<compile_context>
chip_gen: v7x
topology: tpu7x:2x2x1
jax: 0.10.0
libtpu: 0.0.40
codegen_flags: <defaults>
</compile_context>

<pallas_src>
import functools

import jax
import jax.numpy as jnp
from jax.experimental import pallas as pl
from jax.experimental.pallas import tpu as pltpu


# ----------------------------------------------------------------------------
# In-kernel helpers
# ----------------------------------------------------------------------------
def _ln(x, g, b, eps):
    mu = jnp.mean(x, axis=-1, keepdims=True)
    var = jnp.mean(jnp.square(x - mu), axis=-1, keepdims=True)
    return (x - mu) * jax.lax.rsqrt(var + eps) * g + b


# ----------------------------------------------------------------------------
# Fused kernel: embedding LN -> L encoder layers -> fc + tanh
# ----------------------------------------------------------------------------
def _encoder_stack_kernel(x_ref, mask_ref,
                          emb_g_ref, emb_b_ref,
                          wqkv_ref, bqkv_ref, wo_ref, bo_ref,
                          ln1g_ref, ln1b_ref, w1_ref, b1_ref,
                          w2_ref, b2_ref, ln2g_ref, ln2b_ref,
                          fc_w_ref, fc_b_ref,
                          o_ref, *, n_layers, n_seq, seq, nh, hp, hd, eps):
    # One grid step == n_seq sequences: x is (n_seq*seq, H), mask is (n_seq,1,seq).
    x = _ln(x_ref[...].astype(jnp.float32), emb_g_ref[...], emb_b_ref[...], eps)

    q_off = 0
    k_off = nh * hp
    v_off = 2 * nh * hp

    for l in range(n_layers):                      # static unroll over layers
        # ---- fused QKV projection (bf16 in, f32 acc); cast once, slice lazily ----
        xb = x.astype(jnp.bfloat16)
        qkv = jnp.dot(xb, wqkv_ref[l],
                      preferred_element_type=jnp.float32) + bqkv_ref[l]
        qkv_b = qkv.astype(jnp.bfloat16)

        # ---- per-sequence, per-head attention (static slices, f32 softmax) ----
        # NOTE: at larger S, tile this loop / slice q,k,v lazily to limit vreg
        # pressure (see review); at S=8 everything fits in registers.
        ctx_rows = []
        for b in range(n_seq):
            r0 = b * seq
            mask_b = mask_ref[b]                   # (1, seq) additive, f32
            heads = []
            for h in range(nh):
                qh = qkv_b[r0:r0 + seq, q_off + h * hp: q_off + (h + 1) * hp]
                kh = qkv_b[r0:r0 + seq, k_off + h * hp: k_off + (h + 1) * hp]
                vh = qkv_b[r0:r0 + seq, v_off + h * hd: v_off + (h + 1) * hd]
                # q . k^T without materializing the transpose (no XLU transpose).
                s = jax.lax.dot_general(
                    qh, kh, dimension_numbers=(((1,), (1,)), ((), ())),
                    preferred_element_type=jnp.float32) + mask_b       # (seq, seq)
                s = s - jnp.max(s, axis=-1, keepdims=True)
                p = jnp.exp(s)
                p = p * pl.reciprocal(jnp.sum(p, axis=-1, keepdims=True),
                                      approx=True)
                heads.append(jnp.dot(p.astype(jnp.bfloat16), vh,
                                     preferred_element_type=jnp.float32))
            ctx_rows.append(jnp.concatenate(heads, axis=-1))           # (seq, H)
        ctx = jnp.concatenate(ctx_rows, axis=0)                        # (M, H)

        # ---- attention output projection + residual + LN ----
        attn = jnp.dot(ctx.astype(jnp.bfloat16), wo_ref[l],
                       preferred_element_type=jnp.float32) + bo_ref[l]
        x = _ln(x + attn, ln1g_ref[l], ln1b_ref[l], eps)

        # ---- FFN + residual + LN ----
        ff = jnp.dot(x.astype(jnp.bfloat16), w1_ref[l],
                     preferred_element_type=jnp.float32) + b1_ref[l]
        ff = jax.nn.gelu(ff)   # TODO(synk): HF BERT uses exact (erf) gelu; tanh approx used here.
        ff = jnp.dot(ff.astype(jnp.bfloat16), w2_ref[l],
                     preferred_element_type=jnp.float32) + b2_ref[l]
        x = _ln(x + ff, ln2g_ref[l], ln2b_ref[l], eps)

    # ---- fc + tanh epilogue (computed once; NOT repeated per vocab tile) ----
    hfc = jnp.tanh(jnp.dot(x.astype(jnp.bfloat16), fc_w_ref[...],
                           preferred_element_type=jnp.float32) + fc_b_ref[...])
    o_ref[...] = hfc.astype(o_ref.dtype)


def _vocab_kernel(x_ref, w_ref, b_ref, o_ref):
    # One V-tile of the vocab projection; activations resident, weight streams.
    y = jnp.dot(x_ref[...], w_ref[...],
                preferred_element_type=jnp.float32) + b_ref[...]
    o_ref[...] = y.astype(o_ref.dtype)


# ----------------------------------------------------------------------------
# Pallas wrappers
# ----------------------------------------------------------------------------
def _round_up(n, m):
    return ((n + m - 1) // m) * m


def encoder_stack(x, mask_add, pp, *, batch, seq, heads, hp, eps=1e-12):
    M, H = x.shape
    L, _, WQ = pp["wqkv"].shape
    FF = pp["w1"].shape[-1]
    hd = H // heads

    # Largest divisor of batch with <= 512 rows per grid step (bigger M per GEMM).
    seq_per_block = 1
    for c in range(batch, 0, -1):
        if batch % c == 0 and c * seq <= 512:
            seq_per_block = c
            break
    grid = (batch // seq_per_block,)
    bm = seq_per_block * seq

    kernel = functools.partial(
        _encoder_stack_kernel, n_layers=L, n_seq=seq_per_block, seq=seq,
        nh=heads, hp=hp, hd=hd, eps=eps)

    # NOTE (v7x @ BERT-base scale): resident bf16 layer weights should be
    # single-buffered (constant index_map) and the FFN tiled over FF with an
    # "arbitrary" reduction axis; at this config total weights are < 1 MB.
    return pl.pallas_call(
        kernel,
        out_shape=jax.ShapeDtypeStruct((M, H), jnp.bfloat16),
        grid=grid,
        in_specs=[
            pl.BlockSpec((bm, H), lambda i: (i, 0)),                 # x (batch block)
            pl.BlockSpec((seq_per_block, 1, seq), lambda i: (i, 0, 0)),  # additive mask
            pl.BlockSpec((1, H), lambda i: (0, 0)),                  # emb LN gamma
            pl.BlockSpec((1, H), lambda i: (0, 0)),                  # emb LN beta
            pl.BlockSpec((L, H, WQ), lambda i: (0, 0, 0)),           # packed wqkv
            pl.BlockSpec((L, 1, WQ), lambda i: (0, 0, 0)),           # packed bqkv
            pl.BlockSpec((L, H, H), lambda i: (0, 0, 0)),            # wo
            pl.BlockSpec((L, 1, H), lambda i: (0, 0, 0)),            # bo
            pl.BlockSpec((L, 1, H), lambda i: (0, 0, 0)),            # ln1 gamma
            pl.BlockSpec((L, 1, H), lambda i: (0, 0, 0)),            # ln1 beta
            pl.BlockSpec((L, H, FF), lambda i: (0, 0, 0)),           # w1
            pl.BlockSpec((L, 1, FF), lambda i: (0, 0, 0)),           # b1
            pl.BlockSpec((L, FF, H), lambda i: (0, 0, 0)),           # w2
            pl.BlockSpec((L, 1, H), lambda i: (0, 0, 0)),            # b2
            pl.BlockSpec((L, 1, H), lambda i: (0, 0, 0)),            # ln2 gamma
            pl.BlockSpec((L, 1, H), lambda i: (0, 0, 0)),            # ln2 beta
            pl.BlockSpec((H, H), lambda i: (0, 0)),                  # fc weight
            pl.BlockSpec((1, H), lambda i: (0, 0)),                  # fc bias
        ],
        out_specs=pl.BlockSpec((bm, H), lambda i: (i, 0)),
        compiler_params=pltpu.CompilerParams(
            dimension_semantics=("parallel",),
            vmem_limit_bytes=32 * 1024 * 1024),
    )(x, mask_add, pp["emb_ln_g"], pp["emb_ln_b"],
      pp["wqkv"], pp["bqkv"], pp["wo"], pp["bo"],
      pp["ln1_g"], pp["ln1_b"], pp["w1"], pp["b1"],
      pp["w2"], pp["b2"], pp["ln2_g"], pp["ln2_b"],
      pp["fc_w"], pp["fc_b"])


def vocab_head(h, out_w, out_b, *, vocab, block_v):
    M, H = h.shape
    Vp = out_w.shape[1]
    assert Vp % block_v == 0
    logits = pl.pallas_call(
        _vocab_kernel,
        out_shape=jax.ShapeDtypeStruct((M, Vp), jnp.float32),
        grid=(Vp // block_v,),
        in_specs=[
            pl.BlockSpec((M, H), lambda j: (0, 0)),       # tanh(fc(.)) activations (resident)
            pl.BlockSpec((H, block_v), lambda j: (0, j)),  # vocab weight tile
            pl.BlockSpec((1, block_v), lambda j: (0, j)),  # vocab bias tile
        ],
        out_specs=pl.BlockSpec((M, block_v), lambda j: (0, j)),
        compiler_params=pltpu.CompilerParams(dimension_semantics=("parallel",)),
    )(h, out_w, out_b)
    return logits[:, :vocab]


# ----------------------------------------------------------------------------
# Synthetic BERT config / params (deterministic init)
# ----------------------------------------------------------------------------
CFG = dict(hidden=128, heads=2, layers=2, intermediate=256,
           vocab=256, max_pos=64, type_vocab=2)
BLOCK_V = 256   # MXU-N-wide vocab tile (multiple of 128; 256 fills v6e/v7x MXU)


def init_params(key, cfg):
    H, FF, V = cfg["hidden"], cfg["intermediate"], cfg["vocab"]

    def nrm(k, shape):
        return (0.02 * jax.random.normal(k, shape)).astype(jnp.float32)

    keys = iter(jax.random.split(key, 64))
    p = {
        "word_emb": nrm(next(keys), (V, H)),
        "pos_emb": nrm(next(keys), (cfg["max_pos"], H)),
        "type_emb": nrm(next(keys), (cfg["type_vocab"], H)),
        "emb_ln_g": jnp.ones((H,), jnp.float32),
        "emb_ln_b": jnp.zeros((H,), jnp.float32),
        "layers": [],
        "fc_w": nrm(next(keys), (H, H)),
        "fc_b": jnp.zeros((H,), jnp.float32),
        "out_w": nrm(next(keys), (H, V)),
        "out_b": jnp.zeros((V,), jnp.float32),
    }
    for _ in range(cfg["layers"]):
        p["layers"].append({
            "wq": nrm(next(keys), (H, H)), "bq": jnp.zeros((H,), jnp.float32),
            "wk": nrm(next(keys), (H, H)), "bk": jnp.zeros((H,), jnp.float32),
            "wv": nrm(next(keys), (H, H)), "bv": jnp.zeros((H,), jnp.float32),
            "wo": nrm(next(keys), (H, H)), "bo": jnp.zeros((H,), jnp.float32),
            "ln1_g": jnp.ones((H,), jnp.float32), "ln1_b": jnp.zeros((H,), jnp.float32),
            "w1": nrm(next(keys), (H, FF)), "b1": jnp.zeros((FF,), jnp.float32),
            "w2": nrm(next(keys), (FF, H)), "b2": jnp.zeros((H,), jnp.float32),
            "ln2_g": jnp.ones((H,), jnp.float32), "ln2_b": jnp.zeros((H,), jnp.float32),
        })
    return p


def prepare_params(params, cfg):
    """One-time weight packing: fused+padded QKV, folded 1/sqrt(hd) scale,
    stacked (L,...) layer tensors, bf16 weight casts, padded vocab weight."""
    H, nh = cfg["hidden"], cfg["heads"]
    hd = H // nh
    hp = _round_up(hd, 128)                 # per-head Q/K width padded to full lanes
    scale = float(hd) ** -0.5

    def pad_heads(w, b):
        wcols, bcols = [], []
        for h in range(nh):
            wcols.append(w[:, h * hd:(h + 1) * hd])
            bcols.append(b[h * hd:(h + 1) * hd])
            if hp > hd:
                wcols.append(jnp.zeros((H, hp - hd), w.dtype))
                bcols.append(jnp.zeros((hp - hd,), b.dtype))
        return jnp.concatenate(wcols, axis=1), jnp.concatenate(bcols)

    wqkv, bqkv, wo, bo = [], [], [], []
    ln1g, ln1b, w1, b1, w2, b2, ln2g, ln2b = ([] for _ in range(8))
    for lyr in params["layers"]:
        wq_p, bq_p = pad_heads(lyr["wq"] * scale, lyr["bq"] * scale)   # fold 1/sqrt(hd)
        wk_p, bk_p = pad_heads(lyr["wk"], lyr["bk"])
        wqkv.append(jnp.concatenate([wq_p, wk_p, lyr["wv"]], axis=1).astype(jnp.bfloat16))
        bqkv.append(jnp.concatenate([bq_p, bk_p, lyr["bv"]]).astype(jnp.float32))
        wo.append(lyr["wo"].astype(jnp.bfloat16)); bo.append(lyr["bo"])
        ln1g.append(lyr["ln1_g"]); ln1b.append(lyr["ln1_b"])
        w1.append(lyr["w1"].astype(jnp.bfloat16)); b1.append(lyr["b1"])
        w2.append(lyr["w2"].astype(jnp.bfloat16)); b2.append(lyr["b2"])
        ln2g.append(lyr["ln2_g"]); ln2b.append(lyr["ln2_b"])

    def stack_vec(xs):                       # -> (L, 1, X)
        return jnp.stack([x.reshape(1, -1) for x in xs], axis=0)

    V = cfg["vocab"]
    Vp = _round_up(V, BLOCK_V)
    out_w, out_b = params["out_w"], params["out_b"]
    if Vp > V:
        out_w = jnp.concatenate([out_w, jnp.zeros((H, Vp - V), out_w.dtype)], axis=1)
        out_b = jnp.concatenate([out_b, jnp.zeros((Vp - V,), out_b.dtype)])

    return dict(
        word_emb=params["word_emb"], pos_emb=params["pos_emb"],
        type_emb=params["type_emb"],
        emb_ln_g=params["emb_ln_g"].reshape(1, H),
        emb_ln_b=params["emb_ln_b"].reshape(1, H),
        wqkv=jnp.stack(wqkv), bqkv=stack_vec(bqkv),
        wo=jnp.stack(wo), bo=stack_vec(bo),
        ln1_g=stack_vec(ln1g), ln1_b=stack_vec(ln1b),
        w1=jnp.stack(w1), b1=stack_vec(b1),
        w2=jnp.stack(w2), b2=stack_vec(b2),
        ln2_g=stack_vec(ln2g), ln2_b=stack_vec(ln2b),
        fc_w=params["fc_w"].astype(jnp.bfloat16),
        fc_b=params["fc_b"].reshape(1, H),
        out_w=out_w.astype(jnp.bfloat16),
        out_b=out_b.reshape(1, Vp),
    )


# ----------------------------------------------------------------------------
# Forward pass (== TextCorrectionModel.forward)
# ----------------------------------------------------------------------------
def text_correction_forward(pp, input_ids, attention_mask, token_type_ids, cfg):
    B, S = input_ids.shape
    H, nH, V = cfg["hidden"], cfg["heads"], cfg["vocab"]
    hp = _round_up(H // nH, 128)

    # --- BERT embeddings (gathers are JAX glue) ---
    pos_ids = jnp.arange(S, dtype=jnp.int32)[None, :]
    emb = (pp["word_emb"][input_ids]
           + pp["pos_emb"][pos_ids]
           + pp["type_emb"][token_type_ids])
    x = emb.reshape(B * S, H).astype(jnp.float32)

    # additive attention mask (B, 1, S) -- broadcast happens inside the kernel.
    mask_add = ((1.0 - attention_mask.astype(jnp.float32)) * -1e9).reshape(B, 1, S)

    # --- fused: embedding LN -> all encoder layers -> fc + tanh ---
    h = encoder_stack(x, mask_add, pp, batch=B, seq=S, heads=nH, hp=hp)

    # --- V-tiled vocab projection ---
    logits = vocab_head(h, pp["out_w"], pp["out_b"], vocab=V, block_v=BLOCK_V)
    return logits.reshape(B, S, V)


# ----------------------------------------------------------------------------
if __name__ == "__main__":
    B, S = 2, 8
    key = jax.random.PRNGKey(0)
    k_param, k_ids = jax.random.split(key)

    params = init_params(k_param, CFG)
    packed = prepare_params(params, CFG)     # one-time packing / bf16 casting

    input_ids = jax.random.randint(k_ids, (B, S), 0, CFG["vocab"], dtype=jnp.int32)
    attention_mask = jnp.ones((B, S), dtype=jnp.int32)
    token_type_ids = jnp.zeros((B, S), dtype=jnp.int32)

    fwd = jax.jit(functools.partial(text_correction_forward, cfg=CFG))
    out = fwd(packed, input_ids, attention_mask, token_type_ids)
    out = jax.block_until_ready(out)

    assert out.shape == (B, S, CFG["vocab"])
    assert bool(jnp.all(jnp.isfinite(out)))
    print("KERNEL_OK")
</pallas_src>

<mosaic_0001>
module attributes {stable_mosaic.version = 11 : i64} {
  func.func @_vocab_kernel(%arg0: i32, %arg1: memref<16x128xbf16, #tpu.memory_space<vmem>>, %arg2: memref<128x256xbf16, #tpu.memory_space<vmem>>, %arg3: memref<1x256xf32, #tpu.memory_space<vmem>>, %arg4: memref<16x256xf32, #tpu.memory_space<vmem>>) attributes {dimension_semantics = [#tpu.dimension_semantics<parallel>], iteration_bounds = array<i64: 1>, scalar_prefetch = 0 : i64, scratch_operands = 0 : i64, tpu.core_type = #tpu.core_type<tc>, window_params = [{pipeline_mode = #tpu.pipeline_mode<synchronous>, transform_indices = @transform_0, window_bounds = array<i64: 16, 128>}, {transform_indices = @transform_1, window_bounds = array<i64: 128, 256>}, {transform_indices = @transform_2, window_bounds = array<i64: 1, 256>}, {transform_indices = @transform_3, window_bounds = array<i64: 16, 256>}]} {
    %c0 = arith.constant 0 : index
    %c0_0 = arith.constant 0 : index
    %0 = vector.load %arg1[%c0, %c0_0] : memref<16x128xbf16, #tpu.memory_space<vmem>>, vector<16x128xbf16>
    %c0_1 = arith.constant 0 : index
    %c0_2 = arith.constant 0 : index
    %1 = vector.load %arg2[%c0_1, %c0_2] : memref<128x256xbf16, #tpu.memory_space<vmem>>, vector<128x256xbf16>
    %cst = arith.constant dense<0.000000e+00> : vector<16x256xf32>
    %2 = tpu.matmul %0, %1, %cst {dimension_numbers = #tpu.dot_dimension_numbers<[1], [0], [0], [1], [0, 0, 1, 1], [], []>} : vector<16x128xbf16>, vector<128x256xbf16>, vector<16x256xf32> -> vector<16x256xf32>
    %c0_3 = arith.constant 0 : index
    %c0_4 = arith.constant 0 : index
    %3 = vector.load %arg3[%c0_3, %c0_4] : memref<1x256xf32, #tpu.memory_space<vmem>>, vector<1x256xf32>
    %4 = vector.broadcast %3 : vector<1x256xf32> to vector<16x256xf32>
    %5 = arith.addf %2, %4 : vector<16x256xf32>
    %c0_5 = arith.constant 0 : index
    %c0_6 = arith.constant 0 : index
    %6 = vector.load %arg4[%c0_5, %c0_6] : memref<16x256xf32, #tpu.memory_space<vmem>>, vector<16x256xf32>
    tpu.vector_store %arg4[%c0_5, %c0_6], %5 {strides = array<i32>} : memref<16x256xf32, #tpu.memory_space<vmem>>, vector<16x256xf32>,
    return
  }
  func.func @transform_0(%arg0: i32) -> (i32, i32) {
    %c0_i32 = arith.constant 0 : i32
    %c0_i32_0 = arith.constant 0 : i32
    %c0_i32_1 = arith.constant 0 : i32
    return %c0_i32, %c0_i32_0 : i32, i32
  }
  func.func @transform_1(%arg0: i32) -> (i32, i32) {
    %c0_i32 = arith.constant 0 : i32
    %c0_i32_0 = arith.constant 0 : i32
    return %c0_i32, %arg0 : i32, i32
  }
  func.func @transform_2(%arg0: i32) -> (i32, i32) {
    %c0_i32 = arith.constant 0 : i32
    %c0_i32_0 = arith.constant 0 : i32
    return %c0_i32, %arg0 : i32, i32
  }
  func.func @transform_3(%arg0: i32) -> (i32, i32) {
    %c0_i32 = arith.constant 0 : i32
    %c0_i32_0 = arith.constant 0 : i32
    return %c0_i32, %arg0 : i32, i32
  }
}

module attributes {stable_mosaic.version = 11 : i64} {
  func.func @_encoder_stack_kernel(%arg0: i32, %arg1: memref<16x128xf32, #tpu.memory_space<vmem>>, %arg2: memref<2x1x8xf32, #tpu.memory_space<vmem>>, %arg3: memref<1x128xf32, #tpu.memory_space<vmem>>, %arg4: memref<1x128xf32, #tpu.memory_space<vmem>>, %arg5: memref<2x128x640xbf16, #tpu.memory_space<vmem>>, %arg6: memref<2x1x640xf32, #tpu.memory_space<vmem>>, %arg7: memref<2x128x128xbf16, #tpu.memory_space<vmem>>, %arg8: memref<2x1x128xf32, #tpu.memory_space<vmem>>, %arg9: memref<2x1x128xf32, #tpu.memory_space<vmem>>, %arg10: memref<2x1x128xf32, #tpu.memory_space<vmem>>, %arg11: memref<2x128x256xbf16, #tpu.memory_space<vmem>>, %arg12: memref<2x1x256xf32, #tpu.memory_space<vmem>>, %arg13: memref<2x256x128xbf16, #tpu.memory_space<vmem>>, %arg14: memref<2x1x128xf32, #tpu.memory_space<vmem>>, %arg15: memref<2x1x128xf32, #tpu.memory_space<vmem>>, %arg16: memref<2x1x128xf32, #tpu.memory_space<vmem>>, %arg17: memref<128x128xbf16, #tpu.memory_space<vmem>>, %arg18: memref<1x128xf32, #tpu.memory_space<vmem>>, %arg19: memref<16x128xbf16, #tpu.memory_space<vmem>>) attributes {dimension_semantics = [#tpu.dimension_semantics<parallel>], iteration_bounds = array<i64: 1>, scalar_prefetch = 0 : i64, scratch_operands = 0 : i64, tpu.core_type = #tpu.core_type<tc>, window_params = [{transform_indices = @transform_0, window_bounds = array<i64: 16, 128>}, {transform_indices = @transform_1, window_bounds = array<i64: 2, 1, 8>}, {pipeline_mode = #tpu.pipeline_mode<synchronous>, transform_indices = @transform_2, window_bounds = array<i64: 1, 128>}, {pipeline_mode = #tpu.pipeline_mode<synchronous>, transform_indices = @transform_3, window_bounds = array<i64: 1, 128>}, {pipeline_mode = #tpu.pipeline_mode<synchronous>, transform_indices = @transform_4, window_bounds = array<i64: 2, 128, 640>}, {pipeline_mode = #tpu.pipeline_mode<synchronous>, transform_indices = @transform_5, window_bounds = array<i64: 2, 1, 640>}, {pipeline_mode = #tpu.pipeline_mode<synchronous>, transform_indices = @transform_6, window_bounds = array<i64: 2, 128, 128>}, {pipeline_mode = #tpu.pipeline_mode<synchronous>, transform_indices = @transform_7, window_bounds = array<i64: 2, 1, 128>}, {pipeline_mode = #tpu.pipeline_mode<synchronous>, transform_indices = @transform_8, window_bounds = array<i64: 2, 1, 128>}, {pipeline_mode = #tpu.pipeline_mode<synchronous>, transform_indices = @transform_9, window_bounds = array<i64: 2, 1, 128>}, {pipeline_mode = #tpu.pipeline_mode<synchronous>, transform_indices = @transform_10, window_bounds = array<i64: 2, 128, 256>}, {pipeline_mode = #tpu.pipeline_mode<synchronous>, transform_indices = @transform_11, window_bounds = array<i64: 2, 1, 256>}, {pipeline_mode = #tpu.pipeline_mode<synchronous>, transform_indices = @transform_12, window_bounds = array<i64: 2, 256, 128>}, {pipeline_mode = #tpu.pipeline_mode<synchronous>, transform_indices = @transform_13, window_bounds = array<i64: 2, 1, 128>}, {pipeline_mode = #tpu.pipeline_mode<synchronous>, transform_indices = @transform_14, window_bounds = array<i64: 2, 1, 128>}, {pipeline_mode = #tpu.pipeline_mode<synchronous>, transform_indices = @transform_15, window_bounds = array<i64: 2, 1, 128>}, {pipeline_mode = #tpu.pipeline_mode<synchronous>, transform_indices = @transform_16, window_bounds = array<i64: 128, 128>}, {pipeline_mode = #tpu.pipeline_mode<synchronous>, transform_indices = @transform_17, window_bounds = array<i64: 1, 128>}, {transform_indices = @transform_18, window_bounds = array<i64: 16, 128>}]} {
    %c0 = arith.constant 0 : index
    %c0_0 = arith.constant 0 : index
    %0 = vector.load %arg1[%c0, %c0_0] : memref<16x128xf32, #tpu.memory_space<vmem>>, vector<16x128xf32>
    %c0_1 = arith.constant 0 : index
    %c0_2 = arith.constant 0 : index
    %1 = vector.load %arg3[%c0_1, %c0_2] : memref<1x128xf32, #tpu.memory_space<vmem>>, vector<1x128xf32>
    %c0_3 = arith.constant 0 : index
    %c0_4 = arith.constant 0 : index
    %2 = vector.load %arg4[%c0_3, %c0_4] : memref<1x128xf32, #tpu.memory_space<vmem>>, vector<1x128xf32>
    %cst = arith.constant dense<0.000000e+00> : vector<16xf32>
    %3 = vector.multi_reduction <add>, %0, %cst [1] : vector<16x128xf32> to vector<16xf32>
    %4 = vector.shape_cast %3 : vector<16xf32> to vector<16x1xf32>
    %cst_5 = arith.constant 1.280000e+02 : f32
    %5 = vector.broadcast %cst_5 : f32 to vector<16x1xf32>
    %6 = arith.divf %4, %5 : vector<16x1xf32>
    %7 = vector.broadcast %6 : vector<16x1xf32> to vector<16x128xf32>
    %8 = arith.subf %0, %7 : vector<16x128xf32>
    %9 = arith.mulf %8, %8 : vector<16x128xf32>
    %cst_6 = arith.constant dense<0.000000e+00> : vector<16xf32>
    %10 = vector.multi_reduction <add>, %9, %cst_6 [1] : vector<16x128xf32> to vector<16xf32>
    %11 = vector.shape_cast %10 : vector<16xf32> to vector<16x1xf32>
    %cst_7 = arith.constant 1.280000e+02 : f32
    %12 = vector.broadcast %cst_7 : f32 to vector<16x1xf32>
    %13 = arith.divf %11, %12 : vector<16x1xf32>
    %14 = vector.broadcast %6 : vector<16x1xf32> to vector<16x128xf32>
    %15 = arith.subf %0, %14 : vector<16x128xf32>
    %cst_8 = arith.constant 9.99999996E-13 : f32
    %16 = vector.broadcast %cst_8 : f32 to vector<16x1xf32>
    %17 = arith.addf %13, %16 : vector<16x1xf32>
    %18 = math.rsqrt %17 : vector<16x1xf32>
    %19 = vector.broadcast %18 : vector<16x1xf32> to vector<16x128xf32>
    %20 = arith.mulf %15, %19 : vector<16x128xf32>
    %21 = vector.broadcast %1 : vector<1x128xf32> to vector<16x128xf32>
    %22 = arith.mulf %20, %21 : vector<16x128xf32>
    %23 = vector.broadcast %2 : vector<1x128xf32> to vector<16x128xf32>
    %24 = arith.addf %22, %23 : vector<16x128xf32>
    %25 = arith.truncf %24 : vector<16x128xf32> to vector<16x128xbf16>
    %c0_9 = arith.constant 0 : index
    %c0_10 = arith.constant 0 : index
    %c0_11 = arith.constant 0 : index
    %26 = vector.load %arg5[%c0_9, %c0_10, %c0_11] : memref<2x128x640xbf16, #tpu.memory_space<vmem>>, vector<1x128x640xbf16>
    %27 = vector.shape_cast %26 : vector<1x128x640xbf16> to vector<128x640xbf16>
    %cst_12 = arith.constant dense<0.000000e+00> : vector<16x640xf32>
    %28 = tpu.matmul %25, %27, %cst_12 {dimension_numbers = #tpu.dot_dimension_numbers<[1], [0], [0], [1], [0, 0, 1, 1], [], []>} : vector<16x128xbf16>, vector<128x640xbf16>, vector<16x640xf32> -> vector<16x640xf32>
    %c0_13 = arith.constant 0 : index
    %c0_14 = arith.constant 0 : index
    %c0_15 = arith.constant 0 : index
    %29 = vector.load %arg6[%c0_13, %c0_14, %c0_15] : memref<2x1x640xf32, #tpu.memory_space<vmem>>, vector<1x1x640xf32>
    %30 = vector.shape_cast %29 : vector<1x1x640xf32> to vector<1x640xf32>
    %31 = vector.broadcast %30 : vector<1x640xf32> to vector<16x640xf32>
    %32 = arith.addf %28, %31 : vector<16x640xf32>
    %33 = arith.truncf %32 : vector<16x640xf32> to vector<16x640xbf16>
    %c0_16 = arith.constant 0 : index
    %c0_17 = arith.constant 0 : index
    %c0_18 = arith.constant 0 : index
    %34 = vector.load %arg2[%c0_16, %c0_17, %c0_18] : memref<2x1x8xf32, #tpu.memory_space<vmem>>, vector<1x1x8xf32>
    %35 = vector.shape_cast %34 : vector<1x1x8xf32> to vector<1x8xf32>
    %36 = vector.extract_strided_slice %33 {offsets = [0, 0], sizes = [8, 128], strides = [1, 1]} : vector<16x640xbf16> to vector<8x128xbf16>
    %37 = vector.extract_strided_slice %33 {offsets = [0, 256], sizes = [8, 128], strides = [1, 1]} : vector<16x640xbf16> to vector<8x128xbf16>
    %38 = vector.extract_strided_slice %33 {offsets = [0, 512], sizes = [8, 64], strides = [1, 1]} : vector<16x640xbf16> to vector<8x64xbf16>
    %cst_19 = arith.constant dense<0.000000e+00> : vector<8x8xf32>
    %39 = tpu.matmul %36, %37, %cst_19 {dimension_numbers = #tpu.dot_dimension_numbers<[1], [1], [0], [0], [0, 0, 1, 0], [], []>} : vector<8x128xbf16>, vector<8x128xbf16>, vector<8x8xf32> -> vector<8x8xf32>
    %40 = vector.broadcast %35 : vector<1x8xf32> to vector<8x8xf32>
    %41 = arith.addf %39, %40 : vector<8x8xf32>
    %cst_20 = arith.constant dense<0xFF800000> : vector<8xf32>
    %42 = vector.multi_reduction <maximumf>, %41, %cst_20 [1] : vector<8x8xf32> to vector<8xf32>
    %43 = vector.shape_cast %42 : vector<8xf32> to vector<8x1xf32>
    %44 = vector.broadcast %43 : vector<8x1xf32> to vector<8x8xf32>
    %45 = arith.subf %41, %44 : vector<8x8xf32>
    %46 = math.exp %45 : vector<8x8xf32>
    %cst_21 = arith.constant dense<0.000000e+00> : vector<8xf32>
    %47 = vector.multi_reduction <add>, %46, %cst_21 [1] : vector<8x8xf32> to vector<8xf32>
    %48 = vector.shape_cast %47 : vector<8xf32> to vector<8x1xf32>
    %49 = tpu.reciprocal %48 {approx = true} : vector<8x1xf32> -> vector<8x1xf32>
    %50 = vector.broadcast %49 : vector<8x1xf32> to vector<8x8xf32>
    %51 = arith.mulf %46, %50 : vector<8x8xf32>
    %52 = arith.truncf %51 : vector<8x8xf32> to vector<8x8xbf16>
    %cst_22 = arith.constant dense<0.000000e+00> : vector<8x64xf32>
    %53 = tpu.matmul %52, %38, %cst_22 {dimension_numbers = #tpu.dot_dimension_numbers<[1], [0], [0], [1], [0, 0, 1, 1], [], []>} : vector<8x8xbf16>, vector<8x64xbf16>, vector<8x64xf32> -> vector<8x64xf32>
    %54 = vector.extract_strided_slice %33 {offsets = [0, 128], sizes = [8, 128], strides = [1, 1]} : vector<16x640xbf16> to vector<8x128xbf16>
    %55 = vector.extract_strided_slice %33 {offsets = [0, 384], sizes = [8, 128], strides = [1, 1]} : vector<16x640xbf16> to vector<8x128xbf16>
    %56 = vector.extract_strided_slice %33 {offsets = [0, 576], sizes = [8, 64], strides = [1, 1]} : vector<16x640xbf16> to vector<8x64xbf16>
    %cst_23 = arith.constant dense<0.000000e+00> : vector<8x8xf32>
    %57 = tpu.matmul %54, %55, %cst_23 {dimension_numbers = #tpu.dot_dimension_numbers<[1], [1], [0], [0], [0, 0, 1, 0], [], []>} : vector<8x128xbf16>, vector<8x128xbf16>, vector<8x8xf32> -> vector<8x8xf32>
    %58 = vector.broadcast %35 : vector<1x8xf32> to vector<8x8xf32>
    %59 = arith.addf %57, %58 : vector<8x8xf32>
    %cst_24 = arith.constant dense<0xFF800000> : vector<8xf32>
    %60 = vector.multi_reduction <maximumf>, %59, %cst_24 [1] : vector<8x8xf32> to vector<8xf32>
    %61 = vector.shape_cast %60 : vector<8xf32> to vector<8x1xf32>
    %62 = vector.broadcast %61 : vector<8x1xf32> to vector<8x8xf32>
    %63 = arith.subf %59, %62 : vector<8x8xf32>
    %64 = math.exp %63 : vector<8x8xf32>
    %cst_25 = arith.constant dense<0.000000e+00> : vector<8xf32>
    %65 = vector.multi_reduction <add>, %64, %cst_25 [1] : vector<8x8xf32> to vector<8xf32>
    %66 = vector.shape_cast %65 : vector<8xf32> to vector<8x1xf32>
    %67 = tpu.reciprocal %66 {approx = true} : vector<8x1xf32> -> vector<8x1xf32>
    %68 = vector.broadcast %67 : vector<8x1xf32> to vector<8x8xf32>
    %69 = arith.mulf %64, %68 : vector<8x8xf32>
    %70 = arith.truncf %69 : vector<8x8xf32> to vector<8x8xbf16>
    %cst_26 = arith.constant dense<0.000000e+00> : vector<8x64xf32>
    %71 = tpu.matmul %70, %56, %cst_26 {dimension_numbers = #tpu.dot_dimension_numbers<[1], [0], [0], [1], [0, 0, 1, 1], [], []>} : vector<8x8xbf16>, vector<8x64xbf16>, vector<8x64xf32> -> vector<8x64xf32>
    %72 = tpu.concatenate %53, %71 in 1 : vector<8x64xf32>, vector<8x64xf32> -> vector<8x128xf32>
    %c1 = arith.constant 1 : index
    %c0_27 = arith.constant 0 : index
    %c0_28 = arith.constant 0 : index
    %73 = vector.load %arg2[%c1, %c0_27, %c0_28] : memref<2x1x8xf32, #tpu.memory_space<vmem>>, vector<1x1x8xf32>
    %74 = vector.shape_cast %73 : vector<1x1x8xf32> to vector<1x8xf32>
    %75 = vector.extract_strided_slice %33 {offsets = [8, 0], sizes = [8, 128], strides = [1, 1]} : vector<16x640xbf16> to vector<8x128xbf16>
    %76 = vector.extract_strided_slice %33 {offsets = [8, 256], sizes = [8, 128], strides = [1, 1]} : vector<16x640xbf16> to vector<8x128xbf16>
    %77 = vector.extract_strided_slice %33 {offsets = [8, 512], sizes = [8, 64], strides = [1, 1]} : vector<16x640xbf16> to vector<8x64xbf16>
    %cst_29 = arith.constant dense<0.000000e+00> : vector<8x8xf32>
    %78 = tpu.matmul %75, %76, %cst_29 {dimension_numbers = #tpu.dot_dimension_numbers<[1], [1], [0], [0], [0, 0, 1, 0], [], []>} : vector<8x128xbf16>, vector<8x128xbf16>, vector<8x8xf32> -> vector<8x8xf32>
    %79 = vector.broadcast %74 : vector<1x8xf32> to vector<8x8xf32>
    %80 = arith.addf %78, %79 : vector<8x8xf32>
    %cst_30 = arith.constant dense<0xFF800000> : vector<8xf32>
    %81 = vector.multi_reduction <maximumf>, %80, %cst_30 [1] : vector<8x8xf32> to vector<8xf32>
    %82 = vector.shape_cast %81 : vector<8xf32> to vector<8x1xf32>
    %83 = vector.broadcast %82 : vector<8x1xf32> to vector<8x8xf32>
    %84 = arith.subf %80, %83 : vector<8x8xf32>
    %85 = math.exp %84 : vector<8x8xf32>
    %cst_31 = arith.constant dense<0.000000e+00> : vector<8xf32>
    %86 = vector.multi_reduction <add>, %85, %cst_31 [1] : vector<8x8xf32> to vector<8xf32>
    %87 = vector.shape_cast %86 : vector<8xf32> to vector<8x1xf32>
    %88 = tpu.reciprocal %87 {approx = true} : vector<8x1xf32> -> vector<8x1xf32>
    %89 = vector.broadcast %88 : vector<8x1xf32> to vector<8x8xf32>
    %90 = arith.mulf %85, %89 : vector<8x8xf32>
    %91 = arith.truncf %90 : vector<8x8xf32> to vector<8x8xbf16>
    %cst_32 = arith.constant dense<0.000000e+00> : vector<8x64xf32>
    %92 = tpu.matmul %91, %77, %cst_32 {dimension_numbers = #tpu.dot_dimension_numbers<[1], [0], [0], [1], [0, 0, 1, 1], [], []>} : vector<8x8xbf16>, vector<8x64xbf16>, vector<8x64xf32> -> vector<8x64xf32>
    %93 = vector.extract_strided_slice %33 {offsets = [8, 128], sizes = [8, 128], strides = [1, 1]} : vector<16x640xbf16> to vector<8x128xbf16>
    %94 = vector.extract_strided_slice %33 {offsets = [8, 384], sizes = [8, 128], strides = [1, 1]} : vector<16x640xbf16> to vector<8x128xbf16>
    %95 = vector.extract_strided_slice %33 {offsets = [8, 576], sizes = [8, 64], strides = [1, 1]} : vector<16x640xbf16> to vector<8x64xbf16>
    %cst_33 = arith.constant dense<0.000000e+00> : vector<8x8xf32>
    %96 = tpu.matmul %93, %94, %cst_33 {dimension_numbers = #tpu.dot_dimension_numbers<[1], [1], [0], [0], [0, 0, 1, 0], [], []>} : vector<8x128xbf16>, vector<8x128xbf16>, vector<8x8xf32> -> vector<8x8xf32>
    %97 = vector.broadcast %74 : vector<1x8xf32> to vector<8x8xf32>
    %98 = arith.addf %96, %97 : vector<8x8xf32>
    %cst_34 = arith.constant dense<0xFF800000> : vector<8xf32>
    %99 = vector.multi_reduction <maximumf>, %98, %cst_34 [1] : vector<8x8xf32> to vector<8xf32>
    %100 = vector.shape_cast %99 : vector<8xf32> to vector<8x1xf32>
    %101 = vector.broadcast %100 : vector<8x1xf32> to vector<8x8xf32>
    %102 = arith.subf %98, %101 : vector<8x8xf32>
    %103 = math.exp %102 : vector<8x8xf32>
    %cst_35 = arith.constant dense<0.000000e+00> : vector<8xf32>
    %104 = vector.multi_reduction <add>, %103, %cst_35 [1] : vector<8x8xf32> to vector<8xf32>
    %105 = vector.shape_cast %104 : vector<8xf32> to vector<8x1xf32>
    %106 = tpu.reciprocal %105 {approx = true} : vector<8x1xf32> -> vector<8x1xf32>
    %107 = vector.broadcast %106 : vector<8x1xf32> to vector<8x8xf32>
    %108 = arith.mulf %103, %107 : vector<8x8xf32>
    %109 = arith.truncf %108 : vector<8x8xf32> to vector<8x8xbf16>
    %cst_36 = arith.constant dense<0.000000e+00> : vector<8x64xf32>
    %110 = tpu.matmul %109, %95, %cst_36 {dimension_numbers = #tpu.dot_dimension_numbers<[1], [0], [0], [1], [0, 0, 1, 1], [], []>} : vector<8x8xbf16>, vector<8x64xbf16>, vector<8x64xf32> -> vector<8x64xf32>
    %111 = tpu.concatenate %92, %110 in 1 : vector<8x64xf32>, vector<8x64xf32> -> vector<8x128xf32>
    %112 = tpu.concatenate %72, %111 in 0 : vector<8x128xf32>, vector<8x128xf32> -> vector<16x128xf32>
    %113 = arith.truncf %112 : vector<16x128xf32> to vector<16x128xbf16>
    %c0_37 = arith.constant 0 : index
    %c0_38 = arith.constant 0 : index
    %c0_39 = arith.constant 0 : index
    %114 = vector.load %arg7[%c0_37, %c0_38, %c0_39] : memref<2x128x128xbf16, #tpu.memory_space<vmem>>, vector<1x128x128xbf16>
    %115 = vector.shape_cast %114 : vector<1x128x128xbf16> to vector<128x128xbf16>
    %cst_40 = arith.constant dense<0.000000e+00> : vector<16x128xf32>
    %116 = tpu.matmul %113, %115, %cst_40 {dimension_numbers = #tpu.dot_dimension_numbers<[1], [0], [0], [1], [0, 0, 1, 1], [], []>} : vector<16x128xbf16>, vector<128x128xbf16>, vector<16x128xf32> -> vector<16x128xf32>
    %c0_41 = arith.constant 0 : index
    %c0_42 = arith.constant 0 : index
    %c0_43 = arith.constant 0 : index
    %117 = vector.load %arg8[%c0_41, %c0_42, %c0_43] : memref<2x1x128xf32, #tpu.memory_space<vmem>>, vector<1x1x128xf32>
    %118 = vector.shape_cast %117 : vector<1x1x128xf32> to vector<1x128xf32>
    %119 = vector.broadcast %118 : vector<1x128xf32> to vector<16x128xf32>
    %120 = arith.addf %116, %119 : vector<16x128xf32>
    %121 = arith.addf %24, %120 : vector<16x128xf32>
    %c0_44 = arith.constant 0 : index
    %c0_45 = arith.constant 0 : index
    %c0_46 = arith.constant 0 : index
    %122 = vector.load %arg9[%c0_44, %c0_45, %c0_46] : memref<2x1x128xf32, #tpu.memory_space<vmem>>, vector<1x1x128xf32>
    %123 = vector.shape_cast %122 : vector<1x1x128xf32> to vector<1x128xf32>
    %c0_47 = arith.constant 0 : index
    %c0_48 = arith.constant 0 : index
    %c0_49 = arith.constant 0 : index
    %124 = vector.load %arg10[%c0_47, %c0_48, %c0_49] : memref<2x1x128xf32, #tpu.memory_space<vmem>>, vector<1x1x128xf32>
    %125 = vector.shape_cast %124 : vector<1x1x128xf32> to vector<1x128xf32>
    %cst_50 = arith.constant dense<0.000000e+00> : vector<16xf32>
    %126 = vector.multi_reduction <add>, %121, %cst_50 [1] : vector<16x128xf32> to vector<16xf32>
    %127 = vector.shape_cast %126 : vector<16xf32> to vector<16x1xf32>
    %cst_51 = arith.constant 1.280000e+02 : f32
    %128 = vector.broadcast %cst_51 : f32 to vector<16x1xf32>
    %129 = arith.divf %127, %128 : vector<16x1xf32>
    %130 = vector.broadcast %129 : vector<16x1xf32> to vector<16x128xf32>
    %131 = arith.subf %121, %130 : vector<16x128xf32>
    %132 = arith.mulf %131, %131 : vector<16x128xf32>
    %cst_52 = arith.constant dense<0.000000e+00> : vector<16xf32>
    %133 = vector.multi_reduction <add>, %132, %cst_52 [1] : vector<16x128xf32> to vector<16xf32>
    %134 = vector.shape_cast %133 : vector<16xf32> to vector<16x1xf32>
    %cst_53 = arith.constant 1.280000e+02 : f32
    %135 = vector.broadcast %cst_53 : f32 to vector<16x1xf32>
    %136 = arith.divf %134, %135 : vector<16x1xf32>
    %137 = vector.broadcast %129 : vector<16x1xf32> to vector<16x128xf32>
    %138 = arith.subf %121, %137 : vector<16x128xf32>
    %cst_54 = arith.constant 9.99999996E-13 : f32
    %139 = vector.broadcast %cst_54 : f32 to vector<16x1xf32>
    %140 = arith.addf %136, %139 : vector<16x1xf32>
    %141 = math.rsqrt %140 : vector<16x1xf32>
    %142 = vector.broadcast %141 : vector<16x1xf32> to vector<16x128xf32>
    %143 = arith.mulf %138, %142 : vector<16x128xf32>
    %144 = vector.broadcast %123 : vector<1x128xf32> to vector<16x128xf32>
    %145 = arith.mulf %143, %144 : vector<16x128xf32>
    %146 = vector.broadcast %125 : vector<1x128xf32> to vector<16x128xf32>
    %147 = arith.addf %145, %146 : vector<16x128xf32>
    %148 = arith.truncf %147 : vector<16x128xf32> to vector<16x128xbf16>
    %c0_55 = arith.constant 0 : index
    %c0_56 = arith.constant 0 : index
    %c0_57 = arith.constant 0 : index
    %149 = vector.load %arg11[%c0_55, %c0_56, %c0_57] : memref<2x128x256xbf16, #tpu.memory_space<vmem>>, vector<1x128x256xbf16>
    %150 = vector.shape_cast %149 : vector<1x128x256xbf16> to vector<128x256xbf16>
    %cst_58 = arith.constant dense<0.000000e+00> : vector<16x256xf32>
    %151 = tpu.matmul %148, %150, %cst_58 {dimension_numbers = #tpu.dot_dimension_numbers<[1], [0], [0], [1], [0, 0, 1, 1], [], []>} : vector<16x128xbf16>, vector<128x256xbf16>, vector<16x256xf32> -> vector<16x256xf32>
    %c0_59 = arith.constant 0 : index
    %c0_60 = arith.constant 0 : index
    %c0_61 = arith.constant 0 : index
    %152 = vector.load %arg12[%c0_59, %c0_60, %c0_61] : memref<2x1x256xf32, #tpu.memory_space<vmem>>, vector<1x1x256xf32>
    %153 = vector.shape_cast %152 : vector<1x1x256xf32> to vector<1x256xf32>
    %154 = vector.broadcast %153 : vector<1x256xf32> to vector<16x256xf32>
    %155 = arith.addf %151, %154 : vector<16x256xf32>
    %156 = arith.mulf %155, %155 : vector<16x256xf32>
    %157 = arith.mulf %155, %156 : vector<16x256xf32>
    %cst_62 = arith.constant 4.471500e-02 : f32
    %158 = vector.broadcast %cst_62 : f32 to vector<16x256xf32>
    %159 = arith.mulf %158, %157 : vector<16x256xf32>
    %160 = arith.addf %155, %159 : vector<16x256xf32>
    %cst_63 = arith.constant 0.797884583 : f32
    %161 = vector.broadcast %cst_63 : f32 to vector<16x256xf32>
    %162 = arith.mulf %161, %160 : vector<16x256xf32>
    %163 = math.tanh %162 : vector<16x256xf32>
    %cst_64 = arith.constant 1.000000e+00 : f32
    %164 = vector.broadcast %cst_64 : f32 to vector<16x256xf32>
    %165 = arith.addf %164, %163 : vector<16x256xf32>
    %cst_65 = arith.constant 5.000000e-01 : f32
    %166 = vector.broadcast %cst_65 : f32 to vector<16x256xf32>
    %167 = arith.mulf %166, %165 : vector<16x256xf32>
    %168 = arith.mulf %155, %167 : vector<16x256xf32>
    %169 = arith.truncf %168 : vector<16x256xf32> to vector<16x256xbf16>
    %c0_66 = arith.constant 0 : index
    %c0_67 = arith.constant 0 : index
    %c0_68 = arith.constant 0 : index
    %170 = vector.load %arg13[%c0_66, %c0_67, %c0_68] : memref<2x256x128xbf16, #tpu.memory_space<vmem>>, vector<1x256x128xbf16>
    %171 = vector.shape_cast %170 : vector<1x256x128xbf16> to vector<256x128xbf16>
    %cst_69 = arith.constant dense<0.000000e+00> : vector<16x128xf32>
    %172 = tpu.matmul %169, %171, %cst_69 {dimension_numbers = #tpu.dot_dimension_numbers<[1], [0], [0], [1], [0, 0, 1, 1], [], []>} : vector<16x256xbf16>, vector<256x128xbf16>, vector<16x128xf32> -> vector<16x128xf32>
    %c0_70 = arith.constant 0 : index
    %c0_71 = arith.constant 0 : index
    %c0_72 = arith.constant 0 : index
    %173 = vector.load %arg14[%c0_70, %c0_71, %c0_72] : memref<2x1x128xf32, #tpu.memory_space<vmem>>, vector<1x1x128xf32>
    %174 = vector.shape_cast %173 : vector<1x1x128xf32> to vector<1x128xf32>
    %175 = vector.broadcast %174 : vector<1x128xf32> to vector<16x128xf32>
    %176 = arith.addf %172, %175 : vector<16x128xf32>
    %177 = arith.addf %147, %176 : vector<16x128xf32>
    %c0_73 = arith.constant 0 : index
    %c0_74 = arith.constant 0 : index
    %c0_75 = arith.constant 0 : index
    %178 = vector.load %arg15[%c0_73, %c0_74, %c0_75] : memref<2x1x128xf32, #tpu.memory_space<vmem>>, vector<1x1x128xf32>
    %179 = vector.shape_cast %178 : vector<1x1x128xf32> to vector<1x128xf32>
    %c0_76 = arith.constant 0 : index
    %c0_77 = arith.constant 0 : index
    %c0_78 = arith.constant 0 : index
    %180 = vector.load %arg16[%c0_76, %c0_77, %c0_78] : memref<2x1x128xf32, #tpu.memory_space<vmem>>, vector<1x1x128xf32>
    %181 = vector.shape_cast %180 : vector<1x1x128xf32> to vector<1x128xf32>
    %cst_79 = arith.constant dense<0.000000e+00> : vector<16xf32>
    %182 = vector.multi_reduction <add>, %177, %cst_79 [1] : vector<16x128xf32> to vector<16xf32>
    %183 = vector.shape_cast %182 : vector<16xf32> to vector<16x1xf32>
    %cst_80 = arith.constant 1.280000e+02 : f32
    %184 = vector.broadcast %cst_80 : f32 to vector<16x1xf32>
    %185 = arith.divf %183, %184 : vector<16x1xf32>
    %186 = vector.broadcast %185 : vector<16x1xf32> to vector<16x128xf32>
    %187 = arith.subf %177, %186 : vector<16x128xf32>
    %188 = arith.mulf %187, %187 : vector<16x128xf32>
    %cst_81 = arith.constant dense<0.000000e+00> : vector<16xf32>
    %189 = vector.multi_reduction <add>, %188, %cst_81 [1] : vector<16x128xf32> to vector<16xf32>
    %190 = vector.shape_cast %189 : vector<16xf32> to vector<16x1xf32>
    %cst_82 = arith.constant 1.280000e+02 : f32
    %191 = vector.broadcast %cst_82 : f32 to vector<16x1xf32>
    %192 = arith.divf %190, %191 : vector<16x1xf32>
    %193 = vector.broadcast %185 : vector<16x1xf32> to vector<16x128xf32>
    %194 = arith.subf %177, %193 : vector<16x128xf32>
    %cst_83 = arith.constant 9.99999996E-13 : f32
    %195 = vector.broadcast %cst_83 : f32 to vector<16x1xf32>
    %196 = arith.addf %192, %195 : vector<16x1xf32>
    %197 = math.rsqrt %196 : vector<16x1xf32>
    %198 = vector.broadcast %197 : vector<16x1xf32> to vector<16x128xf32>
    %199 = arith.mulf %194, %198 : vector<16x128xf32>
    %200 = vector.broadcast %179 : vector<1x128xf32> to vector<16x128xf32>
    %201 = arith.mulf %199, %200 : vector<16x128xf32>
    %202 = vector.broadcast %181 : vector<1x128xf32> to vector<16x128xf32>
    %203 = arith.addf %201, %202 : vector<16x128xf32>
    %204 = arith.truncf %203 : vector<16x128xf32> to vector<16x128xbf16>
    %c1_84 = arith.constant 1 : index
    %c0_85 = arith.constant 0 : index
    %c0_86 = arith.constant 0 : index
    %205 = vector.load %arg5[%c1_84, %c0_85, %c0_86] : memref<2x128x640xbf16, #tpu.memory_space<vmem>>, vector<1x128x640xbf16>
    %206 = vector.shape_cast %205 : vector<1x128x640xbf16> to vector<128x640xbf16>
    %cst_87 = arith.constant dense<0.000000e+00> : vector<16x640xf32>
    %207 = tpu.matmul %204, %206, %cst_87 {dimension_numbers = #tpu.dot_dimension_numbers<[1], [0], [0], [1], [0, 0, 1, 1], [], []>} : vector<16x128xbf16>, vector<128x640xbf16>, vector<16x640xf32> -> vector<16x640xf32>
    %c1_88 = arith.constant 1 : index
    %c0_89 = arith.constant 0 : index
    %c0_90 = arith.constant 0 : index
    %208 = vector.load %arg6[%c1_88, %c0_89, %c0_90] : memref<2x1x640xf32, #tpu.memory_space<vmem>>, vector<1x1x640xf32>
    %209 = vector.shape_cast %208 : vector<1x1x640xf32> to vector<1x640xf32>
    %210 = vector.broadcast %209 : vector<1x640xf32> to vector<16x640xf32>
    %211 = arith.addf %207, %210 : vector<16x640xf32>
    %212 = arith.truncf %211 : vector<16x640xf32> to vector<16x640xbf16>
    %c0_91 = arith.constant 0 : index
    %c0_92 = arith.constant 0 : index
    %c0_93 = arith.constant 0 : index
    %213 = vector.load %arg2[%c0_91, %c0_92, %c0_93] : memref<2x1x8xf32, #tpu.memory_space<vmem>>, vector<1x1x8xf32>
    %214 = vector.shape_cast %213 : vector<1x1x8xf32> to vector<1x8xf32>
    %215 = vector.extract_strided_slice %212 {offsets = [0, 0], sizes = [8, 128], strides = [1, 1]} : vector<16x640xbf16> to vector<8x128xbf16>
    %216 = vector.extract_strided_slice %212 {offsets = [0, 256], sizes = [8, 128], strides = [1, 1]} : vector<16x640xbf16> to vector<8x128xbf16>
    %217 = vector.extract_strided_slice %212 {offsets = [0, 512], sizes = [8, 64], strides = [1, 1]} : vector<16x640xbf16> to vector<8x64xbf16>
    %cst_94 = arith.constant dense<0.000000e+00> : vector<8x8xf32>
    %218 = tpu.matmul %215, %216, %cst_94 {dimension_numbers = #tpu.dot_dimension_numbers<[1], [1], [0], [0], [0, 0, 1, 0], [], []>} : vector<8x128xbf16>, vector<8x128xbf16>, vector<8x8xf32> -> vector<8x8xf32>
    %219 = vector.broadcast %214 : vector<1x8xf32> to vector<8x8xf32>
    %220 = arith.addf %218, %219 : vector<8x8xf32>
    %cst_95 = arith.constant dense<0xFF800000> : vector<8xf32>
    %221 = vector.multi_reduction <maximumf>, %220, %cst_95 [1] : vector<8x8xf32> to vector<8xf32>
    %222 = vector.shape_cast %221 : vector<8xf32> to vector<8x1xf32>
    %223 = vector.broadcast %222 : vector<8x1xf32> to vector<8x8xf32>
    %224 = arith.subf %220, %223 : vector<8x8xf32>
    %225 = math.exp %224 : vector<8x8xf32>
    %cst_96 = arith.constant dense<0.000000e+00> : vector<8xf32>
    %226 = vector.multi_reduction <add>, %225, %cst_96 [1] : vector<8x8xf32> to vector<8xf32>
    %227 = vector.shape_cast %226 : vector<8xf32> to vector<8x1xf32>
    %228 = tpu.reciprocal %227 {approx = true} : vector<8x1xf32> -> vector<8x1xf32>
    %229 = vector.broadcast %228 : vector<8x1xf32> to vector<8x8xf32>
    %230 = arith.mulf %225, %229 : vector<8x8xf32>
    %231 = arith.truncf %230 : vector<8x8xf32> to vector<8x8xbf16>
    %cst_97 = arith.constant dense<0.000000e+00> : vector<8x64xf32>
    %232 = tpu.matmul %231, %217, %cst_97 {dimension_numbers = #tpu.dot_dimension_numbers<[1], [0], [0], [1], [0, 0, 1, 1], [], []>} : vector<8x8xbf16>, vector<8x64xbf16>, vector<8x64xf32> -> vector<8x64xf32>
    %233 = vector.extract_strided_slice %212 {offsets = [0, 128], sizes = [8, 128], strides = [1, 1]} : vector<16x640xbf16> to vector<8x128xbf16>
    %234 = vector.extract_strided_slice %212 {offsets = [0, 384], sizes = [8, 128], strides = [1, 1]} : vector<16x640xbf16> to vector<8x128xbf16>
    %235 = vector.extract_strided_slice %212 {offsets = [0, 576], sizes = [8, 64], strides = [1, 1]} : vector<16x640xbf16> to vector<8x64xbf16>
    %cst_98 = arith.constant dense<0.000000e+00> : vector<8x8xf32>
    %236 = tpu.matmul %233, %234, %cst_98 {dimension_numbers = #tpu.dot_dimension_numbers<[1], [1], [0], [0], [0, 0, 1, 0], [], []>} : vector<8x128xbf16>, vector<8x128xbf16>, vector<8x8xf32> -> vector<8x8xf32>
    %237 = vector.broadcast %214 : vector<1x8xf32> to vector<8x8xf32>
    %238 = arith.addf %236, %237 : vector<8x8xf32>
    %cst_99 = arith.constant dense<0xFF800000> : vector<8xf32>
    %239 = vector.multi_reduction <maximumf>, %238, %cst_99 [1] : vector<8x8xf32> to vector<8xf32>
    %240 = vector.shape_cast %239 : vector<8xf32> to vector<8x1xf32>
    %241 = vector.broadcast %240 : vector<8x1xf32> to vector<8x8xf32>
    %242 = arith.subf %238, %241 : vector<8x8xf32>
    %243 = math.exp %242 : vector<8x8xf32>
    %cst_100 = arith.constant dense<0.000000e+00> : vector<8xf32>
    %244 = vector.multi_reduction <add>, %243, %cst_100 [1] : vector<8x8xf32> to vector<8xf32>
    %245 = vector.shape_cast %244 : vector<8xf32> to vector<8x1xf32>
    %246 = tpu.reciprocal %245 {approx = true} : vector<8x1xf32> -> vector<8x1xf32>
    %247 = vector.broadcast %246 : vector<8x1xf32> to vector<8x8xf32>
    %248 = arith.mulf %243, %247 : vector<8x8xf32>
    %249 = arith.truncf %248 : vector<8x8xf32> to vector<8x8xbf16>
    %cst_101 = arith.constant dense<0.000000e+00> : vector<8x64xf32>
    %250 = tpu.matmul %249, %235, %cst_101 {dimension_numbers = #tpu.dot_dimension_numbers<[1], [0], [0], [1], [0, 0, 1, 1], [], []>} : vector<8x8xbf16>, vector<8x64xbf16>, vector<8x64xf32> -> vector<8x64xf32>
    %251 = tpu.concatenate %232, %250 in 1 : vector<8x64xf32>, vector<8x64xf32> -> vector<8x128xf32>
    %c1_102 = arith.constant 1 : index
    %c0_103 = arith.constant 0 : index
    %c0_104 = arith.constant 0 : index
    %252 = vector.load %arg2[%c1_102, %c0_103, %c0_104] : memref<2x1x8xf32, #tpu.memory_space<vmem>>, vector<1x1x8xf32>
    %253 = vector.shape_cast %252 : vector<1x1x8xf32> to vector<1x8xf32>
    %254 = vector.extract_strided_slice %212 {offsets = [8, 0], sizes = [8, 128], strides = [1, 1]} : vector<16x640xbf16> to vector<8x128xbf16>
    %255 = vector.extract_strided_slice %212 {offsets = [8, 256], sizes = [8, 128], strides = [1, 1]} : vector<16x640xbf16> to vector<8x128xbf16>
    %256 = vector.extract_strided_slice %212 {offsets = [8, 512], sizes = [8, 64], strides = [1, 1]} : vector<16x640xbf16> to vector<8x64xbf16>
    %cst_105 = arith.constant dense<0.000000e+00> : vector<8x8xf32>
    %257 = tpu.matmul %254, %255, %cst_105 {dimension_numbers = #tpu.dot_dimension_numbers<[1], [1], [0], [0], [0, 0, 1, 0], [], []>} : vector<8x128xbf16>, vector<8x128xbf16>, vector<8x8xf32> -> vector<8x8xf32>
    %258 = vector.broadcast %253 : vector<1x8xf32> to vector<8x8xf32>
    %259 = arith.addf %257, %258 : vector<8x8xf32>
    %cst_106 = arith.constant dense<0xFF800000> : vector<8xf32>
    %260 = vector.multi_reduction <maximumf>, %259, %cst_106 [1] : vector<8x8xf32> to vector<8xf32>
    %261 = vector.shape_cast %260 : vector<8xf32> to vector<8x1xf32>
    %262 = vector.broadcast %261 : vector<8x1xf32> to vector<8x8xf32>
    %263 = arith.subf %259, %262 : vector<8x8xf32>
    %264 = math.exp %263 : vector<8x8xf32>
    %cst_107 = arith.constant dense<0.000000e+00> : vector<8xf32>
    %265 = vector.multi_reduction <add>, %264, %cst_107 [1] : vector<8x8xf32> to vector<8xf32>
    %266 = vector.shape_cast %265 : vector<8xf32> to vector<8x1xf32>
    %267 = tpu.reciprocal %266 {approx = true} : vector<8x1xf32> -> vector<8x1xf32>
    %268 = vector.broadcast %267 : vector<8x1xf32> to vector<8x8xf32>
    %269 = arith.mulf %264, %268 : vector<8x8xf32>
    %270 = arith.truncf %269 : vector<8x8xf32> to vector<8x8xbf16>
    %cst_108 = arith.constant dense<0.000000e+00> : vector<8x64xf32>
    %271 = tpu.matmul %270, %256, %cst_108 {dimension_numbers = #tpu.dot_dimension_numbers<[1], [0], [0], [1], [0, 0, 1, 1], [], []>} : vector<8x8xbf16>, vector<8x64xbf16>, vector<8x64xf32> -> vector<8x64xf32>
    %272 = vector.extract_strided_slice %212 {offsets = [8, 128], sizes = [8, 128], strides = [1, 1]} : vector<16x640xbf16> to vector<8x128xbf16>
    %273 = vector.extract_strided_slice %212 {offsets = [8, 384], sizes = [8, 128], strides = [1, 1]} : vector<16x640xbf16> to vector<8x128xbf16>
    %274 = vector.extract_strided_slice %212 {offsets = [8, 576], sizes = [8, 64], strides = [1, 1]} : vector<16x640xbf16> to vector<8x64xbf16>
    %cst_109 = arith.constant dense<0.000000e+00> : vector<8x8xf32>
    %275 = tpu.matmul %272, %273, %cst_109 {dimension_numbers = #tpu.dot_dimension_numbers<[1], [1], [0], [0], [0, 0, 1, 0], [], []>} : vector<8x128xbf16>, vector<8x128xbf16>, vector<8x8xf32> -> vector<8x8xf32>
    %276 = vector.broadcast %253 : vector<1x8xf32> to vector<8x8xf32>
    %277 = arith.addf %275, %276 : vector<8x8xf32>
    %cst_110 = arith.constant dense<0xFF800000> : vector<8xf32>
    %278 = vector.multi_reduction <maximumf>, %277, %cst_110 [1] : vector<8x8xf32> to vector<8xf32>
    %279 = vector.shape_cast %278 : vector<8xf32> to vector<8x1xf32>
    %280 = vector.broadcast %279 : vector<8x1xf32> to vector<8x8xf32>
    %281 = arith.subf %277, %280 : vector<8x8xf32>
    %282 = math.exp %281 : vector<8x8xf32>
    %cst_111 = arith.constant dense<0.000000e+00> : vector<8xf32>
    %283 = vector.multi_reduction <add>, %282, %cst_111 [1] : vector<8x8xf32> to vector<8xf32>
    %284 = vector.shape_cast %283 : vector<8xf32> to vector<8x1xf32>
    %285 = tpu.reciprocal %284 {approx = true} : vector<8x1xf32> -> vector<8x1xf32>
    %286 = vector.broadcast %285 : vector<8x1xf32> to vector<8x8xf32>
    %287 = arith.mulf %282, %286 : vector<8x8xf32>
    %288 = arith.truncf %287 : vector<8x8xf32> to vector<8x8xbf16>
    %cst_112 = arith.constant dense<0.000000e+00> : vector<8x64xf32>
    %289 = tpu.matmul %288, %274, %cst_112 {dimension_numbers = #tpu.dot_dimension_numbers<[1], [0], [0], [1], [0, 0, 1, 1], [], []>} : vector<8x8xbf16>, vector<8x64xbf16>, vector<8x64xf32> -> vector<8x64xf32>
    %290 = tpu.concatenate %271, %289 in 1 : vector<8x64xf32>, vector<8x64xf32> -> vector<8x128xf32>
    %291 = tpu.concatenate %251, %290 in 0 : vector<8x128xf32>, vector<8x128xf32> -> vector<16x128xf32>
    %292 = arith.truncf %291 : vector<16x128xf32> to vector<16x128xbf16>
    %c1_113 = arith.constant 1 : index
    %c0_114 = arith.constant 0 : index
    %c0_115 = arith.constant 0 : index
    %293 = vector.load %arg7[%c1_113, %c0_114, %c0_115] : memref<2x128x128xbf16, #tpu.memory_space<vmem>>, vector<1x128x128xbf16>
    %294 = vector.shape_cast %293 : vector<1x128x128xbf16> to vector<128x128xbf16>
    %cst_116 = arith.constant dense<0.000000e+00> : vector<16x128xf32>
    %295 = tpu.matmul %292, %294, %cst_116 {dimension_numbers = #tpu.dot_dimension_numbers<[1], [0], [0], [1], [0, 0, 1, 1], [], []>} : vector<16x128xbf16>, vector<128x128xbf16>, vector<16x128xf32> -> vector<16x128xf32>
    %c1_117 = arith.constant 1 : index
    %c0_118 = arith.constant 0 : index
    %c0_119 = arith.constant 0 : index
    %296 = vector.load %arg8[%c1_117, %c0_118, %c0_119] : memref<2x1x128xf32, #tpu.memory_space<vmem>>, vector<1x1x128xf32>
    %297 = vector.shape_cast %296 : vector<1x1x128xf32> to vector<1x128xf32>
    %298 = vector.broadcast %297 : vector<1x128xf32> to vector<16x128xf32>
    %299 = arith.addf %295, %298 : vector<16x128xf32>
    %300 = arith.addf %203, %299 : vector<16x128xf32>
    %c1_120 = arith.constant 1 : index
    %c0_121 = arith.constant 0 : index
    %c0_122 = arith.constant 0 : index
    %301 = vector.load %arg9[%c1_120, %c0_121, %c0_122] : memref<2x1x128xf32, #tpu.memory_space<vmem>>, vector<1x1x128xf32>
    %302 = vector.shape_cast %301 : vector<1x1x128xf32> to vector<1x128xf32>
    %c1_123 = arith.constant 1 : index
    %c0_124 = arith.constant 0 : index
    %c0_125 = arith.constant 0 : index
    %303 = vector.load %arg10[%c1_123, %c0_124, %c0_125] : memref<2x1x128xf32, #tpu.memory_space<vmem>>, vector<1x1x128xf32>
    %304 = vector.shape_cast %303 : vector<1x1x128xf32> to vector<1x128xf32>
    %cst_126 = arith.constant dense<0.000000e+00> : vector<16xf32>
    %305 = vector.multi_reduction <add>, %300, %cst_126 [1] : vector<16x128xf32> to vector<16xf32>
    %306 = vector.shape_cast %305 : vector<16xf32> to vector<16x1xf32>
    %cst_127 = arith.constant 1.280000e+02 : f32
    %307 = vector.broadcast %cst_127 : f32 to vector<16x1xf32>
    %308 = arith.divf %306, %307 : vector<16x1xf32>
    %309 = vector.broadcast %308 : vector<16x1xf32> to vector<16x128xf32>
    %310 = arith.subf %300, %309 : vector<16x128xf32>
    %311 = arith.mulf %310, %310 : vector<16x128xf32>
    %cst_128 = arith.constant dense<0.000000e+00> : vector<16xf32>
    %312 = vector.multi_reduction <add>, %311, %cst_128 [1] : vector<16x128xf32> to vector<16xf32>
    %313 = vector.shape_cast %312 : vector<16xf32> to vector<16x1xf32>
    %cst_129 = arith.constant 1.280000e+02 : f32
    %314 = vector.broadcast %cst_129 : f32 to vector<16x1xf32>
    %315 = arith.divf %313, %314 : vector<16x1xf32>
    %316 = vector.broadcast %308 : vector<16x1xf32> to vector<16x128xf32>
    %317 = arith.subf %300, %316 : vector<16x128xf32>
    %cst_130 = arith.constant 9.99999996E-13 : f32
    %318 = vector.broadcast %cst_130 : f32 to vector<16x1xf32>
    %319 = arith.addf %315, %318 : vector<16x1xf32>
    %320 = math.rsqrt %319 : vector<16x1xf32>
    %321 = vector.broadcast %320 : vector<16x1xf32> to vector<16x128xf32>
    %322 = arith.mulf %317, %321 : vector<16x128xf32>
    %323 = vector.broadcast %302 : vector<1x128xf32> to vector<16x128xf32>
    %324 = arith.mulf %322, %323 : vector<16x128xf32>
    %325 = vector.broadcast %304 : vector<1x128xf32> to vector<16x128xf32>
    %326 = arith.addf %324, %325 : vector<16x128xf32>
    %327 = arith.truncf %326 : vector<16x128xf32> to vector<16x128xbf16>
    %c1_131 = arith.constant 1 : index
    %c0_132 = arith.constant 0 : index
    %c0_133 = arith.constant 0 : index
    %328 = vector.load %arg11[%c1_131, %c0_132, %c0_133] : memref<2x128x256xbf16, #tpu.memory_space<vmem>>, vector<1x128x256xbf16>
    %329 = vector.shape_cast %328 : vector<1x128x256xbf16> to vector<128x256xbf16>
    %cst_134 = arith.constant dense<0.000000e+00> : vector<16x256xf32>
    %330 = tpu.matmul %327, %329, %cst_134 {dimension_numbers = #tpu.dot_dimension_numbers<[1], [0], [0], [1], [0, 0, 1, 1], [], []>} : vector<16x128xbf16>, vector<128x256xbf16>, vector<16x256xf32> -> vector<16x256xf32>
    %c1_135 = arith.constant 1 : index
    %c0_136 = arith.constant 0 : index
    %c0_137 = arith.constant 0 : index
    %331 = vector.load %arg12[%c1_135, %c0_136, %c0_137] : memref<2x1x256xf32, #tpu.memory_space<vmem>>, vector<1x1x256xf32>
    %332 = vector.shape_cast %331 : vector<1x1x256xf32> to vector<1x256xf32>
    %333 = vector.broadcast %332 : vector<1x256xf32> to vector<16x256xf32>
    %334 = arith.addf %330, %333 : vector<16x256xf32>
    %335 = arith.mulf %334, %334 : vector<16x256xf32>
    %336 = arith.mulf %334, %335 : vector<16x256xf32>
    %cst_138 = arith.constant 4.471500e-02 : f32
    %337 = vector.broadcast %cst_138 : f32 to vector<16x256xf32>
    %338 = arith.mulf %337, %336 : vector<16x256xf32>
    %339 = arith.addf %334, %338 : vector<16x256xf32>
    %cst_139 = arith.constant 0.797884583 : f32
    %340 = vector.broadcast %cst_139 : f32 to vector<16x256xf32>
    %341 = arith.mulf %340, %339 : vector<16x256xf32>
    %342 = math.tanh %341 : vector<16x256xf32>
    %cst_140 = arith.constant 1.000000e+00 : f32
    %343 = vector.broadcast %cst_140 : f32 to vector<16x256xf32>
    %344 = arith.addf %343, %342 : vector<16x256xf32>
    %cst_141 = arith.constant 5.000000e-01 : f32
    %345 = vector.broadcast %cst_141 : f32 to vector<16x256xf32>
    %346 = arith.mulf %345, %344 : vector<16x256xf32>
    %347 = arith.mulf %334, %346 : vector<16x256xf32>
    %348 = arith.truncf %347 : vector<16x256xf32> to vector<16x256xbf16>
    %c1_142 = arith.constant 1 : index
    %c0_143 = arith.constant 0 : index
    %c0_144 = arith.constant 0 : index
    %349 = vector.load %arg13[%c1_142, %c0_143, %c0_144] : memref<2x256x128xbf16, #tpu.memory_space<vmem>>, vector<1x256x128xbf16>
    %350 = vector.shape_cast %349 : vector<1x256x128xbf16> to vector<256x128xbf16>
    %cst_145 = arith.constant dense<0.000000e+00> : vector<16x128xf32>
    %351 = tpu.matmul %348, %350, %cst_145 {dimension_numbers = #tpu.dot_dimension_numbers<[1], [0], [0], [1], [0, 0, 1, 1], [], []>} : vector<16x256xbf16>, vector<256x128xbf16>, vector<16x128xf32> -> vector<16x128xf32>
    %c1_146 = arith.constant 1 : index
    %c0_147 = arith.constant 0 : index
    %c0_148 = arith.constant 0 : index
    %352 = vector.load %arg14[%c1_146, %c0_147, %c0_148] : memref<2x1x128xf32, #tpu.memory_space<vmem>>, vector<1x1x128xf32>
    %353 = vector.shape_cast %352 : vector<1x1x128xf32> to vector<1x128xf32>
    %354 = vector.broadcast %353 : vector<1x128xf32> to vector<16x128xf32>
    %355 = arith.addf %351, %354 : vector<16x128xf32>
    %356 = arith.addf %326, %355 : vector<16x128xf32>
    %c1_149 = arith.constant 1 : index
    %c0_150 = arith.constant 0 : index
    %c0_151 = arith.constant 0 : index
    %357 = vector.load %arg15[%c1_149, %c0_150, %c0_151] : memref<2x1x128xf32, #tpu.memory_space<vmem>>, vector<1x1x128xf32>
    %358 = vector.shape_cast %357 : vector<1x1x128xf32> to vector<1x128xf32>
    %c1_152 = arith.constant 1 : index
    %c0_153 = arith.constant 0 : index
    %c0_154 = arith.constant 0 : index
    %359 = vector.load %arg16[%c1_152, %c0_153, %c0_154] : memref<2x1x128xf32, #tpu.memory_space<vmem>>, vector<1x1x128xf32>
    %360 = vector.shape_cast %359 : vector<1x1x128xf32> to vector<1x128xf32>
    %cst_155 = arith.constant dense<0.000000e+00> : vector<16xf32>
    %361 = vector.multi_reduction <add>, %356, %cst_155 [1] : vector<16x128xf32> to vector<16xf32>
    %362 = vector.shape_cast %361 : vector<16xf32> to vector<16x1xf32>
    %cst_156 = arith.constant 1.280000e+02 : f32
    %363 = vector.broadcast %cst_156 : f32 to vector<16x1xf32>
    %364 = arith.divf %362, %363 : vector<16x1xf32>
    %365 = vector.broadcast %364 : vector<16x1xf32> to vector<16x128xf32>
    %366 = arith.subf %356, %365 : vector<16x128xf32>
    %367 = arith.mulf %366, %366 : vector<16x128xf32>
    %cst_157 = arith.constant dense<0.000000e+00> : vector<16xf32>
    %368 = vector.multi_reduction <add>, %367, %cst_157 [1] : vector<16x128xf32> to vector<16xf32>
    %369 = vector.shape_cast %368 : vector<16xf32> to vector<16x1xf32>
    %cst_158 = arith.constant 1.280000e+02 : f32
    %370 = vector.broadcast %cst_158 : f32 to vector<16x1xf32>
    %371 = arith.divf %369, %370 : vector<16x1xf32>
    %372 = vector.broadcast %364 : vector<16x1xf32> to vector<16x128xf32>
    %373 = arith.subf %356, %372 : vector<16x128xf32>
    %cst_159 = arith.constant 9.99999996E-13 : f32
    %374 = vector.broadcast %cst_159 : f32 to vector<16x1xf32>
    %375 = arith.addf %371, %374 : vector<16x1xf32>
    %376 = math.rsqrt %375 : vector<16x1xf32>
    %377 = vector.broadcast %376 : vector<16x1xf32> to vector<16x128xf32>
    %378 = arith.mulf %373, %377 : vector<16x128xf32>
    %379 = vector.broadcast %358 : vector<1x128xf32> to vector<16x128xf32>
    %380 = arith.mulf %378, %379 : vector<16x128xf32>
    %381 = vector.broadcast %360 : vector<1x128xf32> to vector<16x128xf32>
    %382 = arith.addf %380, %381 : vector<16x128xf32>
    %383 = arith.truncf %382 : vector<16x128xf32> to vector<16x128xbf16>
    %c0_160 = arith.constant 0 : index
    %c0_161 = arith.constant 0 : index
    %384 = vector.load %arg17[%c0_160, %c0_161] : memref<128x128xbf16, #tpu.memory_space<vmem>>, vector<128x128xbf16>
    %cst_162 = arith.constant dense<0.000000e+00> : vector<16x128xf32>
    %385 = tpu.matmul %383, %384, %cst_162 {dimension_numbers = #tpu.dot_dimension_numbers<[1], [0], [0], [1], [0, 0, 1, 1], [], []>} : vector<16x128xbf16>, vector<128x128xbf16>, vector<16x128xf32> -> vector<16x128xf32>
    %c0_163 = arith.constant 0 : index
    %c0_164 = arith.constant 0 : index
    %386 = vector.load %arg18[%c0_163, %c0_164] : memref<1x128xf32, #tpu.memory_space<vmem>>, vector<1x128xf32>
    %387 = vector.broadcast %386 : vector<1x128xf32> to vector<16x128xf32>
    %388 = arith.addf %385, %387 : vector<16x128xf32>
    %389 = math.tanh %388 : vector<16x128xf32>
    %390 = arith.truncf %389 : vector<16x128xf32> to vector<16x128xbf16>
    %c0_165 = arith.constant 0 : index
    %c0_166 = arith.constant 0 : index
    %391 = vector.load %arg19[%c0_165, %c0_166] : memref<16x128xbf16, #tpu.memory_space<vmem>>, vector<16x128xbf16>
    tpu.vector_store %arg19[%c0_165, %c0_166], %390 {strides = array<i32>} : memref<16x128xbf16, #tpu.memory_space<vmem>>, vector<16x128xbf16>,
    return
  }
  func.func @transform_0(%arg0: i32) -> (i32, i32) {
    %c0_i32 = arith.constant 0 : i32
    %c0_i32_0 = arith.constant 0 : i32
    return %arg0, %c0_i32 : i32, i32
  }
  func.func @transform_1(%arg0: i32) -> (i32, i32, i32) {
    %c0_i32 = arith.constant 0 : i32
    %c0_i32_0 = arith.constant 0 : i32
    %c0_i32_1 = arith.constant 0 : i32
    return %arg0, %c0_i32, %c0_i32_0 : i32, i32, i32
  }
  func.func @transform_2(%arg0: i32) -> (i32, i32) {
    %c0_i32 = arith.constant 0 : i32
    %c0_i32_0 = arith.constant 0 : i32
    %c0_i32_1 = arith.constant 0 : i32
    return %c0_i32, %c0_i32_0 : i32, i32
  }
  func.func @transform_3(%arg0: i32) -> (i32, i32) {
    %c0_i32 = arith.constant 0 : i32
    %c0_i32_0 = arith.constant 0 : i32
    %c0_i32_1 = arith.constant 0 : i32
    return %c0_i32, %c0_i32_0 : i32, i32
  }
  func.func @transform_4(%arg0: i32) -> (i32, i32, i32) {
    %c0_i32 = arith.constant 0 : i32
    %c0_i32_0 = arith.constant 0 : i32
    %c0_i32_1 = arith.constant 0 : i32
    %c0_i32_2 = arith.constant 0 : i32
    return %c0_i32, %c0_i32_0, %c0_i32_1 : i32, i32, i32
  }
  func.func @transform_5(%arg0: i32) -> (i32, i32, i32) {
    %c0_i32 = arith.constant 0 : i32
    %c0_i32_0 = arith.constant 0 : i32
    %c0_i32_1 = arith.constant 0 : i32
    %c0_i32_2 = arith.constant 0 : i32
    return %c0_i32, %c0_i32_0, %c0_i32_1 : i32, i32, i32
  }
  func.func @transform_6(%arg0: i32) -> (i32, i32, i32) {
    %c0_i32 = arith.constant 0 : i32
    %c0_i32_0 = arith.constant 0 : i32
    %c0_i32_1 = arith.constant 0 : i32
    %c0_i32_2 = arith.constant 0 : i32
    return %c0_i32, %c0_i32_0, %c0_i32_1 : i32, i32, i32
  }
  func.func @transform_7(%arg0: i32) -> (i32, i32, i32) {
    %c0_i32 = arith.constant 0 : i32
    %c0_i32_0 = arith.constant 0 : i32
    %c0_i32_1 = arith.constant 0 : i32
    %c0_i32_2 = arith.constant 0 : i32
    return %c0_i32, %c0_i32_0, %c0_i32_1 : i32, i32, i32
  }
  func.func @transform_8(%arg0: i32) -> (i32, i32, i32) {
    %c0_i32 = arith.constant 0 : i32
    %c0_i32_0 = arith.constant 0 : i32
    %c0_i32_1 = arith.constant 0 : i32
    %c0_i32_2 = arith.constant 0 : i32
    return %c0_i32, %c0_i32_0, %c0_i32_1 : i32, i32, i32
  }
  func.func @transform_9(%arg0: i32) -> (i32, i32, i32) {
    %c0_i32 = arith.constant 0 : i32
    %c0_i32_0 = arith.constant 0 : i32
    %c0_i32_1 = arith.constant 0 : i32
    %c0_i32_2 = arith.constant 0 : i32
    return %c0_i32, %c0_i32_0, %c0_i32_1 : i32, i32, i32
  }
  func.func @transform_10(%arg0: i32) -> (i32, i32, i32) {
    %c0_i32 = arith.constant 0 : i32
    %c0_i32_0 = arith.constant 0 : i32
    %c0_i32_1 = arith.constant 0 : i32
    %c0_i32_2 = arith.constant 0 : i32
    return %c0_i32, %c0_i32_0, %c0_i32_1 : i32, i32, i32
  }
  func.func @transform_11(%arg0: i32) -> (i32, i32, i32) {
    %c0_i32 = arith.constant 0 : i32
    %c0_i32_0 = arith.constant 0 : i32
    %c0_i32_1 = arith.constant 0 : i32
    %c0_i32_2 = arith.constant 0 : i32
    return %c0_i32, %c0_i32_0, %c0_i32_1 : i32, i32, i32
  }
  func.func @transform_12(%arg0: i32) -> (i32, i32, i32) {
    %c0_i32 = arith.constant 0 : i32
    %c0_i32_0 = arith.constant 0 : i32
    %c0_i32_1 = arith.constant 0 : i32
    %c0_i32_2 = arith.constant 0 : i32
    return %c0_i32, %c0_i32_0, %c0_i32_1 : i32, i32, i32
  }
  func.func @transform_13(%arg0: i32) -> (i32, i32, i32) {
    %c0_i32 = arith.constant 0 : i32
    %c0_i32_0 = arith.constant 0 : i32
    %c0_i32_1 = arith.constant 0 : i32
    %c0_i32_2 = arith.constant 0 : i32
    return %c0_i32, %c0_i32_0, %c0_i32_1 : i32, i32, i32
  }
  func.func @transform_14(%arg0: i32) -> (i32, i32, i32) {
    %c0_i32 = arith.constant 0 : i32
    %c0_i32_0 = arith.constant 0 : i32
    %c0_i32_1 = arith.constant 0 : i32
    %c0_i32_2 = arith.constant 0 : i32
    return %c0_i32, %c0_i32_0, %c0_i32_1 : i32, i32, i32
  }
  func.func @transform_15(%arg0: i32) -> (i32, i32, i32) {
    %c0_i32 = arith.constant 0 : i32
    %c0_i32_0 = arith.constant 0 : i32
    %c0_i32_1 = arith.constant 0 : i32
    %c0_i32_2 = arith.constant 0 : i32
    return %c0_i32, %c0_i32_0, %c0_i32_1 : i32, i32, i32
  }
  func.func @transform_16(%arg0: i32) -> (i32, i32) {
    %c0_i32 = arith.constant 0 : i32
    %c0_i32_0 = arith.constant 0 : i32
    %c0_i32_1 = arith.constant 0 : i32
    return %c0_i32, %c0_i32_0 : i32, i32
  }
  func.func @transform_17(%arg0: i32) -> (i32, i32) {
    %c0_i32 = arith.constant 0 : i32
    %c0_i32_0 = arith.constant 0 : i32
    %c0_i32_1 = arith.constant 0 : i32
    return %c0_i32, %c0_i32_0 : i32, i32
  }
  func.func @transform_18(%arg0: i32) -> (i32, i32) {
    %c0_i32 = arith.constant 0 : i32
    %c0_i32_0 = arith.constant 0 : i32
    return %arg0, %c0_i32 : i32, i32
  }
}

</mosaic_0001>

<bundles_post_ra>
// kernel: text_correction_forward.3
= control target key start
LH: loop header
LB: loop body
LE: loop exit
PB: predicated region body
PF: predicated region fallthrough
CT: control target
= control target key end

     0   :  { %v265_v2 = vmov 0   ;;  %s355_s0 = inlined_call_operand.vmem [shape: bf16[16,128], index: 0, kind: input, shape index: {}]   ;;  %s356_s1 = inlined_call_operand.vmem [shape: bf16[128,256], index: 1, kind: input, shape index: {}]   ;;  %s357_s2 = inlined_call_operand.vmem [shape: f32[1,256], index: 2, kind: input, shape index: {}]   ;;  %s358_s3 = inlined_call_operand.hbm [shape: f32[16,256], index: 3, kind: output, shape index: {}]  }
   0x1   :  { %v216_v0 = vld [vmem:[%s356_s1 + $0x4] ss:$8 sps:$4 sm:$0xff]   ;;  %v218_v1 = vld [vmem:[%s356_s1] ss:$8 sps:$4 sm:$0xff]   ;;  %164 = vmatprep.mubr.bf16.mxu0 %v265_v2  ;;  %v219_v3 = vld [vmem:[%s356_s1 + $0x14] ss:$8 sps:$4 sm:$0xff]  }
   0x2   :  { %132 = vmatprep.subr.bf16.mxu0 %v216_v0  ;;  %v221_v4 = vld [vmem:[%s356_s1 + $0x10] ss:$8 sps:$4 sm:$0xff]   ;;  %v222_v5 = vld [vmem:[%s356_s1 + $0x24] ss:$8 sps:$4 sm:$0xff]   ;;  %v224_v6 = vld [vmem:[%s356_s1 + $0x20] ss:$8 sps:$4 sm:$0xff]  }
   0x3   :  { %133 = vmatpush1.bf16.msra.mxu0 %v218_v1  ;;  %v225_v7 = vld [vmem:[%s356_s1 + $0x34] ss:$8 sps:$4 sm:$0xff]   ;;  %v227_v8 = vld [vmem:[%s356_s1 + $0x30] ss:$8 sps:$4 sm:$0xff]   ;;  %v228_v9 = vld [vmem:[%s356_s1 + $0x44] ss:$8 sps:$4 sm:$0xff]  }
   0x4   :  { %134 = vmatprep.subr.bf16.mxu0 %v219_v3 }
   0x7   :  { %135 = vmatpush1.bf16.msra.mxu0 %v221_v4 }
   0x8   :  { %136 = vmatprep.subr.bf16.mxu0 %v222_v5 }
   0xb   :  { %137 = vmatpush1.bf16.msra.mxu0 %v224_v6 }
   0xc   :  { %138 = vmatprep.subr.bf16.mxu0 %v225_v7 }
   0xd   :  { %8 = vsyncpa [#allocation3], 0  ;;  %v230_v10 = vld [vmem:[%s356_s1 + $0x40] ss:$8 sps:$4 sm:$0xff]   ;;  %v231_v11 = vld [vmem:[%s356_s1 + $0x54] ss:$8 sps:$4 sm:$0xff]   ;;  %v36_v18 = vlaneseq }
   0xe   :  { %v233_v12 = vld [vmem:[%s356_s1 + $0x50] ss:$8 sps:$4 sm:$0xff]   ;;  %v234_v13 = vld [vmem:[%s356_s1 + $0x64] ss:$8 sps:$4 sm:$0xff]   ;;  %v236_v14 = vld [vmem:[%s356_s1 + $0x60] ss:$8 sps:$4 sm:$0xff]  }
   0xf   :  { %139 = vmatpush1.bf16.msra.mxu0 %v227_v8  ;;  %v237_v15 = vld [vmem:[%s356_s1 + $0x74] ss:$8 sps:$4 sm:$0xff]   ;;  %v239_v16 = vld [vmem:[%s356_s1 + $0x70] ss:$8 sps:$4 sm:$0xff]   ;;  %v240_v17 = vld [vmem:[%s355_s0] sm:$0xff]   ;;  %v37_v19 = vshrl.u32 %v36_v18, 7 }
  0x10   :  { %140 = vmatprep.subr.bf16.mxu0 %v228_v9  ;;  %v34_v21 = vld [vmem:[%s357_s2] sm:$0x3]  ;;  %s266_s21 = smov [#allocation2]  }
  0x11   :  { %v38_v20 = vsub.s32 0, %v37_v19  ;;  %v42_v22 = vsub.s32 1, %v37_v19  ;;  %s184_s1 = sshll.u32 %s266_s21, 4  ;;  %s185_s1 = int_to_ptr.vmem [resolvable:$true] %s184_s1 }
  0x12   :  { %s241_s0 = scalar_lea.vmem %s185_s1, 512  ;;  %p246_p1 = scmp.lt.s32.totalorder %s185_s1, %s185_s1 }
  0x13   :  { %141 = vmatpush1.bf16.msra.mxu0 %v230_v10  ;;  %v39_v23 = vrot.slane %v34_v21, %v38_v20  ;;  %v43_v24 = vrot.slane %v34_v21, %v42_v22  ;;  %p242_p0 = scmp.ne.s32.totalorder %s185_s1, %s241_s0  ;;  %p247_p2 = scmp.lt.s32.totalorder %s241_s0, %s241_s0 }
  0x14   :  { %142 = vmatprep.subr.bf16.mxu0 %v231_v11 }
  0x15   :  { %p248_p3 = por %p247_p2, %p246_p1 }
  0x17   :  { %143 = vmatpush1.bf16.msra.mxu0 %v233_v12  ;;  %p249_p4 = pnand %p248_p3, %p242_p0 }
  0x18   :  { %144 = vmatprep.subr.bf16.mxu0 %v234_v13 }
  0x1b   :  { %145 = vmatpush1.bf16.msra.mxu0 %v236_v14 }
  0x1c   :  { %146 = vmatprep.subr.bf16.mxu0 %v237_v15 }
  0x1f   :  { %147 = vmatpush1.bf16.msra.mxu0 %v239_v16 }
  0x22   :  { %165 = vmatmul.mubr.bf16.vlgmr.msra.gmra.mrb[0].mxu0 %v240_v17 }
  0xf5   :  { %v166_v25 = vpop.f32.mrb[0].mxu0 }
  0xf6   :  { %v167_v26 = vadd.f32 %v166_v25, %v39_v23  ;;  %v168_v27 = vpop.f32.mrb[1].mxu0 }
  0xf7   :  { %v169_v28 = vadd.f32 %v168_v27, %v43_v24  ;;  %v170_v29 = vpop.f32.mrb[2].mxu0 }
  0xf8   :  { %175 = vst [vmem:[#allocation2] sm:$0xff] %v167_v26  ;;  %v171_v30 = vadd.f32 %v170_v29, %v39_v23  ;;  %v172_v31 = vpop.f32.mrb[3].mxu0 }
  0xf9   :  { %176 = vst [vmem:[#allocation2 + $0x8] sm:$0xff] %v169_v28  ;;  %v173_v32 = vadd.f32 %v172_v31, %v43_v24 }
  0xfa   :  { %177 = vst [vmem:[#allocation2 + $0x10] sm:$0xff] %v171_v30 }
  0xfb   :  { %178 = vst [vmem:[#allocation2 + $0x18] sm:$0xff] %v173_v32 }
  0xfc   :  { %252 = shalt.err (!%p249_p4)
}
  0xfd   :  { %s253_s23 = scalar_lea.hbm %s358_s3, 512 }
  0xfe   :  { %p254_p5 = scmp.ne.s32.totalorder %s358_s3, %s253_s23  ;;  %p257_p6 = scmp.lt.u32.totalorder %s253_s23, %s358_s3 }
 0x100   :  { %p259_p7 = pnand %p257_p6, %p254_p5 }
 0x102   :  { %262 = shalt.err (!%p259_p7)
}
 0x103   :  { %s267_s28 = smov 256   ;;  %s268_s29 = smov 16  }
 0x104   :  { %190 = dma.vmem_to_hbm [thread:$0]  %s185_s1, 512, %s358_s3, [#allocation3], %s267_s28, %s267_s28, %s268_s29  }
 0x105   :  { %263 = dma.done.wait [#allocation3], 512  }
 0x106   :  { %264 = vsyncadd [#allocation3], 4294966784 }
 0x107   :  { %194 = vsyncpa [#allocation3], 1 }

// kernel: text_correction_forward.2
= control target key start
LH: loop header
LB: loop body
LE: loop exit
PB: predicated region body
PF: predicated region fallthrough
CT: control target
= control target key end

     0   :  { %s4640_s0 = inlined_call_operand.vmem [shape: f32[16,128], index: 0, kind: input, shape index: {}]   ;;  %s4641_s1 = inlined_call_operand.vmem [shape: f32[2,1,8], index: 1, kind: input, shape index: {}]   ;;  %s4642_s2 = inlined_call_operand.vmem [shape: f32[1,128], index: 2, kind: input, shape index: {}]   ;;  %s4643_s3 = inlined_call_operand.vmem [shape: f32[1,128], index: 3, kind: input, shape index: {}]   ;;  %s4644_s4 = inlined_call_operand.hbm [shape: bf16[2,128,640], index: 4, kind: input, shape index: {}]   ;;  %s4645_s5 = inlined_call_operand.vmem [shape: f32[2,1,640], index: 5, kind: input, shape index: {}]   ;;  %s4646_s6 = inlined_call_operand.vmem [shape: bf16[2,128,128], index: 6, kind: input, shape index: {}]   ;;  %s4647_s7 = inlined_call_operand.vmem [shape: f32[2,1,128], index: 7, kind: input, shape index: {}]   ;;  %s4648_s8 = inlined_call_operand.vmem [shape: f32[2,1,128], index: 8, kind: input, shape index: {}]   ;;  %s4649_s9 = inlined_call_operand.vmem [shape: f32[2,1,128], index: 9, kind: input, shape index: {}]   ;;  %s4650_s10 = inlined_call_operand.vmem [shape: bf16[2,128,256], index: 10, kind: input, shape index: {}]   ;;  %s4651_s11 = inlined_call_operand.vmem [shape: f32[2,1,256], index: 11, kind: input, shape index: {}]   ;;  %s4652_s12 = inlined_call_operand.hbm [shape: bf16[2,256,128], index: 12, kind: input, shape index: {}]   ;;  %s4653_s13 = inlined_call_operand.vmem [shape: f32[2,1,128], index: 13, kind: input, shape index: {}]   ;;  %s4654_s14 = inlined_call_operand.vmem [shape: f32[2,1,128], index: 14, kind: input, shape index: {}]   ;;  %s4655_s15 = inlined_call_operand.vmem [shape: f32[2,1,128], index: 15, kind: input, shape index: {}]   ;;  %s4656_s16 = inlined_call_operand.vmem [shape: bf16[128,128], index: 16, kind: input, shape index: {}]   ;;  %s4657_s17 = inlined_call_operand.vmem [shape: f32[1,128], index: 17, kind: input, shape index: {}]   ;;  %s4658_s18 = inlined_call_operand.vmem [shape: bf16[16,128], index: 18, kind: output, shape index: {}]  }
   0x1   :  { %4661 = sst [smem:[#allocation8_spill]] %s4640_s0 }
   0x2   :  { %4662 = sst [smem:[#allocation9_spill]] %s4641_s1 }
   0x3   :  { %4663 = sst [smem:[#allocation10_spill]] %s4642_s2 }
   0x4   :  { %23 = vsyncpa [#allocation3], 0 }
   0x5   :  { %24 = vsyncpa [#allocation5], 0  ;;  %s4006_s27 = smov [#allocation2]   ;;  %s3958_s0 = scalar_lea.hbm %s4644_s4, 10240 }
   0x6   :  { %s38_s28 = sshll.u32 %s4006_s27, 4  ;;  %p3959_p0 = scmp.ne.s32.totalorder %s4644_s4, %s3958_s0  ;;  %s39_s28 = int_to_ptr.vmem [resolvable:$true] %s38_s28 }
   0x7   :  { %p3962_p1 = scmp.lt.u32.totalorder %s3958_s0, %s4644_s4 }
   0x9   :  { %p3964_p2 = pnand %p3962_p1, %p3959_p0 }
   0xb   :  { %3967 = shalt.err (!%p3964_p2)
}
   0xc   :  { %s3968_s22 = scalar_lea.vmem %s39_s28, 10240  ;;  %p3973_p4 = scmp.lt.s32.totalorder %s39_s28, %s39_s28 }
   0xd   :  { %p3969_p3 = scmp.ne.s32.totalorder %s39_s28, %s3968_s22  ;;  %p3974_p5 = scmp.lt.s32.totalorder %s3968_s22, %s3968_s22 }
   0xf   :  { %p3975_p6 = por %p3974_p5, %p3973_p4 }
  0x11   :  { %p3976_p7 = pnand %p3975_p6, %p3969_p3 }
  0x13   :  { %3979 = shalt.err (!%p3976_p7)
}
  0x14   :  { %s4007_s2 = smov 320   ;;  %s4008_s23 = smov 20  }
  0x15   :  { %44 = dma.hbm_to_vmem [thread:$0]  %s4644_s4, 10240, %s39_s28, [#allocation3], %s4007_s2, %s4007_s2, %s4008_s23  }
  0x16   :  { %s4009_s26 = smov [#allocation4]   ;;  %s3980_s0 = scalar_lea.hbm %s4652_s12, 4096 }
  0x17   :  { %s64_s27 = sshll.u32 %s4009_s26, 4  ;;  %p3981_p8 = scmp.ne.s32.totalorder %s4652_s12, %s3980_s0  ;;  %s65_s27 = int_to_ptr.vmem [resolvable:$true] %s64_s27 }
  0x18   :  { %p3984_p9 = scmp.lt.u32.totalorder %s3980_s0, %s4652_s12 }
  0x1a   :  { %p3986_p10 = pnand %p3984_p9, %p3981_p8 }
  0x1c   :  { %3989 = shalt.err (!%p3986_p10)
}
  0x1d   :  { %s3990_s22 = scalar_lea.vmem %s65_s27, 4096  ;;  %p3995_p12 = scmp.lt.s32.totalorder %s65_s27, %s65_s27 }
  0x1e   :  { %p3991_p11 = scmp.ne.s32.totalorder %s65_s27, %s3990_s22  ;;  %p3996_p13 = scmp.lt.s32.totalorder %s3990_s22, %s3990_s22 }
  0x20   :  { %p3997_p0 = por %p3996_p13, %p3995_p12 }
  0x22   :  { %p3998_p1 = pnand %p3997_p0, %p3991_p11 }
  0x24   :  { %4001 = shalt.err (!%p3998_p1)
}
  0x25   :  { %s4010_s4 = smov 64   ;;  %s4011_s28 = smov 4  }
  0x26   :  { %70 = dma.hbm_to_vmem [thread:$0]  %s4652_s12, 4096, %s65_s27, [#allocation5], %s4010_s4, %s4010_s4, %s4011_s28  }
  0x27   :  { %4002 = dma.done.wait [#allocation3], 10240  }
  0x28   :  { %4003 = vsyncadd [#allocation3], 4294957056 }
  0x29   :  { %4004 = dma.done.wait [#allocation5], 4096  }
  0x2a   :  { %4005 = vsyncadd [#allocation5], 4294963200  ;;  %s4664_s26 = sld [smem:[#allocation8_spill]]  ;;  %v3669_v2 = vld [vmem:[#allocation2 + $0x4] ss:$20 sps:$4 sm:$0xff]   ;;  %v4012_v36 = vmov 0  }
  0x2b   :  { %v3671_v3 = vld [vmem:[#allocation2] ss:$20 sps:$4 sm:$0xff]   ;;  %v3674_v5 = vld [vmem:[#allocation2 + $0x8] ss:$20 sps:$4 sm:$0xff]   ;;  %415 = vmatprep.subr.bf16.mxu0 %v3669_v2  ;;  %v3680_v17 = vld [vmem:[#allocation2 + $0x30] ss:$20 sps:$4 sm:$0xff]   ;;  %447 = vmatprep.mubr.bf16.mxu0 %v4012_v36 }
  0x2c   :  { %v3672_v4 = vld [vmem:[#allocation2 + $0xc] ss:$20 sps:$4 sm:$0xff]   ;;  %v3677_v7 = vld [vmem:[#allocation2 + $0x28] ss:$20 sps:$4 sm:$0xff]   ;;  %416 = vmatpush1.bf16.msra.mxu0 %v3671_v3  ;;  %v3683_v19 = vld [vmem:[#allocation2 + $0x50] ss:$20 sps:$4 sm:$0xff]   ;;  %490 = vmatprep.mubr.bf16.mxu1 %v4012_v36 }
  0x2d   :  { %v3675_v6 = vld [vmem:[#allocation2 + $0x2c] ss:$20 sps:$4 sm:$0xff]   ;;  %458 = vmatprep.subr.bf16.mxu1 %v3672_v4  ;;  %v3678_v8 = vld [vmem:[#allocation2 + $0x34] ss:$20 sps:$4 sm:$0xff]   ;;  %v3684_v20 = vld [vmem:[#allocation2 + $0x5c] ss:$20 sps:$4 sm:$0xff]  }
  0x2e   :  { %459 = vmatpush1.bf16.msra.mxu1 %v3674_v5  ;;  %417 = vmatprep.subr.bf16.mxu0 %v3675_v6  ;;  %v3681_v18 = vld [vmem:[#allocation2 + $0x54] ss:$20 sps:$4 sm:$0xff]   ;;  %v3686_v21 = vld [vmem:[#allocation2 + $0x58] ss:$20 sps:$4 sm:$0xff]   ;;  %v3687_v22 = vld [vmem:[#allocation2 + $0x7c] ss:$20 sps:$4 sm:$0xff]   ;;  %v182_v5 = vlaneseq }
  0x2f   :  { %460 = vmatprep.subr.bf16.mxu1 %v3678_v8  ;;  %v3689_v23 = vld [vmem:[#allocation2 + $0x78] ss:$20 sps:$4 sm:$0xff]   ;;  %v3692_v25 = vld [vmem:[#allocation2 + $0x80] ss:$20 sps:$4 sm:$0xff]   ;;  %v3698_v29 = vld [vmem:[#allocation2 + $0xa8] ss:$20 sps:$4 sm:$0xff]  }
  0x30   :  { %v88_v0 = vld [vmem:[%s4664_s26] sm:$0xff]  ;;  %v89_v1 = vld [vmem:[%s4664_s26 + $0x8] sm:$0xff]  ;;  %418 = vmatpush1.bf16.msra.mxu0 %v3677_v7  ;;  %v3708_v35 = vld [vmem:[#allocation2 + $0xfc] ss:$20 sps:$4 sm:$0xff]   ;;  %v4013_v43 = vmov 0.0   ;;  %s4665_s0 = sld [smem:[#allocation10_spill]] }
  0x31   :  { %92 = vadd.xlane.f32.xlu0 %v88_v0  ;;  %419 = vmatprep.subr.bf16.mxu0 %v3681_v18  ;;  %v3690_v24 = vld [vmem:[#allocation2 + $0x84] ss:$20 sps:$4 sm:$0xff]   ;;  %v3695_v27 = vld [vmem:[#allocation2 + $0xa0] ss:$20 sps:$4 sm:$0xff]   ;;  %v3701_v32 = vld [vmem:[#allocation2 + $0xc8] ss:$20 sps:$4 sm:$0xff]  }
  0x32   :  { %461 = vmatpush1.bf16.msra.mxu1 %v3680_v17  ;;  %v3693_v26 = vld [vmem:[#allocation2 + $0xa4] ss:$20 sps:$4 sm:$0xff]   ;;  %v3696_v28 = vld [vmem:[#allocation2 + $0xac] ss:$20 sps:$4 sm:$0xff]   ;;  %v3702_v31 = vld [vmem:[#allocation2 + $0xd4] ss:$20 sps:$4 sm:$0xff]  }
  0x33   :  { %462 = vmatprep.subr.bf16.mxu1 %v3684_v20  ;;  %v3699_v30 = vld [vmem:[#allocation2 + $0xcc] ss:$20 sps:$4 sm:$0xff]   ;;  %v3704_v33 = vld [vmem:[#allocation2 + $0xd0] ss:$20 sps:$4 sm:$0xff]   ;;  %v3705_v34 = vld [vmem:[#allocation2 + $0xf4] ss:$20 sps:$4 sm:$0xff]  }
  0x34   :  { %420 = vmatpush1.bf16.msra.mxu0 %v3683_v19  ;;  %v3707_v37 = vld [vmem:[#allocation2 + $0xf0] ss:$20 sps:$4 sm:$0xff]   ;;  %v3710_v38 = vld [vmem:[#allocation2 + $0xf8] ss:$20 sps:$4 sm:$0xff]   ;;  %v3716_v42 = vld [vmem:[#allocation2 + $0x120] ss:$20 sps:$4 sm:$0xff]  }
  0x35   :  { %94 = vadd.xlane.f32.xlu0 %v89_v1  ;;  %421 = vmatprep.subr.bf16.mxu0 %v3687_v22  ;;  %v3711_v39 = vld [vmem:[#allocation2 + $0x11c] ss:$20 sps:$4 sm:$0xff]   ;;  %v3714_v40 = vld [vmem:[#allocation2 + $0x124] ss:$20 sps:$4 sm:$0xff]   ;;  %v3091_v56 = vld [vmem:[%s4643_s3] ss:$0 sm:$0xff] }
  0x36   :  { %463 = vmatpush1.bf16.msra.mxu1 %v3686_v21  ;;  %v3713_v41 = vld [vmem:[#allocation2 + $0x118] ss:$20 sps:$4 sm:$0xff]   ;;  %v3090_v52 = vld [vmem:[%s4665_s0] ss:$0 sm:$0xff]  ;;  %v3717_v60 = vld [vmem:[#allocation2 + $0x10] ss:$20 sps:$4 sm:$0xff]  }
  0x37   :  { %464 = vmatprep.subr.bf16.mxu1 %v3690_v24  ;;  %v3718_v62 = vld [vmem:[#allocation2 + $0x38] ss:$20 sps:$4 sm:$0xff]   ;;  %vm4014_vm0 = vmmov 0   ;;  %v3719_v63 = vld [vmem:[#allocation2 + $0x60] ss:$20 sps:$4 sm:$0xff]   ;;  %v4182_v6 = vshrl.u32 %v182_v5, 7 }
  0x38   :  { %422 = vmatpush1.bf16.msra.mxu0 %v3689_v23  ;;  %v3722_v2 = vld [vmem:[#allocation2 + $0xd8] ss:$20 sps:$4 sm:$0xff]   ;;  %v3723_v3 = vld [vmem:[#allocation2 + $0x100] ss:$20 sps:$4 sm:$0xff]   ;;  %v3724_v4 = vld [vmem:[#allocation2 + $0x128] ss:$20 sps:$4 sm:$0xff]  }
  0x39   :  { %423 = vmatprep.subr.bf16.mxu0 %v3693_v26  ;;  %v4185_v7 = vsub.s32 0, %v4182_v6  ;;  %v192_v8 = vsub.s32 2, %v4182_v6  ;;  %vm610_vm1 = vcmask 1043456   ;;  %s4666_s28 = sld [smem:[#allocation9_spill]]  ;;  %vm594_vm2 = vcmask 64512  }
  0x3a   :  { %465 = vmatpush1.bf16.msra.mxu1 %v3692_v25  ;;  %vm759_vm3 = vcmask 523264  }
  0x3b   :  { %466 = vmatprep.subr.bf16.mxu1 %v3696_v28 }
  0x3c   :  { %424 = vmatpush1.bf16.msra.mxu0 %v3695_v27 }
  0x3d   :  { %425 = vmatprep.subr.bf16.mxu0 %v3699_v30 }
  0x3e   :  { %467 = vmatpush1.bf16.msra.mxu1 %v3698_v29 }
  0x3f   :  { %468 = vmatprep.subr.bf16.mxu1 %v3702_v31 }
  0x40   :  { %426 = vmatpush1.bf16.msra.mxu0 %v3701_v32 }
  0x41   :  { %427 = vmatprep.subr.bf16.mxu0 %v3705_v34 }
  0x42   :  { %469 = vmatpush1.bf16.msra.mxu1 %v3704_v33 }
  0x43   :  { %470 = vmatprep.subr.bf16.mxu1 %v3708_v35 }
  0x44   :  { %428 = vmatpush1.bf16.msra.mxu0 %v3707_v37 }
  0x45   :  { %429 = vmatprep.subr.bf16.mxu0 %v3711_v39 }
  0x46   :  { %471 = vmatpush1.bf16.msra.mxu1 %v3710_v38 }
  0x47   :  { %472 = vmatprep.subr.bf16.mxu1 %v3714_v40 }
  0x48   :  { %430 = vmatpush1.bf16.msra.mxu0 %v3713_v41  ;;  %v200_v41 = vsub.s32 4, %v4182_v6 }
  0x49   :  { %3454 = vmatprep.subr.bf16.mxu0 %v4013_v43 }
  0x4a   :  { %473 = vmatpush1.bf16.msra.mxu1 %v3716_v42 }
  0x4b   :  { %3474 = vmatprep.subr.bf16.mxu1 %v4013_v43 }
  0xbe   :  { %v93_v9 = vpop.xlane.xlu0 %92 }
  0xbf   :  { %v97_v10 = vmul.f32 0.0078125, %v93_v9  ;;  %v180_v9 = vld [vmem:[%s4645_s5] sm:$0x1f] }
  0xc0   :  { %v201_v42 = vrot.slane %v180_v9, %v200_v41 }
  0xc1   :  { %v4142_v11 = vsub.f32 %v88_v0, %v97_v10  ;;  %v3720_v0 = vld [vmem:[#allocation2 + $0x88] ss:$20 sps:$4 sm:$0xff]   ;;  %v4192_v10 = vsub.s32 1, %v4182_v6 }
  0xc2   :  { %v95_v12 = vpop.xlane.xlu0 %94 }
  0xc3   :  { %v98_v13 = vmul.f32 0.0078125, %v95_v12  ;;  %v101_v14 = vmul.f32 %v4142_v11, %v4142_v11  ;;  %v185_v12 = vrot.slane %v180_v9, %v4185_v7 }
  0xc5   :  { %v4146_v15 = vsub.f32 %v89_v1, %v98_v13  ;;  %103 = vadd.xlane.f32.xlu1 %v101_v14  ;;  %v3721_v1 = vld [vmem:[#allocation2 + $0xb0] ss:$20 sps:$4 sm:$0xff]   ;;  %v193_v13 = vrot.slane %v180_v9, %v192_v8 }
  0xc7   :  { %v102_v16 = vmul.f32 %v4146_v15, %v4146_v15 }
  0xc9   :  { %105 = vadd.xlane.f32.xlu1 %v102_v16  ;;  %v189_v16 = vrot.slane %v180_v9, %v4192_v10 }
 0x152   :  { %v104_v44 = vpop.xlane.xlu1 %103 }
 0x153   :  { %v107_v45 = vmul.f32 0.0078125, %v104_v44 }
 0x155   :  { %v109_v46 = vadd.f32 1e-12, %v107_v45 }
 0x156   :  { %v106_v47 = vpop.xlane.xlu1 %105 }
 0x157   :  { %3885 = vrsqrt.f32 %v109_v46  ;;  %v108_v48 = vmul.f32 0.0078125, %v106_v47 }
 0x159   :  { %v110_v49 = vadd.f32 1e-12, %v108_v48 }
 0x15b   :  { %3887 = vrsqrt.f32 %v110_v49 }
 0x161   :  { %v3886_v50 = vpop.eup %3885 }
 0x162   :  { %v113_v51 = vmul.f32 %v3886_v50, %v4142_v11  ;;  %v196_v11 = vsub.s32 3, %v4182_v6 }
 0x164   :  { %v121_v55 = vmul.f32 %v3090_v52, %v113_v51  ;;  %v197_v17 = vrot.slane %v180_v9, %v196_v11 }
 0x165   :  { %v3888_v53 = vpop.eup %3887 }
 0x166   :  { %v114_v54 = vmul.f32 %v3888_v53, %v4146_v15  ;;  %v4162_v58 = vadd.f32 %v3091_v56, %v121_v55 }
 0x168   :  { %v122_v57 = vmul.f32 %v3090_v52, %v114_v54  ;;  %v4227_v52 = vld [vmem:[%s4666_s28] ss:$0 sm:$0xff] }
 0x16a   :  { %v4164_v59 = vadd.f32 %v3091_v56, %v122_v57 }
 0x16c   :  { %v131_v61 = vpack.c.bf16 %v4164_v59, %v4162_v58 }
 0x16e   :  { %448 = vmatmul.mubr.bf16.vlgmr.msra.gmra.mrb[0].mxu0 %v131_v61  ;;  %491 = vmatmul.mubr.bf16.vlgmr.msra.gmra.mrb[0].mxu1 %v131_v61 }
 0x16f   :  { %3455 = vmatpush3.bf16.msra.mxu0 %v3717_v60  ;;  %3470 = vmatprep.mubr.msk.bf16.mxu0 %vm4014_vm0, %v4013_v43 }
 0x170   :  { %3456 = vmatprep.subr.bf16.mxu0 %v4013_v43  ;;  %3476 = vmatprep.mubr.msk.bf16.mxu1 %vm4014_vm0, %v4013_v43 }
 0x173   :  { %3457 = vmatpush3.bf16.msra.mxu0 %v3718_v62 }
 0x174   :  { %3458 = vmatprep.subr.bf16.mxu0 %v4013_v43 }
 0x177   :  { %3459 = vmatpush3.bf16.msra.mxu0 %v3719_v63 }
 0x178   :  { %3460 = vmatprep.subr.bf16.mxu0 %v4013_v43 }
 0x17b   :  { %3461 = vmatpush3.bf16.msra.mxu0 %v3720_v0 }
 0x17c   :  { %3462 = vmatprep.subr.bf16.mxu0 %v4013_v43 }
 0x17f   :  { %3463 = vmatpush3.bf16.msra.mxu0 %v3721_v1 }
 0x180   :  { %3464 = vmatprep.subr.bf16.mxu0 %v4013_v43 }
 0x183   :  { %3465 = vmatpush3.bf16.msra.mxu0 %v3722_v2 }
 0x184   :  { %3466 = vmatprep.subr.bf16.mxu0 %v4013_v43 }
 0x187   :  { %3467 = vmatpush3.bf16.msra.mxu0 %v3723_v3 }
 0x188   :  { %3468 = vmatprep.subr.bf16.mxu0 %v4013_v43 }
 0x18b   :  { %3469 = vmatpush3.bf16.msra.mxu0 %v3724_v4 }
 0x18c   :  { %3498 = vmatprep.subr.bf16.mxu0 %v4013_v43 }
 0x18e   :  { %3471 = vmatmul.mubr.bf16.vlgmr.msra.gmra.mrb[4].mxu0 %v131_v61 }
 0x18f   :  { %3500 = vmatprep.mubr.msk.bf16.mxu0 %vm4014_vm0, %v4013_v43 }
 0x241   :  { %v449_v14 = vpop.f32.mrb[0].mxu0  ;;  %v492_v15 = vpop.f32.mrb[0].mxu1 }
 0x242   :  { %v451_v18 = vpop.f32.mrb[1].mxu0  ;;  %v494_v19 = vpop.f32.mrb[1].mxu1  ;;  %v450_v22 = vadd.f32 %v449_v14, %v185_v12  ;;  %v493_v23 = vadd.f32 %v492_v15, %v193_v13 }
 0x243   :  { %v453_v20 = vpop.f32.mrb[2].mxu0  ;;  %v496_v21 = vpop.f32.mrb[2].mxu1  ;;  %v452_v28 = vadd.f32 %v451_v18, %v189_v16  ;;  %v495_v29 = vadd.f32 %v494_v19, %v197_v17 }
 0x244   :  { %v454_v24 = vadd.f32 %v453_v20, %v185_v12  ;;  %v497_v25 = vadd.f32 %v496_v21, %v193_v13  ;;  %v455_v26 = vpop.f32.mrb[3].mxu0  ;;  %v498_v27 = vpop.f32.mrb[3].mxu1  ;;  %v4234_v13 = vld [vmem:[%s4666_s28 + $0x1] ss:$0 sm:$0xff] }
 0x245   :  { %v456_v30 = vadd.f32 %v455_v26, %v189_v16  ;;  %v499_v31 = vadd.f32 %v498_v27, %v197_v17 }
 0x246   :  { %v542_v32 = vpack.c.bf16 %v454_v24, %v450_v22  ;;  %v544_v33 = vpack.c.bf16 %v497_v25, %v493_v23 }
 0x247   :  { %v4201_v34 = vpack.c.bf16 %v456_v30, %v452_v28  ;;  %v4203_v35 = vpack.c.bf16 %v499_v31, %v495_v29 }
 0x248   :  { %v773_v37 = vrot.slane %v544_v33, 4  ;;  %3475 = vmatpush3.bf16.xpose.msra.mxu1 %v544_v33  ;;  %v770_v38 = vrot.slane %v542_v32, 4 }
 0x249   :  { %3480 = vmatprep.subr.bf16.mxu1 %v4013_v43  ;;  %v878_v39 = vrot.slane %v4203_v35, 4  ;;  %v875_v40 = vrot.slane %v4201_v34, 4 }
 0x24a   :  { %3499 = vmatpush3.bf16.xpose.msra.mxu0 %v773_v37 }
 0x24b   :  { %3510 = vmatprep.subr.bf16.mxu0 %v4013_v43 }
 0x24f   :  { %3477 = vmatmul.mubr.bf16.vlgmr.msra.gmra.mrb[4].mxu1 %v542_v32 }
 0x250   :  { %3482 = vmatprep.mubr.msk.bf16.mxu1 %vm4014_vm0, %v4013_v43 }
 0x251   :  { %3501 = vmatmul.mubr.bf16.vlgmr.msra.gmra.mrb[8].mxu0 %v770_v38 }
 0x252   :  { %3511 = vmatpush3.bf16.xpose.msra.mxu0 %v878_v39  ;;  %3512 = vmatprep.mubr.msk.bf16.mxu0 %vm4014_vm0, %v4013_v43 }
 0x253   :  { %3522 = vmatprep.subr.bf16.mxu0 %v4013_v43 }
 0x259   :  { %3513 = vmatmul.mubr.bf16.vlgmr.msra.gmra.mrb[12].mxu0 %v875_v40 }
 0x25a   :  { %3538 = vmatprep.mubr.msk.bf16.mxu0 %vm4014_vm0, %v4013_v43 }
 0x261   :  { %v535_v44 = vpop.f32.mrb[4].mxu0 }
 0x262   :  { %v3472_v45 = vpop.f32.mrb[5].mxu0  ;;  %v536_v47 = vadd.f32 %v535_v44, %v201_v42 }
 0x263   :  { %v538_v46 = vpop.f32.mrb[6].mxu0 }
 0x264   :  { %v539_v48 = vadd.f32 %v538_v46, %v201_v42  ;;  %v3473_v49 = vpop.f32.mrb[7].mxu0 }
 0x266   :  { %v4219_v50 = vpack.c.bf16 %v539_v48, %v536_v47 }
 0x268   :  { %v612_v51 = vsel %vm610_vm1, %v4219_v50, 0 }
 0x269   :  { %3481 = vmatpush3.bf16.msra.mxu1 %v612_v51 }
 0x26a   :  { %3486 = vmatprep.subr.bf16.mxu1 %v4013_v43 }
 0x322   :  { %v588_v53 = vpop.f32.mrb[4].mxu1 }
 0x323   :  { %v589_v54 = vadd.f32 %v4227_v52, %v588_v53  ;;  %v3478_v55 = vpop.f32.mrb[5].mxu1 }
 0x324   :  { %v591_v56 = vpop.f32.mrb[6].mxu1  ;;  %v809_v57 = vpop.f32.mrb[8].mxu0 }
 0x325   :  { %v3479_v60 = vpop.f32.mrb[7].mxu1  ;;  %v3502_v61 = vpop.f32.mrb[9].mxu0  ;;  %v595_v62 = vsel %vm594_vm2, %v589_v54, -inf  ;;  %v810_v15 = vadd.f32 %v4234_v13, %v809_v57  ;;  %v827_v57 = vrot.slane %v4219_v50, 4 }
 0x326   :  { %v812_v63 = vpop.f32.mrb[10].mxu0  ;;  %596 = vmax.xlane.f32.xlu0 %v595_v62 }
 0x327   :  { %v3503_v0 = vpop.f32.mrb[11].mxu0  ;;  %v815_v17 = vsel %vm594_vm2, %v810_v15, -inf }
 0x32c   :  { %v914_v1 = vpop.f32.mrb[12].mxu0 }
 0x32d   :  { %v3514_v2 = vpop.f32.mrb[13].mxu0  ;;  %v915_v33 = vadd.f32 %v4234_v13, %v914_v1 }
 0x32e   :  { %v917_v3 = vpop.f32.mrb[14].mxu0  ;;  %v832_v2 = vsel %vm610_vm1, %v827_v57, 0 }
 0x32f   :  { %v3515_v4 = vpop.f32.mrb[15].mxu0  ;;  %v920_v37 = vsel %vm594_vm2, %v915_v33, -inf }
 0x3b3   :  { %v597_v5 = vpop.xlane.xlu0 %596 }
 0x3b4   :  { %v598_v9 = vsub.f32 %v589_v54, %v597_v5 }
 0x3b6   :  { %v599_v12 = vmul.f32 1.442695, %v598_v9 }
 0x3b8   :  { %3889 = vpow2.f32 %v599_v12 }
 0x3c2   :  { %v3890_v14 = vpop.eup %3889 }
 0x3c3   :  { %v601_v16 = vsel %vm594_vm2, %v3890_v14, 0.0 }
 0x3c4   :  { %602 = vadd.xlane.f32.xlu1 %v601_v16  ;;  %v3726_v16 = vld [vmem:[%s4646_s6 + $0x8] sm:$0xff]  }
 0x3c8   :  { %816 = vmax.xlane.f32.xlu1 %v815_v17  ;;  %v3727_v17 = vld [vmem:[%s4646_s6 + $0x10] sm:$0xff]  }
 0x451   :  { %v603_v18 = vpop.xlane.xlu1 %602 }
 0x452   :  { %3891 = vrcp.f32 %v603_v18  ;;  %v3728_v18 = vld [vmem:[%s4646_s6 + $0x18] sm:$0xff]  }
 0x455   :  { %v817_v22 = vpop.xlane.xlu1 %816 }
 0x456   :  { %v818_v23 = vsub.f32 %v810_v15, %v817_v22  ;;  %v3725_v15 = vld [vmem:[%s4646_s6] sm:$0xff]  }
 0x457   :  { %3523 = vmatpush3.bf16.msra.mxu0 %v3725_v15  ;;  %v3750_v15 = vld [vmem:[%s4650_s10 + $0x54] ss:$8 sps:$4 sm:$0xff]  }
 0x458   :  { %v819_v26 = vmul.f32 1.442695, %v818_v23  ;;  %3524 = vmatprep.subr.bf16.mxu0 %v4013_v43 }
 0x45a   :  { %3893 = vpow2.f32 %v819_v26 }
 0x45b   :  { %3525 = vmatpush3.bf16.msra.mxu0 %v3726_v16  ;;  %v3748_v16 = vld [vmem:[%s4650_s10 + $0x50] ss:$8 sps:$4 sm:$0xff]  }
 0x45c   :  { %v3892_v19 = vpop.eup %3891  ;;  %3526 = vmatprep.subr.bf16.mxu0 %v4013_v43 }
 0x45d   :  { %v605_v20 = vmul.f32 %v3892_v19, %v3890_v14  ;;  %v3729_v19 = vld [vmem:[%s4646_s6 + $0x20] sm:$0xff]  }
 0x45f   :  { %v606_v21 = vpack.c.bf16 %v605_v20, %v605_v20  ;;  %3527 = vmatpush3.bf16.msra.mxu0 %v3727_v17  ;;  %v3730_v20 = vld [vmem:[%s4646_s6 + $0x28] sm:$0xff]  }
 0x460   :  { %3528 = vmatprep.subr.bf16.mxu0 %v4013_v43  ;;  %v3753_v17 = vld [vmem:[%s4650_s10 + $0x64] ss:$8 sps:$4 sm:$0xff]  }
 0x461   :  { %3483 = vmatmul.mubr.msk.bf16.vlgmr.msra.gmra.mrb[8].mxu1 %vm594_vm2, %v606_v21  ;;  %v3731_v21 = vld [vmem:[%s4646_s6 + $0x30] sm:$0xff]  }
 0x462   :  { %3487 = vmatpush3.bf16.xpose.msra.mxu1 %v4203_v35  ;;  %3488 = vmatprep.mubr.msk.bf16.mxu1 %vm4014_vm0, %v4013_v43 }
 0x463   :  { %3492 = vmatprep.subr.bf16.mxu1 %v4013_v43  ;;  %3529 = vmatpush3.bf16.msra.mxu0 %v3728_v18  ;;  %v3751_v18 = vld [vmem:[%s4650_s10 + $0x60] ss:$8 sps:$4 sm:$0xff]  }
 0x464   :  { %v3894_v38 = vpop.eup %3893  ;;  %3530 = vmatprep.subr.bf16.mxu0 %v4013_v43 }
 0x465   :  { %v821_v39 = vsel %vm594_vm2, %v3894_v38, 0.0 }
 0x467   :  { %3531 = vmatpush3.bf16.msra.mxu0 %v3729_v19  ;;  %v3756_v19 = vld [vmem:[%s4650_s10 + $0x74] ss:$8 sps:$4 sm:$0xff]  }
 0x468   :  { %3532 = vmatprep.subr.bf16.mxu0 %v4013_v43 }
 0x469   :  { %3489 = vmatmul.mubr.bf16.vlgmr.msra.gmra.mrb[12].mxu1 %v4201_v34 }
 0x46a   :  { %3494 = vmatprep.mubr.msk.bf16.mxu1 %vm4014_vm0, %v4013_v43 }
 0x46b   :  { %3533 = vmatpush3.bf16.msra.mxu0 %v3730_v20  ;;  %v3754_v20 = vld [vmem:[%s4650_s10 + $0x70] ss:$8 sps:$4 sm:$0xff]  }
 0x46c   :  { %3534 = vmatprep.subr.bf16.mxu0 %v4013_v43 }
 0x46f   :  { %3535 = vmatpush3.bf16.msra.mxu0 %v3731_v21 }
 0x470   :  { %3536 = vmatprep.subr.bf16.mxu0 %v4013_v43 }
 0x534   :  { %v4247_v24 = vpop.f32.mrb[8].mxu1 }
 0x535   :  { %v3484_v25 = vpop.f32.mrb[9].mxu1 }
 0x536   :  { %v651_v27 = vpop.f32.mrb[10].mxu1 }
 0x537   :  { %v3485_v28 = vpop.f32.mrb[11].mxu1  ;;  %v3732_v27 = vld [vmem:[%s4646_s6 + $0x38] sm:$0xff]  }
 0x538   :  { %3537 = vmatpush3.bf16.msra.mxu0 %v3732_v27 }
 0x53c   :  { %v688_v29 = vpop.f32.mrb[12].mxu1 }
 0x53d   :  { %v689_v30 = vadd.f32 %v4227_v52, %v688_v29  ;;  %v3490_v31 = vpop.f32.mrb[13].mxu1 }
 0x53e   :  { %v691_v32 = vpop.f32.mrb[14].mxu1 }
 0x53f   :  { %v3491_v34 = vpop.f32.mrb[15].mxu1  ;;  %v694_v35 = vsel %vm594_vm2, %v689_v30, -inf }
 0x540   :  { %695 = vmax.xlane.f32.xlu0 %v694_v35 }
 0x544   :  { %921 = vmax.xlane.f32.xlu0 %v920_v37 }
 0x548   :  { %822 = vadd.xlane.f32.xlu0 %v821_v39 }
 0x55e   :  { %707 = vrot.lane.b32.xlu0 %v4219_v50, %s4010_s4 }
 0x5cd   :  { %v696_v40 = vpop.xlane.xlu0 %695 }
 0x5ce   :  { %v697_v42 = vsub.f32 %v689_v30, %v696_v40 }
 0x5d0   :  { %v698_v44 = vmul.f32 1.442695, %v697_v42 }
 0x5d1   :  { %v922_v45 = vpop.xlane.xlu0 %921 }
 0x5d2   :  { %3895 = vpow2.f32 %v698_v44  ;;  %v923_v46 = vsub.f32 %v915_v33, %v922_v45 }
 0x5d4   :  { %v924_v47 = vmul.f32 1.442695, %v923_v46  ;;  %v3139_v46 = vld [vmem:[%s4647_s7] ss:$0 sm:$0xff] }
 0x5d5   :  { %v823_v48 = vpop.xlane.xlu0 %822 }
 0x5d6   :  { %3897 = vpow2.f32 %v924_v47 }
 0x5d9   :  { %v708_v49 = vpop.permute.xlu0 %707 }
 0x5da   :  { %v713_v51 = vsel %vm610_vm1, %v708_v49, 0 }
 0x5db   :  { %3493 = vmatpush3.bf16.msra.mxu1 %v713_v51 }
 0x5dc   :  { %v3896_v53 = vpop.eup %3895  ;;  %3504 = vmatprep.subr.bf16.mxu1 %v4013_v43 }
 0x5dd   :  { %v700_v54 = vsel %vm594_vm2, %v3896_v53, 0.0 }
 0x5de   :  { %701 = vadd.xlane.f32.xlu1 %v700_v54 }
 0x5e0   :  { %v3898_v55 = vpop.eup %3897 }
 0x5e1   :  { %v926_v56 = vsel %vm594_vm2, %v3898_v55, 0.0 }
 0x5e2   :  { %927 = vadd.xlane.f32.xlu1 %v926_v56 }
 0x5f3   :  { %932 = vrot.lane.b32.xlu1 %v827_v57, %s4010_s4  ;;  %v3735_v57 = vld [vmem:[%s4650_s10 + $0x4] ss:$8 sps:$4 sm:$0xff]  }
 0x66b   :  { %v702_v60 = vpop.xlane.xlu1 %701 }
 0x66c   :  { %3899 = vrcp.f32 %v702_v60  ;;  %v3738_v60 = vld [vmem:[%s4650_s10 + $0x14] ss:$8 sps:$4 sm:$0xff]  }
 0x66d   :  { %3901 = vrcp.f32 %v823_v48 }
 0x66f   :  { %v928_v61 = vpop.xlane.xlu1 %927 }
 0x670   :  { %3903 = vrcp.f32 %v928_v61 }
 0x673   :  { %v933_v3 = vpop.permute.xlu1 %932 }
 0x674   :  { %v938_v9 = vsel %vm610_vm1, %v933_v3, 0  ;;  %v3741_v3 = vld [vmem:[%s4650_s10 + $0x24] ss:$8 sps:$4 sm:$0xff]  }
 0x676   :  { %v3900_v62 = vpop.eup %3899 }
 0x677   :  { %v704_v63 = vmul.f32 %v3900_v62, %v3896_v53  ;;  %v3902_v1 = vpop.eup %3901 }
 0x678   :  { %v825_v50 = vmul.f32 %v3902_v1, %v3894_v38 }
 0x679   :  { %v705_v0 = vpack.c.bf16 %v704_v63, %v704_v63 }
 0x67a   :  { %v826_v4 = vpack.c.bf16 %v825_v50, %v825_v50  ;;  %v3904_v5 = vpop.eup %3903 }
 0x67b   :  { %3495 = vmatmul.mubr.msk.bf16.vlgmr.msra.gmra.mrb[16].mxu1 %vm594_vm2, %v705_v0  ;;  %v930_v12 = vmul.f32 %v3904_v5, %v3898_v55  ;;  %v3744_v5 = vld [vmem:[%s4650_s10 + $0x34] ss:$8 sps:$4 sm:$0xff]  }
 0x67c   :  { %3505 = vmatpush3.bf16.msra.mxu1 %v832_v2  ;;  %3506 = vmatprep.mubr.msk.bf16.mxu1 %vm4014_vm0, %v4013_v43 }
 0x67d   :  { %3516 = vmatprep.subr.bf16.mxu1 %v4013_v43  ;;  %v931_v14 = vpack.c.bf16 %v930_v12, %v930_v12  ;;  %v3747_v12 = vld [vmem:[%s4650_s10 + $0x44] ss:$8 sps:$4 sm:$0xff]  }
 0x683   :  { %3507 = vmatmul.mubr.msk.bf16.vlgmr.msra.gmra.mrb[20].mxu1 %vm594_vm2, %v826_v4  ;;  %v3739_v4 = vld [vmem:[%s4650_s10 + $0x20] ss:$8 sps:$4 sm:$0xff]  }
 0x684   :  { %3517 = vmatpush3.bf16.msra.mxu1 %v938_v9  ;;  %3518 = vmatprep.mubr.msk.bf16.mxu1 %vm4014_vm0, %v4013_v43  ;;  %v3742_v9 = vld [vmem:[%s4650_s10 + $0x30] ss:$8 sps:$4 sm:$0xff]  }
 0x685   :  { %1249 = vmatprep.subr.bf16.mxu1 %v3735_v57  ;;  %v3771_v57 = vld [vmem:[#allocation4 + $0x78] sm:$0xff]  }
 0x68b   :  { %3519 = vmatmul.mubr.msk.bf16.vlgmr.msra.gmra.mrb[24].mxu1 %vm594_vm2, %v931_v14  ;;  %v3745_v14 = vld [vmem:[%s4650_s10 + $0x40] ss:$8 sps:$4 sm:$0xff]  }
 0x68c   :  { %1281 = vmatprep.mubr.bf16.mxu1 %v4012_v36 }
 0x74e   :  { %v749_v22 = vpop.f32.mrb[16].mxu1 }
 0x74f   :  { %v3496_v23 = vpop.f32.mrb[17].mxu1 }
 0x750   :  { %v752_v25 = vpop.f32.mrb[18].mxu1 }
 0x751   :  { %v3497_v26 = vpop.f32.mrb[19].mxu1 }
 0x756   :  { %v868_v28 = vpop.f32.mrb[20].mxu1 }
 0x757   :  { %v3508_v29 = vpop.f32.mrb[21].mxu1 }
 0x758   :  { %v871_v30 = vpop.f32.mrb[22].mxu1 }
 0x759   :  { %v3509_v31 = vpop.f32.mrb[23].mxu1  ;;  %v3148_v30 = vld [vmem:[%s4648_s8] ss:$0 sm:$0xff] }
 0x75e   :  { %v974_v32 = vpop.f32.mrb[24].mxu1 }
 0x75f   :  { %v3659_v33 = vpack.i.bf16 %v974_v32, %v749_v22  ;;  %v3520_v34 = vpop.f32.mrb[25].mxu1 }
 0x760   :  { %v977_v35 = vpop.f32.mrb[26].mxu1  ;;  %v3149_v34 = vld [vmem:[%s4649_s9] ss:$0 sm:$0xff] }
 0x761   :  { %3660 = vrot.lane.b32.xlu1 %v3659_v33, %s4010_s4  ;;  %v3521_v37 = vpop.f32.mrb[27].mxu1 }
 0x7d3   :  { %v3661_v38 = vpop.permute.xlu1 %3660 }
 0x7d4   :  { %v3663_v39 = vunpack.i.h.bf16 %v3661_v38  ;;  %v3662_v40 = vunpack.i.l.bf16 %v3661_v38 }
 0x7d6   :  { %v984_v42 = vsel %vm759_vm3, %v868_v28, %v3663_v39  ;;  %v760_v44 = vsel %vm759_vm3, %v4247_v24, %v3662_v40  ;;  %v3733_v24 = vld [vmem:[%s4650_s10] ss:$8 sps:$4 sm:$0xff]  }
 0x7d7   :  { %v985_v45 = vpack.c.bf16 %v984_v42, %v760_v44  ;;  %1250 = vmatpush1.bf16.msra.mxu1 %v3733_v24  ;;  %v3757_v40 = vld [vmem:[#allocation4 + $0x40] sm:$0xff]   ;;  %v3759_v44 = vld [vmem:[#allocation4 + $0x48] sm:$0xff]   ;;  %v3770_v24 = vld [vmem:[#allocation4 + $0x30] sm:$0xff]  }
 0x7d8   :  { %1251 = vmatprep.subr.bf16.mxu1 %v3738_v60  ;;  %v3758_v42 = vld [vmem:[#allocation4] sm:$0xff]   ;;  %3367 = vmatprep.subr.bf16.mxu0 %v3757_v40  ;;  %v3772_v60 = vld [vmem:[#allocation4 + $0x38] sm:$0xff]  }
 0x7d9   :  { %3539 = vmatmul.mubr.bf16.vlgmr.msra.gmra.mrb[16].mxu0 %v985_v45  ;;  %v3760_v45 = vld [vmem:[#allocation4 + $0x8] sm:$0xff]  }
 0x7da   :  { %3368 = vmatpush3.bf16.msra.mxu0 %v3758_v42 }
 0x7db   :  { %3369 = vmatprep.subr.bf16.mxu0 %v3759_v44 }
 0x7de   :  { %3370 = vmatpush3.bf16.msra.mxu0 %v3760_v45 }
 0x8ac   :  { %v1091_v47 = vpop.f32.mrb[16].mxu0 }
 0x8ad   :  { %v1092_v48 = vadd.f32 %v3139_v46, %v1091_v47  ;;  %v3540_v49 = vpop.f32.mrb[17].mxu0  ;;  %v3762_v47 = vld [vmem:[#allocation4 + $0x10] sm:$0xff]  }
 0x8ae   :  { %v1094_v51 = vpop.f32.mrb[18].mxu0  ;;  %v3764_v49 = vld [vmem:[#allocation4 + $0x18] sm:$0xff]  }
 0x8af   :  { %v1095_v53 = vadd.f32 %v3139_v46, %v1094_v51  ;;  %v3541_v54 = vpop.f32.mrb[19].mxu0  ;;  %v1098_v55 = vadd.f32 %v1092_v48, %v4162_v58  ;;  %v3736_v58 = vld [vmem:[%s4650_s10 + $0x10] ss:$8 sps:$4 sm:$0xff]   ;;  %v3765_v51 = vld [vmem:[#allocation4 + $0x60] sm:$0xff]  }
 0x8b0   :  { %1252 = vmatpush1.bf16.msra.mxu1 %v3736_v58  ;;  %v3761_v46 = vld [vmem:[#allocation4 + $0x50] sm:$0xff]   ;;  %v3763_v48 = vld [vmem:[#allocation4 + $0x58] sm:$0xff]   ;;  %v3767_v54 = vld [vmem:[#allocation4 + $0x68] sm:$0xff]  }
 0x8b1   :  { %1102 = vadd.xlane.f32.xlu1 %v1098_v55  ;;  %v1099_v56 = vadd.f32 %v1095_v53, %v4164_v59  ;;  %1253 = vmatprep.subr.bf16.mxu1 %v3741_v3  ;;  %v3766_v53 = vld [vmem:[#allocation4 + $0x20] sm:$0xff]  }
 0x8b2   :  { %3371 = vmatprep.subr.bf16.mxu0 %v3761_v46  ;;  %v1157_v58 = vld [vmem:[%s4651_s11] sm:$0x3] }
 0x8b3   :  { %1104 = vadd.xlane.f32.xlu0 %v1099_v56  ;;  %3372 = vmatpush3.bf16.msra.mxu0 %v3762_v47 }
 0x8b4   :  { %1254 = vmatpush1.bf16.msra.mxu1 %v3739_v4  ;;  %3373 = vmatprep.subr.bf16.mxu0 %v3763_v48 }
 0x8b5   :  { %1255 = vmatprep.subr.bf16.mxu1 %v3744_v5 }
 0x8b7   :  { %3374 = vmatpush3.bf16.msra.mxu0 %v3764_v49 }
 0x8b8   :  { %1256 = vmatpush1.bf16.msra.mxu1 %v3742_v9  ;;  %3375 = vmatprep.subr.bf16.mxu0 %v3765_v51 }
 0x8b9   :  { %1257 = vmatprep.subr.bf16.mxu1 %v3747_v12 }
 0x8bb   :  { %3376 = vmatpush3.bf16.msra.mxu0 %v3766_v53 }
 0x8bc   :  { %1258 = vmatpush1.bf16.msra.mxu1 %v3745_v14  ;;  %3377 = vmatprep.subr.bf16.mxu0 %v3767_v54 }
 0x8bd   :  { %1259 = vmatprep.subr.bf16.mxu1 %v3750_v15 }
 0x8c0   :  { %1260 = vmatpush1.bf16.msra.mxu1 %v3748_v16 }
 0x8c1   :  { %1261 = vmatprep.subr.bf16.mxu1 %v3753_v17 }
 0x8c4   :  { %1262 = vmatpush1.bf16.msra.mxu1 %v3751_v18 }
 0x8c5   :  { %1263 = vmatprep.subr.bf16.mxu1 %v3756_v19 }
 0x8c8   :  { %1264 = vmatpush1.bf16.msra.mxu1 %v3754_v20 }
 0x93e   :  { %v1103_v59 = vpop.xlane.xlu1 %1102 }
 0x93f   :  { %v1106_v61 = vmul.f32 0.0078125, %v1103_v59  ;;  %v1162_v59 = vrot.slane %v1157_v58, %v4185_v7 }
 0x940   :  { %v1105_v62 = vpop.xlane.xlu0 %1104 }
 0x941   :  { %v1108_v63 = vsub.f32 %v1098_v55, %v1106_v61  ;;  %v1107_v0 = vmul.f32 0.0078125, %v1105_v62  ;;  %v3768_v55 = vld [vmem:[#allocation4 + $0x28] sm:$0xff]   ;;  %v1166_v61 = vrot.slane %v1157_v58, %v4192_v10 }
 0x942   :  { %3378 = vmatpush3.bf16.msra.mxu0 %v3768_v55 }
 0x943   :  { %v1109_v1 = vsub.f32 %v1099_v56, %v1107_v0  ;;  %v1110_v2 = vmul.f32 %v1108_v63, %v1108_v63  ;;  %v3769_v56 = vld [vmem:[#allocation4 + $0x70] sm:$0xff]  }
 0x944   :  { %3379 = vmatprep.subr.bf16.mxu0 %v3769_v56 }
 0x945   :  { %1112 = vadd.xlane.f32.xlu0 %v1110_v2  ;;  %v1111_v50 = vmul.f32 %v1109_v1, %v1109_v1 }
 0x946   :  { %3380 = vmatpush3.bf16.msra.mxu0 %v3770_v24 }
 0x947   :  { %3381 = vmatprep.subr.bf16.mxu0 %v3771_v57  ;;  %v3166_v57 = vld [vmem:[%s4653_s13] ss:$0 sm:$0xff] }
 0x949   :  { %1114 = vadd.xlane.f32.xlu0 %v1111_v50 }
 0x94a   :  { %3382 = vmatpush3.bf16.msra.mxu0 %v3772_v60 }
 0x9d2   :  { %v1113_v21 = vpop.xlane.xlu0 %1112 }
 0x9d3   :  { %v1116_v22 = vmul.f32 0.0078125, %v1113_v21 }
 0x9d5   :  { %v1118_v23 = vadd.f32 1e-12, %v1116_v22 }
 0x9d6   :  { %v1115_v25 = vpop.xlane.xlu0 %1114 }
 0x9d7   :  { %3905 = vrsqrt.f32 %v1118_v23  ;;  %v1117_v26 = vmul.f32 0.0078125, %v1115_v25 }
 0x9d9   :  { %v1119_v27 = vadd.f32 1e-12, %v1117_v26 }
 0x9db   :  { %3907 = vrsqrt.f32 %v1119_v27 }
 0x9e1   :  { %v3906_v28 = vpop.eup %3905 }
 0x9e2   :  { %v1122_v29 = vmul.f32 %v3906_v28, %v1108_v63 }
 0x9e4   :  { %v1130_v33 = vmul.f32 %v3148_v30, %v1122_v29 }
 0x9e5   :  { %v3908_v31 = vpop.eup %3907 }
 0x9e6   :  { %v1123_v32 = vmul.f32 %v3908_v31, %v1109_v1  ;;  %v4367_v37 = vadd.f32 %v3149_v34, %v1130_v33 }
 0x9e8   :  { %v1131_v35 = vmul.f32 %v3148_v30, %v1123_v32 }
 0x9ea   :  { %v4369_v38 = vadd.f32 %v3149_v34, %v1131_v35 }
 0x9ec   :  { %v1140_v39 = vpack.c.bf16 %v4369_v38, %v4367_v37 }
 0x9ee   :  { %1282 = vmatmul.mubr.bf16.vlgmr.msra.gmra.mrb[28].mxu1 %v1140_v39 }
 0x9ef   :  { %1866 = vmatprep.mubr.bf16.mxu1 %v4012_v36 }
 0xac1   :  { %v1283_v62 = vpop.f32.mrb[28].mxu1 }
 0xac2   :  { %v1284_v63 = vadd.f32 %v1283_v62, %v1162_v59  ;;  %v1285_v0 = vpop.f32.mrb[29].mxu1 }
 0xac3   :  { %v1286_v1 = vadd.f32 %v1285_v0, %v1166_v61  ;;  %v1287_v2 = vpop.f32.mrb[30].mxu1 }
 0xac4   :  { %v1292_v50 = vmul.f32 %v1284_v63, %v1284_v63  ;;  %v1288_v3 = vadd.f32 %v1287_v2, %v1162_v59  ;;  %v1289_v4 = vpop.f32.mrb[31].mxu1 }
 0xac5   :  { %v1293_v5 = vmul.f32 %v1286_v1, %v1286_v1  ;;  %v1290_v9 = vadd.f32 %v1289_v4, %v1166_v61  ;;  %v3776_v4 = vld [vmem:[#allocation2 + $0x148] ss:$20 sps:$4 sm:$0xff]  }
 0xac6   :  { %v1296_v12 = vmul.f32 %v1292_v50, %v1284_v63  ;;  %v1294_v14 = vmul.f32 %v1288_v3, %v1288_v3  ;;  %v3773_v50 = vld [vmem:[#allocation2 + $0x140] ss:$20 sps:$4 sm:$0xff]  }
 0xac7   :  { %v1297_v15 = vmul.f32 %v1293_v5, %v1286_v1  ;;  %v1295_v16 = vmul.f32 %v1290_v9, %v1290_v9  ;;  %v3778_v5 = vld [vmem:[#allocation2 + $0x14c] ss:$20 sps:$4 sm:$0xff]  }
 0xac8   :  { %v1300_v17 = vmul.f32 0.044715, %v1296_v12  ;;  %v1298_v18 = vmul.f32 %v1294_v14, %v1288_v3  ;;  %v3784_v12 = vld [vmem:[#allocation2 + $0x174] ss:$20 sps:$4 sm:$0xff]   ;;  %1877 = vmatprep.subr.bf16.mxu0 %v3778_v5 }
 0xac9   :  { %v1301_v19 = vmul.f32 0.044715, %v1297_v15  ;;  %v1299_v20 = vmul.f32 %v1295_v16, %v1290_v9  ;;  %v3779_v14 = vld [vmem:[#allocation2 + $0x168] ss:$20 sps:$4 sm:$0xff]   ;;  %v3782_v15 = vld [vmem:[#allocation2 + $0x170] ss:$20 sps:$4 sm:$0xff]  }
 0xaca   :  { %v1304_v21 = vadd.f32 %v1300_v17, %v1284_v63  ;;  %v1302_v22 = vmul.f32 0.044715, %v1298_v18 }
 0xacb   :  { %v1305_v23 = vadd.f32 %v1301_v19, %v1286_v1  ;;  %v1303_v25 = vmul.f32 0.044715, %v1299_v20 }
 0xacc   :  { %v1308_v26 = vmul.f32 0.7978846, %v1304_v21  ;;  %v1306_v27 = vadd.f32 %v1302_v22, %v1288_v3  ;;  %v3787_v22 = vld [vmem:[#allocation2 + $0x194] ss:$20 sps:$4 sm:$0xff]  }
 0xacd   :  { %v1309_v28 = vmul.f32 0.7978846, %v1305_v23  ;;  %v1307_v29 = vadd.f32 %v1303_v25, %v1290_v9  ;;  %v3785_v23 = vld [vmem:[#allocation2 + $0x190] ss:$20 sps:$4 sm:$0xff]  }
 0xace   :  { %3909 = vtanh.f32 %v1308_v26  ;;  %v1310_v30 = vmul.f32 0.7978846, %v1306_v27  ;;  %v3790_v25 = vld [vmem:[#allocation2 + $0x19c] ss:$20 sps:$4 sm:$0xff]   ;;  %v3788_v26 = vld [vmem:[#allocation2 + $0x198] ss:$20 sps:$4 sm:$0xff]  }
 0xacf   :  { %3911 = vtanh.f32 %v1309_v28  ;;  %v1311_v31 = vmul.f32 0.7978846, %v1307_v29  ;;  %v3793_v27 = vld [vmem:[#allocation2 + $0x1bc] ss:$20 sps:$4 sm:$0xff]   ;;  %v3791_v28 = vld [vmem:[#allocation2 + $0x1b8] ss:$20 sps:$4 sm:$0xff]  }
 0xad0   :  { %3913 = vtanh.f32 %v1310_v30  ;;  %v3796_v29 = vld [vmem:[#allocation2 + $0x1c4] ss:$20 sps:$4 sm:$0xff]   ;;  %v3794_v30 = vld [vmem:[#allocation2 + $0x1c0] ss:$20 sps:$4 sm:$0xff]  }
 0xad1   :  { %3915 = vtanh.f32 %v1311_v31  ;;  %v3799_v31 = vld [vmem:[#allocation2 + $0x1e4] ss:$20 sps:$4 sm:$0xff]  }
 0xad8   :  { %v3910_v32 = vpop.eup %3909 }
 0xad9   :  { %v3912_v33 = vpop.eup %3911  ;;  %v1316_v34 = vadd.f32 1.0, %v3910_v32  ;;  %v3797_v32 = vld [vmem:[#allocation2 + $0x1e0] ss:$20 sps:$4 sm:$0xff]  }
 0xada   :  { %v3914_v35 = vpop.eup %3913  ;;  %v1317_v39 = vadd.f32 1.0, %v3912_v33  ;;  %v3802_v33 = vld [vmem:[#allocation2 + $0x1ec] ss:$20 sps:$4 sm:$0xff]  }
 0xadb   :  { %v3916_v40 = vpop.eup %3915  ;;  %v1320_v42 = vmul.f32 0.5, %v1316_v34  ;;  %v1318_v44 = vadd.f32 1.0, %v3914_v35  ;;  %v3800_v34 = vld [vmem:[#allocation2 + $0x1e8] ss:$20 sps:$4 sm:$0xff]   ;;  %v3805_v35 = vld [vmem:[#allocation2 + $0x20c] ss:$20 sps:$4 sm:$0xff]  }
 0xadc   :  { %v1319_v45 = vadd.f32 1.0, %v3916_v40  ;;  %v1321_v46 = vmul.f32 0.5, %v1317_v39  ;;  %v3803_v39 = vld [vmem:[#allocation2 + $0x208] ss:$20 sps:$4 sm:$0xff]  }
 0xadd   :  { %v1322_v47 = vmul.f32 0.5, %v1318_v44  ;;  %v1324_v49 = vmul.f32 %v1320_v42, %v1284_v63  ;;  %v3808_v40 = vld [vmem:[#allocation2 + $0x214] ss:$20 sps:$4 sm:$0xff]   ;;  %v3806_v42 = vld [vmem:[#allocation2 + $0x210] ss:$20 sps:$4 sm:$0xff]  }
 0xade   :  { %v1323_v48 = vmul.f32 0.5, %v1319_v45  ;;  %v1325_v53 = vmul.f32 %v1321_v46, %v1286_v1  ;;  %v3811_v44 = vld [vmem:[#allocation2 + $0x234] ss:$20 sps:$4 sm:$0xff]   ;;  %v3809_v45 = vld [vmem:[#allocation2 + $0x230] ss:$20 sps:$4 sm:$0xff]  }
 0xadf   :  { %v1326_v51 = vmul.f32 %v1322_v47, %v1288_v3  ;;  %v3775_v3 = vld [vmem:[#allocation2 + $0x144] ss:$20 sps:$4 sm:$0xff]   ;;  %v3814_v46 = vld [vmem:[#allocation2 + $0x23c] ss:$20 sps:$4 sm:$0xff]  }
 0xae0   :  { %v1327_v54 = vmul.f32 %v1323_v48, %v1290_v9  ;;  %v3781_v9 = vld [vmem:[#allocation2 + $0x16c] ss:$20 sps:$4 sm:$0xff]   ;;  %1834 = vmatprep.subr.bf16.mxu1 %v3775_v3  ;;  %v3817_v48 = vld [vmem:[#allocation2 + $0x25c] ss:$20 sps:$4 sm:$0xff]  }
 0xae1   :  { %v1328_v55 = vpack.c.bf16 %v1326_v51, %v1324_v49  ;;  %1835 = vmatpush1.bf16.msra.mxu1 %v3773_v50  ;;  %v3812_v47 = vld [vmem:[#allocation2 + $0x238] ss:$20 sps:$4 sm:$0xff]  }
 0xae2   :  { %v1329_v56 = vpack.c.bf16 %v1327_v54, %v1325_v53  ;;  %1836 = vmatprep.subr.bf16.mxu1 %v3781_v9  ;;  %v3815_v49 = vld [vmem:[#allocation2 + $0x258] ss:$20 sps:$4 sm:$0xff]   ;;  %v3818_v53 = vld [vmem:[#allocation2 + $0x260] ss:$20 sps:$4 sm:$0xff]  }
 0xae3   :  { %v3820_v51 = vld [vmem:[#allocation2 + $0x264] ss:$20 sps:$4 sm:$0xff]  }
 0xae4   :  { %1497 = vmatprep.mubr.bf16.mxu0 %v1329_v56  ;;  %v3822_v9 = vld [vmem:[#allocation2 + $0x178] ss:$20 sps:$4 sm:$0xff]  }
 0xae5   :  { %1498 = vmatmul.mubr.bf16.vlgmr.msra.gmra.mrb[20].mxu0 %v1328_v55  ;;  %1837 = vmatpush1.bf16.msra.mxu1 %v3779_v14  ;;  %v3824_v14 = vld [vmem:[#allocation2 + $0x1c8] ss:$20 sps:$4 sm:$0xff]  }
 0xae6   :  { %1909 = vmatprep.mubr.bf16.mxu0 %v4012_v36  ;;  %1878 = vmatpush1.bf16.msra.mxu0 %v3776_v4  ;;  %v3821_v4 = vld [vmem:[#allocation2 + $0x150] ss:$20 sps:$4 sm:$0xff]  }
 0xae7   :  { %1879 = vmatprep.subr.bf16.mxu0 %v3784_v12  ;;  %1838 = vmatprep.subr.bf16.mxu1 %v3787_v22  ;;  %v3823_v12 = vld [vmem:[#allocation2 + $0x1a0] ss:$20 sps:$4 sm:$0xff]  }
 0xae9   :  { %1839 = vmatpush1.bf16.msra.mxu1 %v3785_v23 }
 0xaea   :  { %1880 = vmatpush1.bf16.msra.mxu0 %v3782_v15  ;;  %1840 = vmatprep.subr.bf16.mxu1 %v3793_v27  ;;  %v3825_v15 = vld [vmem:[#allocation2 + $0x1f0] ss:$20 sps:$4 sm:$0xff]  }
 0xaeb   :  { %1881 = vmatprep.subr.bf16.mxu0 %v3790_v25 }
 0xaed   :  { %1841 = vmatpush1.bf16.msra.mxu1 %v3791_v28 }
 0xaee   :  { %1882 = vmatpush1.bf16.msra.mxu0 %v3788_v26  ;;  %1842 = vmatprep.subr.bf16.mxu1 %v3799_v31 }
 0xaef   :  { %1883 = vmatprep.subr.bf16.mxu0 %v3796_v29 }
 0xaf1   :  { %1843 = vmatpush1.bf16.msra.mxu1 %v3797_v32 }
 0xaf2   :  { %1884 = vmatpush1.bf16.msra.mxu0 %v3794_v30  ;;  %1844 = vmatprep.subr.bf16.mxu1 %v3805_v35 }
 0xaf3   :  { %1885 = vmatprep.subr.bf16.mxu0 %v3802_v33 }
 0xaf5   :  { %1845 = vmatpush1.bf16.msra.mxu1 %v3803_v39 }
 0xaf6   :  { %1886 = vmatpush1.bf16.msra.mxu0 %v3800_v34  ;;  %1846 = vmatprep.subr.bf16.mxu1 %v3811_v44 }
 0xaf7   :  { %1887 = vmatprep.subr.bf16.mxu0 %v3808_v40 }
 0xaf9   :  { %1847 = vmatpush1.bf16.msra.mxu1 %v3809_v45 }
 0xafa   :  { %1888 = vmatpush1.bf16.msra.mxu0 %v3806_v42  ;;  %1848 = vmatprep.subr.bf16.mxu1 %v3817_v48 }
 0xafb   :  { %1889 = vmatprep.subr.bf16.mxu0 %v3814_v46 }
 0xafd   :  { %1849 = vmatpush1.bf16.msra.mxu1 %v3815_v49 }
 0xafe   :  { %1890 = vmatpush1.bf16.msra.mxu0 %v3812_v47  ;;  %3542 = vmatprep.subr.bf16.mxu1 %v4013_v43 }
 0xaff   :  { %1891 = vmatprep.subr.bf16.mxu0 %v3820_v51 }
 0xb02   :  { %1892 = vmatpush1.bf16.msra.mxu0 %v3818_v53 }
 0xb03   :  { %3562 = vmatprep.subr.bf16.mxu0 %v4013_v43 }
 0xbb8   :  { %v3383_v24 = vpop.f32.mrb[20].mxu0 }
 0xbb9   :  { %v3384_v60 = vpop.f32.mrb[21].mxu0 }
 0xbba   :  { %v3385_v58 = vadd.f32 %v3384_v60, %v3383_v24  ;;  %v3386_v59 = vpop.f32.mrb[22].mxu0 }
 0xbbb   :  { %v3387_v61 = vpop.f32.mrb[23].mxu0 }
 0xbbc   :  { %v1500_v62 = vadd.f32 %v3385_v58, %v3166_v57  ;;  %v3388_v63 = vadd.f32 %v3387_v61, %v3386_v59  ;;  %v3183_v59 = vld [vmem:[%s4654_s14] ss:$0 sm:$0xff] }
 0xbbe   :  { %v1503_v0 = vadd.f32 %v3388_v63, %v3166_v57  ;;  %v1506_v1 = vadd.f32 %v1500_v62, %v4367_v37 }
 0xbc0   :  { %1510 = vadd.xlane.f32.xlu1 %v1506_v1  ;;  %v1507_v2 = vadd.f32 %v1503_v0, %v4369_v38 }
 0xbc2   :  { %1512 = vadd.xlane.f32.xlu0 %v1507_v2 }
 0xc4d   :  { %v1511_v37 = vpop.xlane.xlu1 %1510 }
 0xc4e   :  { %v1514_v16 = vmul.f32 0.0078125, %v1511_v37  ;;  %v3826_v37 = vld [vmem:[#allocation2 + $0x218] ss:$20 sps:$4 sm:$0xff]  }
 0xc4f   :  { %v1513_v38 = vpop.xlane.xlu0 %1512 }
 0xc50   :  { %v4385_v17 = vsub.f32 %v1506_v1, %v1514_v16  ;;  %v1515_v18 = vmul.f32 0.0078125, %v1513_v38  ;;  %v3184_v1 = vld [vmem:[%s4655_s15] ss:$0 sm:$0xff]  ;;  %v3828_v38 = vld [vmem:[#allocation2 + $0x268] ss:$20 sps:$4 sm:$0xff]  }
 0xc51   :  { %v3827_v16 = vld [vmem:[#allocation2 + $0x240] ss:$20 sps:$4 sm:$0xff]  }
 0xc52   :  { %v4387_v19 = vsub.f32 %v1507_v2, %v1515_v18  ;;  %v1518_v20 = vmul.f32 %v4385_v17, %v4385_v17 }
 0xc54   :  { %1520 = vadd.xlane.f32.xlu1 %v1518_v20  ;;  %v1519_v21 = vmul.f32 %v4387_v19, %v4387_v19 }
 0xc56   :  { %1522 = vadd.xlane.f32.xlu0 %v1519_v21 }
 0xce1   :  { %v1521_v54 = vpop.xlane.xlu1 %1520 }
 0xce2   :  { %v1524_v55 = vmul.f32 0.0078125, %v1521_v54 }
 0xce3   :  { %v1523_v56 = vpop.xlane.xlu0 %1522 }
 0xce4   :  { %v1526_v24 = vadd.f32 1e-12, %v1524_v55  ;;  %v1525_v57 = vmul.f32 0.0078125, %v1523_v56 }
 0xce6   :  { %3917 = vrsqrt.f32 %v1526_v24  ;;  %v1527_v60 = vadd.f32 1e-12, %v1525_v57 }
 0xce8   :  { %3919 = vrsqrt.f32 %v1527_v60 }
 0xcf0   :  { %v3918_v58 = vpop.eup %3917 }
 0xcf1   :  { %v1530_v61 = vmul.f32 %v3918_v58, %v4385_v17  ;;  %v3185_v17 = vld [vmem:[%s4645_s5 + $0x5] sm:$0x1f] }
 0xcf2   :  { %v3920_v62 = vpop.eup %3919  ;;  %v1604_v18 = vrot.slane %v3185_v17, %v4185_v7  ;;  %v1608_v22 = vrot.slane %v3185_v17, %v4192_v10  ;;  %v1616_v23 = vrot.slane %v3185_v17, %v196_v11  ;;  %v1620_v49 = vrot.slane %v3185_v17, %v200_v41 }
 0xcf3   :  { %v1531_v63 = vmul.f32 %v3920_v62, %v4387_v19  ;;  %v1538_v0 = vmul.f32 %v3183_v59, %v1530_v61  ;;  %v1612_v19 = vrot.slane %v3185_v17, %v192_v8 }
 0xcf5   :  { %v1539_v2 = vmul.f32 %v3183_v59, %v1531_v63  ;;  %v4403_v50 = vadd.f32 %v3184_v1, %v1538_v0 }
 0xcf7   :  { %v4405_v3 = vadd.f32 %v3184_v1, %v1539_v2  ;;  %v3957_v1 = vld [vmem:[%s4666_s28] ss:$0 sm:$0xff] }
 0xcf9   :  { %v1548_v5 = vpack.c.bf16 %v4405_v3, %v4403_v50 }
 0xcfb   :  { %1867 = vmatmul.mubr.bf16.vlgmr.msra.gmra.mrb[32].mxu1 %v1548_v5  ;;  %1910 = vmatmul.mubr.bf16.vlgmr.msra.gmra.mrb[24].mxu0 %v1548_v5 }
 0xcfc   :  { %3543 = vmatpush3.bf16.msra.mxu1 %v3821_v4  ;;  %3558 = vmatprep.mubr.msk.bf16.mxu1 %vm4014_vm0, %v4013_v43 }
 0xcfd   :  { %3544 = vmatprep.subr.bf16.mxu1 %v4013_v43  ;;  %3564 = vmatprep.mubr.msk.bf16.mxu0 %vm4014_vm0, %v4013_v43 }
 0xd00   :  { %3545 = vmatpush3.bf16.msra.mxu1 %v3822_v9 }
 0xd01   :  { %3546 = vmatprep.subr.bf16.mxu1 %v4013_v43 }
 0xd04   :  { %3547 = vmatpush3.bf16.msra.mxu1 %v3823_v12 }
 0xd05   :  { %3548 = vmatprep.subr.bf16.mxu1 %v4013_v43 }
 0xd08   :  { %3549 = vmatpush3.bf16.msra.mxu1 %v3824_v14 }
 0xd09   :  { %3550 = vmatprep.subr.bf16.mxu1 %v4013_v43 }
 0xd0c   :  { %3551 = vmatpush3.bf16.msra.mxu1 %v3825_v15 }
 0xd0d   :  { %3552 = vmatprep.subr.bf16.mxu1 %v4013_v43 }
 0xd10   :  { %3553 = vmatpush3.bf16.msra.mxu1 %v3826_v37 }
 0xd11   :  { %3554 = vmatprep.subr.bf16.mxu1 %v4013_v43 }
 0xd14   :  { %3555 = vmatpush3.bf16.msra.mxu1 %v3827_v16 }
 0xd15   :  { %3556 = vmatprep.subr.bf16.mxu1 %v4013_v43 }
 0xd18   :  { %3557 = vmatpush3.bf16.msra.mxu1 %v3828_v38 }
 0xd19   :  { %3568 = vmatprep.subr.bf16.mxu1 %v4013_v43 }
 0xd1b   :  { %3559 = vmatmul.mubr.bf16.vlgmr.msra.gmra.mrb[36].mxu1 %v1548_v5 }
 0xd1c   :  { %3570 = vmatprep.mubr.msk.bf16.mxu1 %vm4014_vm0, %v4013_v43 }
 0xdce   :  { %v1868_v20 = vpop.f32.mrb[32].mxu1  ;;  %v1911_v21 = vpop.f32.mrb[24].mxu0 }
 0xdcf   :  { %v1870_v25 = vpop.f32.mrb[33].mxu1  ;;  %v1913_v26 = vpop.f32.mrb[25].mxu0  ;;  %v1869_v29 = vadd.f32 %v1868_v20, %v1604_v18  ;;  %v1912_v30 = vadd.f32 %v1911_v21, %v1612_v19 }
 0xdd0   :  { %v1872_v27 = vpop.f32.mrb[34].mxu1  ;;  %v1915_v28 = vpop.f32.mrb[26].mxu0  ;;  %v1871_v35 = vadd.f32 %v1870_v25, %v1608_v22  ;;  %v1914_v39 = vadd.f32 %v1913_v26, %v1616_v23 }
 0xdd1   :  { %v1873_v31 = vadd.f32 %v1872_v27, %v1604_v18  ;;  %v1916_v32 = vadd.f32 %v1915_v28, %v1612_v19  ;;  %v1874_v33 = vpop.f32.mrb[35].mxu1  ;;  %v1917_v34 = vpop.f32.mrb[27].mxu0 }
 0xdd2   :  { %v1875_v8 = vadd.f32 %v1874_v33, %v1608_v22  ;;  %v1918_v40 = vadd.f32 %v1917_v34, %v1616_v23 }
 0xdd3   :  { %v1961_v42 = vpack.c.bf16 %v1873_v31, %v1869_v29  ;;  %v1963_v44 = vpack.c.bf16 %v1916_v32, %v1912_v30 }
 0xdd4   :  { %v1962_v45 = vpack.c.bf16 %v1875_v8, %v1871_v35  ;;  %v1964_v46 = vpack.c.bf16 %v1918_v40, %v1914_v39 }
 0xdd5   :  { %3563 = vmatpush3.bf16.xpose.msra.mxu0 %v1963_v44  ;;  %v2174_v11 = vrot.slane %v1963_v44, 4  ;;  %v2171_v47 = vrot.slane %v1961_v42, 4 }
 0xdd6   :  { %3574 = vmatprep.subr.bf16.mxu0 %v4013_v43  ;;  %v2279_v48 = vrot.slane %v1964_v46, 4  ;;  %v2276_v57 = vrot.slane %v1962_v45, 4 }
 0xddc   :  { %3565 = vmatmul.mubr.bf16.vlgmr.msra.gmra.mrb[28].mxu0 %v1961_v42 }
 0xddd   :  { %3575 = vmatpush3.bf16.xpose.msra.mxu0 %v1964_v46  ;;  %3576 = vmatprep.mubr.msk.bf16.mxu0 %vm4014_vm0, %v4013_v43 }
 0xdde   :  { %3586 = vmatprep.subr.bf16.mxu0 %v4013_v43 }
 0xde4   :  { %3577 = vmatmul.mubr.bf16.vlgmr.msra.gmra.mrb[32].mxu0 %v1962_v45 }
 0xde5   :  { %3587 = vmatpush3.bf16.xpose.msra.mxu0 %v2174_v11  ;;  %3588 = vmatprep.mubr.msk.bf16.mxu0 %vm4014_vm0, %v4013_v43 }
 0xde6   :  { %3598 = vmatprep.subr.bf16.mxu0 %v4013_v43 }
 0xdec   :  { %3589 = vmatmul.mubr.bf16.vlgmr.msra.gmra.mrb[36].mxu0 %v2171_v47 }
 0xded   :  { %3599 = vmatpush3.bf16.xpose.msra.mxu0 %v2279_v48  ;;  %3600 = vmatprep.mubr.msk.bf16.mxu0 %vm4014_vm0, %v4013_v43 }
 0xdee   :  { %v1954_v51 = vpop.f32.mrb[36].mxu1  ;;  %3610 = vmatprep.subr.bf16.mxu0 %v4013_v43 }
 0xdef   :  { %v3560_v53 = vpop.f32.mrb[37].mxu1  ;;  %v1955_v55 = vadd.f32 %v1954_v51, %v1620_v49 }
 0xdf0   :  { %v1957_v54 = vpop.f32.mrb[38].mxu1 }
 0xdf1   :  { %v1958_v56 = vadd.f32 %v1957_v54, %v1620_v49  ;;  %v3561_v24 = vpop.f32.mrb[39].mxu1 }
 0xdf3   :  { %v4444_v60 = vpack.c.bf16 %v1958_v56, %v1955_v55 }
 0xdf4   :  { %3601 = vmatmul.mubr.bf16.vlgmr.msra.gmra.mrb[40].mxu0 %v2276_v57 }
 0xdf5   :  { %v2022_v6 = vsel %vm610_vm1, %v4444_v60, 0  ;;  %3626 = vmatprep.mubr.msk.bf16.mxu0 %vm4014_vm0, %v4013_v43  ;;  %v2228_v11 = vrot.slane %v4444_v60, 4 }
 0xdf6   :  { %3569 = vmatpush3.bf16.msra.mxu1 %v2022_v6 }
 0xdf7   :  { %3580 = vmatprep.subr.bf16.mxu1 %v4013_v43 }
 0xeaf   :  { %v2000_v41 = vpop.f32.mrb[28].mxu0 }
 0xeb0   :  { %v2001_v58 = vadd.f32 %v4227_v52, %v2000_v41  ;;  %v3566_v59 = vpop.f32.mrb[29].mxu0  ;;  %v2233_v41 = vsel %vm610_vm1, %v2228_v11, 0 }
 0xeb1   :  { %v2003_v61 = vpop.f32.mrb[30].mxu0 }
 0xeb2   :  { %v3567_v62 = vpop.f32.mrb[31].mxu0  ;;  %v2006_v63 = vsel %vm594_vm2, %v2001_v58, -inf }
 0xeb3   :  { %2007 = vmax.xlane.f32.xlu1 %v2006_v63 }
 0xeb7   :  { %v2098_v0 = vpop.f32.mrb[32].mxu0 }
 0xeb8   :  { %v2099_v2 = vadd.f32 %v3957_v1, %v2098_v0  ;;  %v3578_v4 = vpop.f32.mrb[33].mxu0 }
 0xeb9   :  { %v2101_v5 = vpop.f32.mrb[34].mxu0  ;;  %v3829_v4 = vld [vmem:[%s4646_s6 + $0x40] sm:$0xff]  }
 0xeba   :  { %v3579_v9 = vpop.f32.mrb[35].mxu0  ;;  %v2104_v12 = vsel %vm594_vm2, %v2099_v2, -inf  ;;  %3611 = vmatpush3.bf16.msra.mxu0 %v3829_v4  ;;  %v3830_v5 = vld [vmem:[%s4646_s6 + $0x48] sm:$0xff]  }
 0xebb   :  { %2105 = vmax.xlane.f32.xlu0 %v2104_v12  ;;  %3612 = vmatprep.subr.bf16.mxu0 %v4013_v43  ;;  %v3831_v9 = vld [vmem:[%s4646_s6 + $0x50] sm:$0xff]   ;;  %v3833_v12 = vld [vmem:[%s4646_s6 + $0x60] sm:$0xff]  }
 0xebc   :  { %v3855_v4 = vld [vmem:[%s4650_s10 + $0xe0] ss:$8 sps:$4 sm:$0xff]  }
 0xebe   :  { %3613 = vmatpush3.bf16.msra.mxu0 %v3830_v5  ;;  %v3860_v5 = vld [vmem:[%s4650_s10 + $0xf4] ss:$8 sps:$4 sm:$0xff]  }
 0xebf   :  { %v2210_v14 = vpop.f32.mrb[36].mxu0  ;;  %3614 = vmatprep.subr.bf16.mxu0 %v4013_v43 }
 0xec0   :  { %v2211_v52 = vadd.f32 %v4234_v13, %v2210_v14  ;;  %v3590_v15 = vpop.f32.mrb[37].mxu0  ;;  %v3834_v14 = vld [vmem:[%s4646_s6 + $0x68] sm:$0xff]  }
 0xec1   :  { %v2213_v37 = vpop.f32.mrb[38].mxu0 }
 0xec2   :  { %v3591_v16 = vpop.f32.mrb[39].mxu0  ;;  %v2216_v38 = vsel %vm594_vm2, %v2211_v52, -inf  ;;  %3615 = vmatpush3.bf16.msra.mxu0 %v3831_v9  ;;  %v3858_v9 = vld [vmem:[%s4650_s10 + $0xf0] ss:$8 sps:$4 sm:$0xff]  }
 0xec3   :  { %2217 = vmax.xlane.f32.xlu1 %v2216_v38  ;;  %3616 = vmatprep.subr.bf16.mxu0 %v4013_v43 }
 0xec7   :  { %v2315_v17 = vpop.f32.mrb[40].mxu0 }
 0xec8   :  { %v2316_v18 = vadd.f32 %v4234_v13, %v2315_v17  ;;  %v3602_v19 = vpop.f32.mrb[41].mxu0 }
 0xec9   :  { %v2318_v20 = vpop.f32.mrb[42].mxu0 }
 0xeca   :  { %v3603_v21 = vpop.f32.mrb[43].mxu0  ;;  %v2321_v22 = vsel %vm594_vm2, %v2316_v18, -inf }
 0xecb   :  { %2322 = vmax.xlane.f32.xlu0 %v2321_v22  ;;  %v3836_v21 = vld [vmem:[%s4646_s6 + $0x78] sm:$0xff]  }
 0xf40   :  { %v2008_v23 = vpop.xlane.xlu1 %2007 }
 0xf41   :  { %v2009_v25 = vsub.f32 %v2001_v58, %v2008_v23 }
 0xf43   :  { %v2010_v26 = vmul.f32 1.442695, %v2009_v25 }
 0xf45   :  { %3921 = vpow2.f32 %v2010_v26 }
 0xf48   :  { %v2106_v27 = vpop.xlane.xlu0 %2105 }
 0xf49   :  { %v2107_v28 = vsub.f32 %v2099_v2, %v2106_v27 }
 0xf4b   :  { %v2108_v29 = vmul.f32 1.442695, %v2107_v28 }
 0xf4d   :  { %3923 = vpow2.f32 %v2108_v29 }
 0xf4f   :  { %v3922_v30 = vpop.eup %3921 }
 0xf50   :  { %v2218_v31 = vpop.xlane.xlu1 %2217  ;;  %v2012_v32 = vsel %vm594_vm2, %v3922_v30, 0.0 }
 0xf51   :  { %v2219_v33 = vsub.f32 %v2211_v52, %v2218_v31  ;;  %2013 = vadd.xlane.f32.xlu1 %v2012_v32  ;;  %v3835_v52 = vld [vmem:[%s4646_s6 + $0x70] sm:$0xff]  }
 0xf53   :  { %v2220_v13 = vmul.f32 1.442695, %v2219_v33 }
 0xf55   :  { %3925 = vpow2.f32 %v2220_v13 }
 0xf57   :  { %v3924_v34 = vpop.eup %3923 }
 0xf58   :  { %v2323_v35 = vpop.xlane.xlu0 %2322  ;;  %v2110_v39 = vsel %vm594_vm2, %v3924_v34, 0.0 }
 0xf59   :  { %v2324_v8 = vsub.f32 %v2316_v18, %v2323_v35  ;;  %2111 = vadd.xlane.f32.xlu0 %v2110_v39 }
 0xf5b   :  { %v2325_v40 = vmul.f32 1.442695, %v2324_v8  ;;  %v3247_v8 = vld [vmem:[%s4647_s7 + $0x1] ss:$0 sm:$0xff] }
 0xf5d   :  { %3927 = vpow2.f32 %v2325_v40 }
 0xf5f   :  { %v3926_v42 = vpop.eup %3925 }
 0xf60   :  { %v2222_v44 = vsel %vm594_vm2, %v3926_v42, 0.0 }
 0xf61   :  { %2223 = vadd.xlane.f32.xlu1 %v2222_v44 }
 0xf67   :  { %v3928_v45 = vpop.eup %3927 }
 0xf68   :  { %v2327_v46 = vsel %vm594_vm2, %v3928_v45, 0.0 }
 0xf69   :  { %2328 = vadd.xlane.f32.xlu0 %v2327_v46 }
 0xf72   :  { %2117 = vrot.lane.b32.xlu1 %v4444_v60, %s4010_s4 }
 0xf7f   :  { %2333 = vrot.lane.b32.xlu0 %v2228_v11, %s4010_s4 }
 0xfde   :  { %v2014_v47 = vpop.xlane.xlu1 %2013 }
 0xfdf   :  { %3929 = vrcp.f32 %v2014_v47 }
 0xfe6   :  { %v2112_v48 = vpop.xlane.xlu0 %2111 }
 0xfe7   :  { %3931 = vrcp.f32 %v2112_v48 }
 0xfe9   :  { %v3930_v49 = vpop.eup %3929 }
 0xfea   :  { %v2016_v51 = vmul.f32 %v3930_v49, %v3922_v30  ;;  %v3837_v49 = vld [vmem:[%s4650_s10 + $0x80] ss:$8 sps:$4 sm:$0xff]  }
 0xfec   :  { %v2017_v53 = vpack.c.bf16 %v2016_v51, %v2016_v51  ;;  %v3839_v51 = vld [vmem:[%s4650_s10 + $0x84] ss:$8 sps:$4 sm:$0xff]  }
 0xfee   :  { %3571 = vmatmul.mubr.msk.bf16.vlgmr.msra.gmra.mrb[40].mxu1 %vm594_vm2, %v2017_v53  ;;  %v2224_v54 = vpop.xlane.xlu1 %2223  ;;  %v3842_v53 = vld [vmem:[%s4650_s10 + $0x94] ss:$8 sps:$4 sm:$0xff]  }
 0xfef   :  { %3933 = vrcp.f32 %v2224_v54  ;;  %3582 = vmatprep.mubr.msk.bf16.mxu1 %vm4014_vm0, %v4013_v43 }
 0xff1   :  { %v3932_v55 = vpop.eup %3931 }
 0xff2   :  { %v2114_v56 = vmul.f32 %v3932_v55, %v3924_v34  ;;  %v2118_v24 = vpop.permute.xlu1 %2117 }
 0xff3   :  { %v2123_v57 = vsel %vm610_vm1, %v2118_v24, 0 }
 0xff4   :  { %3581 = vmatpush3.bf16.msra.mxu1 %v2123_v57  ;;  %v2115_v60 = vpack.c.bf16 %v2114_v56, %v2114_v56 }
 0xff5   :  { %3592 = vmatprep.subr.bf16.mxu1 %v4013_v43 }
 0xff6   :  { %v2329_v6 = vpop.xlane.xlu0 %2328 }
 0xff7   :  { %3935 = vrcp.f32 %v2329_v6  ;;  %3583 = vmatmul.mubr.msk.bf16.vlgmr.msra.gmra.mrb[44].mxu1 %vm594_vm2, %v2115_v60 }
 0xff8   :  { %3593 = vmatpush3.bf16.msra.mxu1 %v2233_v41  ;;  %3594 = vmatprep.mubr.msk.bf16.mxu1 %vm4014_vm0, %v4013_v43  ;;  %v3845_v41 = vld [vmem:[%s4650_s10 + $0xa4] ss:$8 sps:$4 sm:$0xff]  }
 0xff9   :  { %v3934_v58 = vpop.eup %3933  ;;  %3604 = vmatprep.subr.bf16.mxu1 %v4013_v43 }
 0xffa   :  { %v2226_v59 = vmul.f32 %v3934_v58, %v3926_v42  ;;  %v2334_v61 = vpop.permute.xlu0 %2333  ;;  %v3843_v58 = vld [vmem:[%s4650_s10 + $0xa0] ss:$8 sps:$4 sm:$0xff]  }
 0xffb   :  { %v2339_v63 = vsel %vm610_vm1, %v2334_v61, 0  ;;  %v3846_v61 = vld [vmem:[%s4650_s10 + $0xb0] ss:$8 sps:$4 sm:$0xff]  }
 0xffc   :  { %v2227_v62 = vpack.c.bf16 %v2226_v59, %v2226_v59  ;;  %v3848_v59 = vld [vmem:[%s4650_s10 + $0xb4] ss:$8 sps:$4 sm:$0xff]  }
 0xfff   :  { %3595 = vmatmul.mubr.msk.bf16.vlgmr.msra.gmra.mrb[48].mxu1 %vm594_vm2, %v2227_v62  ;;  %v3851_v62 = vld [vmem:[%s4650_s10 + $0xc4] ss:$8 sps:$4 sm:$0xff]  }
0x1000   :  { %3605 = vmatpush3.bf16.msra.mxu1 %v2339_v63  ;;  %3606 = vmatprep.mubr.msk.bf16.mxu1 %vm4014_vm0, %v4013_v43  ;;  %v3849_v63 = vld [vmem:[%s4650_s10 + $0xc0] ss:$8 sps:$4 sm:$0xff]  }
0x1001   :  { %v3936_v0 = vpop.eup %3935  ;;  %2656 = vmatprep.subr.bf16.mxu1 %v3839_v51 }
0x1002   :  { %v2331_v1 = vmul.f32 %v3936_v0, %v3928_v45  ;;  %v3854_v0 = vld [vmem:[%s4650_s10 + $0xd4] ss:$8 sps:$4 sm:$0xff]  }
0x1004   :  { %v2332_v2 = vpack.c.bf16 %v2331_v1, %v2331_v1  ;;  %v3852_v1 = vld [vmem:[%s4650_s10 + $0xd0] ss:$8 sps:$4 sm:$0xff]  }
0x1007   :  { %3607 = vmatmul.mubr.msk.bf16.vlgmr.msra.gmra.mrb[52].mxu1 %vm594_vm2, %v2332_v2  ;;  %v3857_v2 = vld [vmem:[%s4650_s10 + $0xe4] ss:$8 sps:$4 sm:$0xff]  }
0x1008   :  { %2688 = vmatprep.mubr.bf16.mxu1 %v4012_v36  ;;  %v3832_v36 = vld [vmem:[%s4646_s6 + $0x58] sm:$0xff]   ;;  %2657 = vmatpush1.bf16.msra.mxu1 %v3837_v49 }
0x1009   :  { %3617 = vmatpush3.bf16.msra.mxu0 %v3832_v36  ;;  %2658 = vmatprep.subr.bf16.mxu1 %v3842_v53 }
0x100a   :  { %3618 = vmatprep.subr.bf16.mxu0 %v4013_v43 }
0x100d   :  { %3619 = vmatpush3.bf16.msra.mxu0 %v3833_v12 }
0x100e   :  { %3620 = vmatprep.subr.bf16.mxu0 %v4013_v43 }
0x1011   :  { %3621 = vmatpush3.bf16.msra.mxu0 %v3834_v14 }
0x1012   :  { %3622 = vmatprep.subr.bf16.mxu0 %v4013_v43 }
0x1015   :  { %3623 = vmatpush3.bf16.msra.mxu0 %v3835_v52 }
0x1016   :  { %3624 = vmatprep.subr.bf16.mxu0 %v4013_v43 }
0x1019   :  { %3625 = vmatpush3.bf16.msra.mxu0 %v3836_v21  ;;  %v3259_v21 = vld [vmem:[%s4649_s9 + $0x1] ss:$0 sm:$0xff] }
0x10c1   :  { %v2058_v15 = vpop.f32.mrb[40].mxu1 }
0x10c2   :  { %v3572_v37 = vpop.f32.mrb[41].mxu1 }
0x10c3   :  { %v2061_v16 = vpop.f32.mrb[42].mxu1 }
0x10c4   :  { %v3573_v38 = vpop.f32.mrb[43].mxu1 }
0x10c5   :  { %v3258_v38 = vld [vmem:[%s4648_s8 + $0x1] ss:$0 sm:$0xff] }
0x10ca   :  { %v2159_v17 = vpop.f32.mrb[44].mxu1 }
0x10cb   :  { %v3584_v18 = vpop.f32.mrb[45].mxu1 }
0x10cc   :  { %v2162_v19 = vpop.f32.mrb[46].mxu1 }
0x10cd   :  { %v3585_v20 = vpop.f32.mrb[47].mxu1 }
0x10d2   :  { %v2269_v22 = vpop.f32.mrb[48].mxu1 }
0x10d3   :  { %v3596_v23 = vpop.f32.mrb[49].mxu1 }
0x10d4   :  { %v2272_v25 = vpop.f32.mrb[50].mxu1 }
0x10d5   :  { %v3597_v26 = vpop.f32.mrb[51].mxu1 }
0x10da   :  { %v2375_v27 = vpop.f32.mrb[52].mxu1 }
0x10db   :  { %v3664_v28 = vpack.i.bf16 %v2375_v27, %v2159_v17  ;;  %v3608_v29 = vpop.f32.mrb[53].mxu1  ;;  %v3861_v27 = vld [vmem:[#allocation4 + $0xc0] sm:$0xff]  }
0x10dc   :  { %v2378_v30 = vpop.f32.mrb[54].mxu1  ;;  %3423 = vmatprep.subr.bf16.mxu0 %v3861_v27  ;;  %v3863_v29 = vld [vmem:[#allocation4 + $0xc8] sm:$0xff]  }
0x10dd   :  { %3665 = vrot.lane.b32.xlu1 %v3664_v28, %s4010_s4  ;;  %v3609_v31 = vpop.f32.mrb[55].mxu1  ;;  %v3862_v28 = vld [vmem:[#allocation4 + $0x80] sm:$0xff]   ;;  %v3864_v30 = vld [vmem:[#allocation4 + $0x88] sm:$0xff]  }
0x10de   :  { %v3865_v31 = vld [vmem:[#allocation4 + $0xd0] sm:$0xff]  }
0x114f   :  { %v3666_v32 = vpop.permute.xlu1 %3665 }
0x1150   :  { %v3668_v33 = vunpack.i.h.bf16 %v3666_v32  ;;  %v3667_v13 = vunpack.i.l.bf16 %v3666_v32  ;;  %v3866_v32 = vld [vmem:[#allocation4 + $0x90] sm:$0xff]  }
0x1152   :  { %v2385_v34 = vsel %vm759_vm3, %v2269_v22, %v3668_v33  ;;  %v2169_v35 = vsel %vm759_vm3, %v2058_v15, %v3667_v13  ;;  %v3867_v33 = vld [vmem:[#allocation4 + $0xd8] sm:$0xff]  }
0x1153   :  { %v2386_v39 = vpack.c.bf16 %v2385_v34, %v2169_v35  ;;  %v3868_v13 = vld [vmem:[#allocation4 + $0x98] sm:$0xff]   ;;  %v3869_v34 = vld [vmem:[#allocation4 + $0xe0] sm:$0xff]  }
0x1154   :  { %v3870_v35 = vld [vmem:[#allocation4 + $0xa0] sm:$0xff]  }
0x1155   :  { %3627 = vmatmul.mubr.bf16.vlgmr.msra.gmra.mrb[44].mxu0 %v2386_v39  ;;  %v3871_v39 = vld [vmem:[#allocation4 + $0xe8] sm:$0xff]  }
0x1156   :  { %3424 = vmatpush3.bf16.msra.mxu0 %v3862_v28 }
0x1157   :  { %3425 = vmatprep.subr.bf16.mxu0 %v3863_v29 }
0x115a   :  { %3426 = vmatpush3.bf16.msra.mxu0 %v3864_v30 }
0x115b   :  { %3427 = vmatprep.subr.bf16.mxu0 %v3865_v31 }
0x115e   :  { %3428 = vmatpush3.bf16.msra.mxu0 %v3866_v32  ;;  %v3294_v32 = vld [vmem:[%s4653_s13 + $0x1] ss:$0 sm:$0xff] }
0x115f   :  { %3429 = vmatprep.subr.bf16.mxu0 %v3867_v33 }
0x1162   :  { %3430 = vmatpush3.bf16.msra.mxu0 %v3868_v13 }
0x1163   :  { %3431 = vmatprep.subr.bf16.mxu0 %v3869_v34 }
0x1166   :  { %3432 = vmatpush3.bf16.msra.mxu0 %v3870_v35 }
0x1167   :  { %3433 = vmatprep.subr.bf16.mxu0 %v3871_v39 }
0x1228   :  { %v2494_v40 = vpop.f32.mrb[44].mxu0 }
0x1229   :  { %v2495_v42 = vadd.f32 %v3247_v8, %v2494_v40  ;;  %v3628_v44 = vpop.f32.mrb[45].mxu0  ;;  %v3873_v40 = vld [vmem:[#allocation4 + $0xf0] sm:$0xff]  }
0x122a   :  { %v2497_v45 = vpop.f32.mrb[46].mxu0  ;;  %v3875_v44 = vld [vmem:[#allocation4 + $0xf8] sm:$0xff]  }
0x122b   :  { %v2498_v46 = vadd.f32 %v3247_v8, %v2497_v45  ;;  %v3629_v11 = vpop.f32.mrb[47].mxu0  ;;  %v2501_v47 = vadd.f32 %v2495_v42, %v4403_v50  ;;  %v3840_v50 = vld [vmem:[%s4650_s10 + $0x90] ss:$8 sps:$4 sm:$0xff]   ;;  %v3872_v8 = vld [vmem:[#allocation4 + $0xa8] sm:$0xff]  }
0x122c   :  { %2659 = vmatpush1.bf16.msra.mxu1 %v3840_v50  ;;  %3434 = vmatpush3.bf16.msra.mxu0 %v3872_v8  ;;  %v3874_v42 = vld [vmem:[#allocation4 + $0xb0] sm:$0xff]   ;;  %v3876_v45 = vld [vmem:[#allocation4 + $0xb8] sm:$0xff]  }
0x122d   :  { %2507 = vadd.xlane.f32.xlu1 %v2501_v47  ;;  %v2502_v48 = vadd.f32 %v2498_v46, %v4405_v3  ;;  %2660 = vmatprep.subr.bf16.mxu1 %v3845_v41  ;;  %v3276_v46 = vld [vmem:[%s4651_s11 + $0x2] sm:$0x3] }
0x122e   :  { %3435 = vmatprep.subr.bf16.mxu0 %v3873_v40  ;;  %v2569_v11 = vrot.slane %v3276_v46, %v4185_v7 }
0x122f   :  { %2509 = vadd.xlane.f32.xlu0 %v2502_v48 }
0x1230   :  { %2661 = vmatpush1.bf16.msra.mxu1 %v3843_v58  ;;  %3436 = vmatpush3.bf16.msra.mxu0 %v3874_v42 }
0x1231   :  { %2662 = vmatprep.subr.bf16.mxu1 %v3848_v59  ;;  %3437 = vmatprep.subr.bf16.mxu0 %v3875_v44 }
0x1234   :  { %2663 = vmatpush1.bf16.msra.mxu1 %v3846_v61  ;;  %3438 = vmatpush3.bf16.msra.mxu0 %v3876_v45  ;;  %v3877_v45 = vld [vmem:[%s4656_s16] sm:$0xff]  }
0x1235   :  { %2664 = vmatprep.subr.bf16.mxu1 %v3851_v62 }
0x1238   :  { %2665 = vmatpush1.bf16.msra.mxu1 %v3849_v63 }
0x1239   :  { %2666 = vmatprep.subr.bf16.mxu1 %v3854_v0 }
0x123c   :  { %2667 = vmatpush1.bf16.msra.mxu1 %v3852_v1 }
0x123d   :  { %2668 = vmatprep.subr.bf16.mxu1 %v3857_v2 }
0x1240   :  { %2669 = vmatpush1.bf16.msra.mxu1 %v3855_v4 }
0x1241   :  { %2670 = vmatprep.subr.bf16.mxu1 %v3860_v5 }
0x1244   :  { %2671 = vmatpush1.bf16.msra.mxu1 %v3858_v9 }
0x1245   :  { %3630 = vmatprep.subr.bf16.mxu1 %v4013_v43 }
0x12ba   :  { %v2508_v3 = vpop.xlane.xlu1 %2507 }
0x12bb   :  { %v2511_v54 = vmul.f32 0.0078125, %v2508_v3 }
0x12bc   :  { %v2510_v55 = vpop.xlane.xlu0 %2509 }
0x12bd   :  { %v2513_v56 = vsub.f32 %v2501_v47, %v2511_v54  ;;  %v2512_v24 = vmul.f32 0.0078125, %v2510_v55  ;;  %v2573_v47 = vrot.slane %v3276_v46, %v4192_v10  ;;  %v3878_v46 = vld [vmem:[%s4656_s16 + $0x8] sm:$0xff]  }
0x12bf   :  { %v2514_v57 = vsub.f32 %v2502_v48, %v2512_v24  ;;  %v2515_v60 = vmul.f32 %v2513_v56, %v2513_v56 }
0x12c1   :  { %2517 = vadd.xlane.f32.xlu0 %v2515_v60  ;;  %v2516_v6 = vmul.f32 %v2514_v57, %v2514_v57 }
0x12c3   :  { %2519 = vadd.xlane.f32.xlu1 %v2516_v6 }
0x134e   :  { %v2518_v36 = vpop.xlane.xlu0 %2517 }
0x134f   :  { %v2521_v12 = vmul.f32 0.0078125, %v2518_v36 }
0x1350   :  { %v2520_v14 = vpop.xlane.xlu1 %2519 }
0x1351   :  { %v2523_v52 = vadd.f32 1e-12, %v2521_v12  ;;  %v2522_v15 = vmul.f32 0.0078125, %v2520_v14 }
0x1353   :  { %3937 = vrsqrt.f32 %v2523_v52  ;;  %v2524_v37 = vadd.f32 1e-12, %v2522_v15 }
0x1355   :  { %3939 = vrsqrt.f32 %v2524_v37 }
0x135d   :  { %v3938_v16 = vpop.eup %3937 }
0x135e   :  { %v2527_v17 = vmul.f32 %v3938_v16, %v2513_v56 }
0x135f   :  { %v3940_v18 = vpop.eup %3939 }
0x1360   :  { %v2528_v19 = vmul.f32 %v3940_v18, %v2514_v57  ;;  %v2535_v20 = vmul.f32 %v3258_v38, %v2527_v17 }
0x1362   :  { %v2536_v22 = vmul.f32 %v3258_v38, %v2528_v19  ;;  %v4579_v23 = vadd.f32 %v3259_v21, %v2535_v20 }
0x1364   :  { %v4581_v25 = vadd.f32 %v3259_v21, %v2536_v22 }
0x1366   :  { %v2545_v26 = vpack.c.bf16 %v4581_v25, %v4579_v23 }
0x1368   :  { %2689 = vmatmul.mubr.bf16.vlgmr.msra.gmra.mrb[56].mxu1 %v2545_v26 }
0x1369   :  { %3646 = vmatprep.mubr.msk.bf16.mxu1 %vm4014_vm0, %v4013_v43  ;;  %3631 = vmatpush3.bf16.msra.mxu1 %v3877_v45 }
0x136a   :  { %3632 = vmatprep.subr.bf16.mxu1 %v4013_v43 }
0x136d   :  { %3633 = vmatpush3.bf16.msra.mxu1 %v3878_v46 }
0x136e   :  { %3634 = vmatprep.subr.bf16.mxu1 %v4013_v43 }
0x143b   :  { %v2690_v48 = vpop.f32.mrb[56].mxu1 }
0x143c   :  { %v2691_v49 = vadd.f32 %v2690_v48, %v2569_v11  ;;  %v2692_v51 = vpop.f32.mrb[57].mxu1 }
0x143d   :  { %v2693_v53 = vadd.f32 %v2692_v51, %v2573_v47  ;;  %v2694_v50 = vpop.f32.mrb[58].mxu1 }
0x143e   :  { %v2699_v3 = vmul.f32 %v2691_v49, %v2691_v49  ;;  %v2695_v54 = vadd.f32 %v2694_v50, %v2569_v11  ;;  %v2696_v55 = vpop.f32.mrb[59].mxu1  ;;  %v3879_v50 = vld [vmem:[%s4656_s16 + $0x10] sm:$0xff]  }
0x143f   :  { %v2700_v56 = vmul.f32 %v2693_v53, %v2693_v53  ;;  %v2697_v24 = vadd.f32 %v2696_v55, %v2573_v47  ;;  %3635 = vmatpush3.bf16.msra.mxu1 %v3879_v50  ;;  %v3882_v55 = vld [vmem:[%s4656_s16 + $0x28] sm:$0xff]  }
0x1440   :  { %v2703_v57 = vmul.f32 %v2699_v3, %v2691_v49  ;;  %v2701_v60 = vmul.f32 %v2695_v54, %v2695_v54  ;;  %3636 = vmatprep.subr.bf16.mxu1 %v4013_v43  ;;  %v3880_v3 = vld [vmem:[%s4656_s16 + $0x18] sm:$0xff]  }
0x1441   :  { %v2704_v6 = vmul.f32 %v2700_v56, %v2693_v53  ;;  %v2702_v41 = vmul.f32 %v2697_v24, %v2697_v24  ;;  %v3883_v56 = vld [vmem:[%s4656_s16 + $0x30] sm:$0xff]  }
0x1442   :  { %v2707_v58 = vmul.f32 0.044715, %v2703_v57  ;;  %v2705_v59 = vmul.f32 %v2701_v60, %v2695_v54 }
0x1443   :  { %v2708_v61 = vmul.f32 0.044715, %v2704_v6  ;;  %v2706_v7 = vmul.f32 %v2702_v41, %v2697_v24  ;;  %3637 = vmatpush3.bf16.msra.mxu1 %v3880_v3 }
0x1444   :  { %v2711_v62 = vadd.f32 %v2707_v58, %v2691_v49  ;;  %v2709_v10 = vmul.f32 0.044715, %v2705_v59  ;;  %3638 = vmatprep.subr.bf16.mxu1 %v4013_v43 }
0x1445   :  { %v2712_v63 = vadd.f32 %v2708_v61, %v2693_v53  ;;  %v2710_v0 = vmul.f32 0.044715, %v2706_v7  ;;  %v3313_v7 = vld [vmem:[%s4654_s14 + $0x1] ss:$0 sm:$0xff] }
0x1446   :  { %v2715_v1 = vmul.f32 0.7978846, %v2711_v62  ;;  %v2713_v2 = vadd.f32 %v2709_v10, %v2695_v54 }
0x1447   :  { %v2716_v4 = vmul.f32 0.7978846, %v2712_v63  ;;  %v2714_v5 = vadd.f32 %v2710_v0, %v2697_v24 }
0x1448   :  { %3941 = vtanh.f32 %v2715_v1  ;;  %v2717_v9 = vmul.f32 0.7978846, %v2713_v2 }
0x1449   :  { %3943 = vtanh.f32 %v2716_v4  ;;  %v2718_v36 = vmul.f32 0.7978846, %v2714_v5 }
0x144a   :  { %3945 = vtanh.f32 %v2717_v9  ;;  %v3315_v9 = vld [vmem:[%s4657_s17] ss:$0 sm:$0xff] }
0x144b   :  { %3947 = vtanh.f32 %v2718_v36 }
0x1452   :  { %v3942_v12 = vpop.eup %3941 }
0x1453   :  { %v3944_v14 = vpop.eup %3943  ;;  %v2723_v52 = vadd.f32 1.0, %v3942_v12 }
0x1454   :  { %v3946_v15 = vpop.eup %3945  ;;  %v2724_v37 = vadd.f32 1.0, %v3944_v14 }
0x1455   :  { %v3948_v16 = vpop.eup %3947  ;;  %v2727_v38 = vmul.f32 0.5, %v2723_v52  ;;  %v2725_v17 = vadd.f32 1.0, %v3946_v15 }
0x1456   :  { %v2726_v18 = vadd.f32 1.0, %v3948_v16  ;;  %v2728_v19 = vmul.f32 0.5, %v2724_v37 }
0x1457   :  { %v2729_v20 = vmul.f32 0.5, %v2725_v17  ;;  %v2731_v22 = vmul.f32 %v2727_v38, %v2691_v49 }
0x1458   :  { %v2730_v21 = vmul.f32 0.5, %v2726_v18  ;;  %v2732_v27 = vmul.f32 %v2728_v19, %v2693_v53 }
0x1459   :  { %v2733_v26 = vmul.f32 %v2729_v20, %v2695_v54  ;;  %v3881_v54 = vld [vmem:[%s4656_s16 + $0x20] sm:$0xff]  }
0x145a   :  { %v2734_v28 = vmul.f32 %v2730_v21, %v2697_v24  ;;  %3639 = vmatpush3.bf16.msra.mxu1 %v3881_v54  ;;  %v3884_v24 = vld [vmem:[%s4656_s16 + $0x38] sm:$0xff]  }
0x145b   :  { %v2735_v29 = vpack.c.bf16 %v2733_v26, %v2731_v22  ;;  %3640 = vmatprep.subr.bf16.mxu1 %v4013_v43 }
0x145c   :  { %v2736_v30 = vpack.c.bf16 %v2734_v28, %v2732_v27 }
0x145e   :  { %2906 = vmatprep.mubr.bf16.mxu0 %v2736_v30  ;;  %3641 = vmatpush3.bf16.msra.mxu1 %v3882_v55 }
0x145f   :  { %2907 = vmatmul.mubr.bf16.vlgmr.msra.gmra.mrb[48].mxu0 %v2735_v29  ;;  %3642 = vmatprep.subr.bf16.mxu1 %v4013_v43 }
0x1462   :  { %3643 = vmatpush3.bf16.msra.mxu1 %v3883_v56 }
0x1463   :  { %3644 = vmatprep.subr.bf16.mxu1 %v4013_v43  ;;  %v3314_v43 = vld [vmem:[%s4655_s15 + $0x1] ss:$0 sm:$0xff] }
0x1466   :  { %3645 = vmatpush3.bf16.msra.mxu1 %v3884_v24 }
0x1532   :  { %v3439_v31 = vpop.f32.mrb[48].mxu0 }
0x1533   :  { %v3440_v33 = vpop.f32.mrb[49].mxu0 }
0x1534   :  { %v3441_v13 = vadd.f32 %v3440_v33, %v3439_v31  ;;  %v3442_v34 = vpop.f32.mrb[50].mxu0 }
0x1535   :  { %v3443_v35 = vpop.f32.mrb[51].mxu0 }
0x1536   :  { %v2909_v39 = vadd.f32 %v3441_v13, %v3294_v32  ;;  %v3444_v8 = vadd.f32 %v3443_v35, %v3442_v34 }
0x1538   :  { %v2912_v40 = vadd.f32 %v3444_v8, %v3294_v32  ;;  %v2915_v42 = vadd.f32 %v2909_v39, %v4579_v23 }
0x153a   :  { %2921 = vadd.xlane.f32.xlu0 %v2915_v42  ;;  %v2916_v44 = vadd.f32 %v2912_v40, %v4581_v25 }
0x153c   :  { %2923 = vadd.xlane.f32.xlu1 %v2916_v44 }
0x15c7   :  { %v2922_v11 = vpop.xlane.xlu0 %2921 }
0x15c8   :  { %v2925_v23 = vmul.f32 0.0078125, %v2922_v11 }
0x15c9   :  { %v2924_v47 = vpop.xlane.xlu1 %2923 }
0x15ca   :  { %v2927_v48 = vsub.f32 %v2915_v42, %v2925_v23  ;;  %v2926_v25 = vmul.f32 0.0078125, %v2924_v47 }
0x15cc   :  { %v2928_v49 = vsub.f32 %v2916_v44, %v2926_v25  ;;  %v2929_v51 = vmul.f32 %v2927_v48, %v2927_v48 }
0x15ce   :  { %2931 = vadd.xlane.f32.xlu0 %v2929_v51  ;;  %v2930_v53 = vmul.f32 %v2928_v49, %v2928_v49 }
0x15d0   :  { %2933 = vadd.xlane.f32.xlu1 %v2930_v53 }
0x165b   :  { %v2932_v57 = vpop.xlane.xlu0 %2931 }
0x165c   :  { %v2935_v60 = vmul.f32 0.0078125, %v2932_v57 }
0x165d   :  { %v2934_v6 = vpop.xlane.xlu1 %2933 }
0x165e   :  { %v2937_v41 = vadd.f32 1e-12, %v2935_v60  ;;  %v2936_v58 = vmul.f32 0.0078125, %v2934_v6 }
0x1660   :  { %3949 = vrsqrt.f32 %v2937_v41  ;;  %v2938_v59 = vadd.f32 1e-12, %v2936_v58 }
0x1662   :  { %3951 = vrsqrt.f32 %v2938_v59 }
0x166a   :  { %v3950_v61 = vpop.eup %3949 }
0x166b   :  { %v2941_v62 = vmul.f32 %v3950_v61, %v2927_v48 }
0x166c   :  { %v3952_v10 = vpop.eup %3951 }
0x166d   :  { %v2942_v63 = vmul.f32 %v3952_v10, %v2928_v49  ;;  %v2949_v0 = vmul.f32 %v3313_v7, %v2941_v62 }
0x166f   :  { %v2950_v1 = vmul.f32 %v3313_v7, %v2942_v63  ;;  %v2957_v2 = vadd.f32 %v3314_v43, %v2949_v0 }
0x1671   :  { %v2958_v4 = vadd.f32 %v3314_v43, %v2950_v1 }
0x1673   :  { %v2959_v5 = vpack.c.bf16 %v2958_v4, %v2957_v2 }
0x1675   :  { %3647 = vmatmul.mubr.bf16.vlgmr.msra.gmra.mrb[60].mxu1 %v2959_v5 }
0x1748   :  { %v3065_v36 = vpop.f32.mrb[60].mxu1 }
0x1749   :  { %v3066_v12 = vadd.f32 %v3315_v9, %v3065_v36  ;;  %v3648_v14 = vpop.f32.mrb[61].mxu1 }
0x174a   :  { %v3068_v52 = vpop.f32.mrb[62].mxu1 }
0x174b   :  { %v3069_v15 = vadd.f32 %v3315_v9, %v3068_v52  ;;  %v3649_v37 = vpop.f32.mrb[63].mxu1  ;;  %3953 = vtanh.f32 %v3066_v12 }
0x174d   :  { %3955 = vtanh.f32 %v3069_v15 }
0x1755   :  { %v3954_v16 = vpop.eup %3953 }
0x1757   :  { %v3956_v38 = vpop.eup %3955 }
0x1758   :  { %v3331_v17 = vpack.c.bf16 %v3956_v38, %v3954_v16 }
0x175a   :  { %3332 = vst [vmem:[%s4658_s18] sm:$0xff] %v3331_v17  }
0x175b   :  { %3088 = vsyncpa [#allocation3], 1 }
0x175c   :  { %3089 = vsyncpa [#allocation5], 1 }

</bundles_post_ra>
